<compile_context>
chip_gen: v7x
topology: tpu7x:2x2x1
jax: 0.10.0
libtpu: 0.0.40
codegen_flags: <defaults>
</compile_context>

<pallas_src>
import functools

import jax
import jax.numpy as jnp
from jax import lax
from jax.experimental import pallas as pl
from jax.experimental.pallas import tpu as pltpu


# (kernel, stride, padding) for the 5 Conv1d layers of CPCEncoder.
LAYER_CFG = [
    (10, 5, 3),
    (8, 4, 2),
    (4, 2, 1),
    (4, 2, 1),
    (4, 2, 1),
]
DOWNSAMPLING = 160
EPS = 1e-5


# ---------------------------------------------------------------------------
# Small helpers
# ---------------------------------------------------------------------------
def _round_up(v, m):
    return ((v + m - 1) // m) * m


@functools.lru_cache(maxsize=None)
def _tile_config():
    """(tm_target, vmem_limit_bytes) adapted to this chip's per-core VMEM."""
    cap = 64 * 1024 * 1024
    try:
        info = pltpu.get_tpu_info()
        cap = int(getattr(info, "vmem_capacity_bytes", cap) or cap)
    except Exception:
        pass
    if cap >= 100 * 1024 * 1024:          # v5e / v6e: 128 MiB per core
        return 1024, 96 * 1024 * 1024
    return 512, 44 * 1024 * 1024          # v7x: 64 MiB per core, 2 TCs


def _choose_tm(t_out, batch, target):
    """Row-tile size: multiple of 8, VMEM-friendly, prefers dividing t_out, and
    (at batch==1) leaves >= 2 row blocks so dual-TC chips can split the grid."""
    if batch == 1 and t_out > 16:
        target = min(target, max(8, _round_up(pl.cdiv(t_out, 2), 8)))
    t8 = _round_up(max(t_out, 1), 8)
    if t8 <= target:
        return t8
    for cand in range(target, 7, -8):     # prefer no padded output rows
        if t_out % cand == 0:
            return cand
    return target


def _const_spec(block_shape, index_map):
    """BlockSpec for an operand whose block index never changes: fetch once and
    keep a single VMEM buffer (pl.Buffered(1)) when the API supports it."""
    buffered = getattr(pl, "Buffered", None)
    if buffered is not None:
        try:
            return pl.BlockSpec(block_shape, index_map,
                                pipeline_mode=buffered(1))
        except TypeError:
            pass
    return pl.BlockSpec(block_shape, index_map)


# ---------------------------------------------------------------------------
# Pallas kernel: fused Conv1d(K=2*stride) + ChannelNorm + ReLU, im2col in VMEM
# ---------------------------------------------------------------------------
def _fused_layer_kernel(a_ref, b_ref, w_ref, bias_ref, g_ref, beta_ref, o_ref,
                        *, s_chunk, eps):
    """One (tm, H) output tile.

    a_ref    : (tm, s*C)   stride-chunk rows t = i*tm .. i*tm+tm-1
    b_ref    : (8,  s*C)   first rows of the NEXT row block (row i*tm+tm, ...)
    w_ref    : (2*s*C, H)  conv weight, tap-major / channel-minor rows
    bias_ref : (1, H)      conv bias          (f32)
    g_ref    : (1, H)      ChannelNorm weight (f32)
    beta_ref : (1, H)      ChannelNorm bias   (f32)
    o_ref    : (tm, H)     output tile
    Output row t uses chunk rows t (top weight half) and t+1 (bottom half).
    """
    x0 = a_ref[...]
    w_top = w_ref[:s_chunk, :]
    w_bot = w_ref[s_chunk:, :]
    z_top = jnp.dot(x0, w_top, preferred_element_type=jnp.float32)   # (tm, H)
    z_bot = jnp.dot(x0, w_bot, preferred_element_type=jnp.float32)   # (tm, H)
    # Contribution of chunk row i*tm+tm (first row of the next block), needed
    # by the last output row of this tile.
    z_next = jnp.dot(b_ref[...], w_bot, preferred_element_type=jnp.float32)
    # Output row t needs z_bot of chunk row t+1 -> shift up by one row.
    z_bot = jnp.concatenate([z_bot[1:, :], z_next[:1, :]], axis=0)
    y = z_top + z_bot + bias_ref[...]

    h = y.shape[-1]
    mean = jnp.mean(y, axis=-1, keepdims=True)
    d = y - mean
    # torch.var default is unbiased (correction=1)
    var = jnp.sum(d * d, axis=-1, keepdims=True) * (1.0 / (h - 1))
    z = d * lax.rsqrt(var + eps) * g_ref[...] + beta_ref[...]
    o_ref[...] = jnp.maximum(z, 0.0).astype(o_ref.dtype)


def fused_conv_cn_relu_layer(x_tlc, layer_params, k, s, p, *,
                             operand_dtype=jnp.bfloat16,
                             out_dtype=jnp.bfloat16, eps=EPS):
    """x_tlc: (B, T_in, C) channel-last -> (B, T_out, H), one fused Pallas call."""
    w, bias, gamma, beta = layer_params              # w: (H, C, K) PyTorch layout
    B, T_in, C = x_tlc.shape
    H = w.shape[0]
    assert w.shape[1] == C and w.shape[2] == k and k == 2 * s, (w.shape, k, s)
    T_out = (T_in + 2 * p - k) // s + 1

    tm_target, vmem_limit = _tile_config()
    tm = _choose_tm(T_out, B, tm_target)
    n_blk = pl.cdiv(T_out, tm)
    r_total = (n_blk + 1) * tm                       # +1 block for shifted view
    sC = s * C

    # Zero-pad so (a) the conv's left padding lines up with stride-chunk
    # boundaries and (b) the shifted-view block i+1 is always in bounds, then
    # view the activation as stride-chunk rows of s*C values (reshape is free).
    back = r_total * s - T_in - p
    x_pad = jnp.pad(x_tlc.astype(operand_dtype), ((0, 0), (p, back), (0, 0)))
    x_r = x_pad.reshape(B, r_total, sC)

    # (H, C, K) -> (K*C, H), tap-major / channel-minor to match the chunk rows.
    w2 = jnp.transpose(w, (2, 1, 0)).reshape(k * C, H).astype(operand_dtype)

    blk8 = tm // 8
    kernel = functools.partial(_fused_layer_kernel, s_chunk=sC, eps=eps)

    in_isz = jnp.dtype(operand_dtype).itemsize
    out_isz = jnp.dtype(out_dtype).itemsize
    m_rows = B * n_blk * tm
    cost = pl.CostEstimate(
        flops=int(2 * m_rows * (2 * sC) * H + 8 * m_rows * H),
        transcendentals=int(m_rows),
        bytes_accessed=int((m_rows + B * n_blk * 8) * sC * in_isz
                           + 2 * sC * H * in_isz + 3 * H * 4
                           + m_rows * H * out_isz),
    )

    out = pl.pallas_call(
        kernel,
        out_shape=jax.ShapeDtypeStruct((B, n_blk * tm, H), out_dtype),
        grid_spec=pltpu.PrefetchScalarGridSpec(
            num_scalar_prefetch=0,
            grid=(B, n_blk),
            in_specs=[
                # row block i of the chunked activation
                pl.BlockSpec((None, tm, sC), lambda b, i: (b, i, 0)),
                # first 8 rows of row block i+1 (same HBM buffer, tiny DMA)
                pl.BlockSpec((None, 8, sC), lambda b, i: (b, (i + 1) * blk8, 0)),
                # constant-index operands: fetched once, single VMEM buffer
                _const_spec((2 * sC, H), lambda b, i: (0, 0)),
                _const_spec((1, H), lambda b, i: (0, 0)),
                _const_spec((1, H), lambda b, i: (0, 0)),
                _const_spec((1, H), lambda b, i: (0, 0)),
            ],
            out_specs=pl.BlockSpec((None, tm, H), lambda b, i: (b, i, 0)),
        ),
        compiler_params=pltpu.CompilerParams(
            dimension_semantics=("parallel", "parallel"),
            vmem_limit_bytes=vmem_limit),
        cost_estimate=cost,
    )(x_r, x_r, w2,
      bias.reshape(1, H).astype(jnp.float32),
      gamma.reshape(1, H).astype(jnp.float32),
      beta.reshape(1, H).astype(jnp.float32))

    if n_blk * tm != T_out:
        out = out[:, :T_out, :]
    return out


# ---------------------------------------------------------------------------
# Plain-JAX layer (used for layer 0 of the kernel path and for the references)
# ---------------------------------------------------------------------------
def _im2col_tlc(x, k, s, p):
    """x: (B, T, C) -> patches (B, T_out, K*C), tap-major / channel-minor."""
    b, t, c = x.shape
    t_out = (t + 2 * p - k) // s + 1
    xp = jnp.pad(x, ((0, 0), (p, p), (0, 0)))
    taps = [lax.slice(xp, (0, q, 0), (b, q + (t_out - 1) * s + 1, c), (1, s, 1))
            for q in range(k)]
    return jnp.stack(taps, axis=2).reshape(b, t_out, k * c), t_out


def _layer_jax(x_tlc, layer_params, k, s, p, *, op_dtype, precision=None,
               eps=EPS):
    w, bias, gamma, beta = layer_params
    b = x_tlc.shape[0]
    h = w.shape[0]
    patches, t_out = _im2col_tlc(x_tlc, k, s, p)
    w2 = jnp.transpose(w, (2, 1, 0)).reshape(k * w.shape[1], h)
    y = jnp.dot(patches.reshape(b * t_out, -1).astype(op_dtype),
                w2.astype(op_dtype),
                preferred_element_type=jnp.float32, precision=precision)
    y = y + bias[None, :]
    mean = jnp.mean(y, axis=-1, keepdims=True)
    d = y - mean
    var = jnp.sum(d * d, axis=-1, keepdims=True) * (1.0 / (h - 1))
    z = d * lax.rsqrt(var + eps) * gamma[None, :] + beta[None, :]
    return jnp.maximum(z, 0.0).reshape(b, t_out, h)


# ---------------------------------------------------------------------------
# Encoder forward (Pallas path) and plain-JAX reference
# ---------------------------------------------------------------------------
def cpc_encoder_forward(x, params, compute_dtype=jnp.bfloat16):
    """x: (B, 1, T_wave) NCW -> (B, hidden_dim, T_wave // 160) NCW."""
    n = len(LAYER_CFG)
    k, s, p = LAYER_CFG[0]
    # Layer 0 (C_in=1, K=10): a K=10 contraction wastes the MXU, keep it in
    # f32 XLA.  TODO(synk): fuse layer 0 into layer 1's Pallas kernel.
    h = _layer_jax(jnp.transpose(x, (0, 2, 1)), params[0], k, s, p,
                   op_dtype=jnp.float32, precision=lax.Precision.HIGHEST)
    for li in range(1, n):
        k, s, p = LAYER_CFG[li]
        out_dtype = jnp.float32 if li == n - 1 else compute_dtype
        h = fused_conv_cn_relu_layer(h, params[li], k, s, p,
                                     operand_dtype=compute_dtype,
                                     out_dtype=out_dtype)
    return jnp.transpose(h, (0, 2, 1))


def cpc_encoder_reference(x, params, compute_dtype=jnp.float32):
    """Plain-JAX reference.  compute_dtype=f32 -> PyTorch-equivalent math;
    compute_dtype=bf16 -> applies the same operand casts as the kernel path."""
    n = len(LAYER_CFG)
    h = jnp.transpose(x, (0, 2, 1))
    for li, ((k, s, p), lp) in enumerate(zip(LAYER_CFG, params)):
        if li == 0:
            op_dt, prec = jnp.float32, lax.Precision.HIGHEST
        else:
            op_dt = compute_dtype
            prec = lax.Precision.HIGHEST if op_dt == jnp.float32 else None
        h = _layer_jax(h, lp, k, s, p, op_dtype=op_dt, precision=prec)
        if li < n - 1:
            h = h.astype(compute_dtype)
    return jnp.transpose(h, (0, 2, 1))


def init_params(hidden_dim, key):
    """Deterministic synthetic parameters (small perturbations on the affine
    ChannelNorm params so the affine path is actually exercised)."""
    params = []
    c_in = 1
    for (k, _, _) in LAYER_CFG:
        key, k1, k2, k3, k4 = jax.random.split(key, 5)
        w = 0.1 * jax.random.normal(k1, (hidden_dim, c_in, k), jnp.float32)
        b = 0.1 * jax.random.normal(k2, (hidden_dim,), jnp.float32)
        gamma = 1.0 + 0.1 * jax.random.normal(k3, (hidden_dim,), jnp.float32)
        beta = 0.1 * jax.random.normal(k4, (hidden_dim,), jnp.float32)
        params.append((w, b, gamma, beta))
        c_in = hidden_dim
    return params


if __name__ == "__main__":
    key = jax.random.PRNGKey(0)
    hidden_dim = 128          # small stand-in for the default 512; multiple of
                              # 128 so output stores stay lane-dense
    B, T_wave = 2, 3200       # DOWNSAMPLING = 160 -> T_feat = 20

    key, kx, kp = jax.random.split(key, 3)
    x = jax.random.normal(kx, (B, 1, T_wave), jnp.float32)
    params = init_params(hidden_dim, kp)

    fwd = jax.jit(functools.partial(cpc_encoder_forward,
                                    compute_dtype=jnp.bfloat16))
    out = jax.block_until_ready(fwd(x, params))
    assert out.shape == (B, hidden_dim, T_wave // DOWNSAMPLING), out.shape
    assert bool(jnp.all(jnp.isfinite(out)))

    # (1) tight check vs a reference applying the exact same bf16 operand casts
    ref_cast = jax.jit(functools.partial(cpc_encoder_reference,
                                         compute_dtype=jnp.bfloat16))(x, params)
    ref_cast = jax.block_until_ready(ref_cast)
    err_cast = float(jnp.max(jnp.abs(out - ref_cast.astype(jnp.float32))))
    assert err_cast < 2e-2, f"mismatch vs same-cast reference: {err_cast}"

    # (2) drift check vs a pure-f32 (PyTorch-equivalent) reference
    ref_f32 = jax.block_until_ready(jax.jit(cpc_encoder_reference)(x, params))
    diff = jnp.abs(out - ref_f32)
    max_d, mean_d = float(jnp.max(diff)), float(jnp.mean(diff))
    assert mean_d < 3e-2 and max_d < 5e-1, (mean_d, max_d)

    print("KERNEL_OK")
</pallas_src>

<mosaic_0001>
module attributes {stable_mosaic.version = 11 : i64} {
  func.func @_fused_layer_kernel(%arg0: i32, %arg1: i32, %arg2: memref<1x160x512xbf16, #tpu.memory_space<vmem>>, %arg3: memref<1x8x512xbf16, #tpu.memory_space<vmem>>, %arg4: memref<1024x128xbf16, #tpu.memory_space<vmem>>, %arg5: memref<1x128xf32, #tpu.memory_space<vmem>>, %arg6: memref<1x128xf32, #tpu.memory_space<vmem>>, %arg7: memref<1x128xf32, #tpu.memory_space<vmem>>, %arg8: memref<1x160x128xbf16, #tpu.memory_space<vmem>>) attributes {dimension_semantics = [#tpu.dimension_semantics<parallel>, #tpu.dimension_semantics<parallel>], iteration_bounds = array<i64: 2, 1>, scalar_prefetch = 0 : i64, scratch_operands = 0 : i64, tpu.core_type = #tpu.core_type<tc>, window_params = [{transform_indices = @transform_0, window_bounds = array<i64: 1, 160, 512>}, {transform_indices = @transform_1, window_bounds = array<i64: 1, 8, 512>}, {pipeline_mode = #tpu.pipeline_mode<synchronous>, transform_indices = @transform_2, window_bounds = array<i64: 1024, 128>}, {pipeline_mode = #tpu.pipeline_mode<synchronous>, transform_indices = @transform_3, window_bounds = array<i64: 1, 128>}, {pipeline_mode = #tpu.pipeline_mode<synchronous>, transform_indices = @transform_4, window_bounds = array<i64: 1, 128>}, {pipeline_mode = #tpu.pipeline_mode<synchronous>, transform_indices = @transform_5, window_bounds = array<i64: 1, 128>}, {transform_indices = @transform_6, window_bounds = array<i64: 1, 160, 128>}]} {
    %c0 = arith.constant 0 : index
    %c0_0 = arith.constant 0 : index
    %c0_1 = arith.constant 0 : index
    %0 = vector.load %arg2[%c0, %c0_0, %c0_1] : memref<1x160x512xbf16, #tpu.memory_space<vmem>>, vector<1x160x512xbf16>
    %1 = vector.shape_cast %0 : vector<1x160x512xbf16> to vector<160x512xbf16>
    %c0_2 = arith.constant 0 : index
    %c0_3 = arith.constant 0 : index
    %2 = vector.load %arg4[%c0_2, %c0_3] : memref<1024x128xbf16, #tpu.memory_space<vmem>>, vector<512x128xbf16>
    %c512 = arith.constant 512 : index
    %c0_4 = arith.constant 0 : index
    %3 = vector.load %arg4[%c512, %c0_4] : memref<1024x128xbf16, #tpu.memory_space<vmem>>, vector<512x128xbf16>
    %cst = arith.constant dense<0.000000e+00> : vector<160x128xf32>
    %4 = tpu.matmul %1, %2, %cst {dimension_numbers = #tpu.dot_dimension_numbers<[1], [0], [0], [1], [0, 0, 1, 1], [], []>} : vector<160x512xbf16>, vector<512x128xbf16>, vector<160x128xf32> -> vector<160x128xf32>
    %cst_5 = arith.constant dense<0.000000e+00> : vector<160x128xf32>
    %5 = tpu.matmul %1, %3, %cst_5 {dimension_numbers = #tpu.dot_dimension_numbers<[1], [0], [0], [1], [0, 0, 1, 1], [], []>} : vector<160x512xbf16>, vector<512x128xbf16>, vector<160x128xf32> -> vector<160x128xf32>
    %c0_6 = arith.constant 0 : index
    %c0_7 = arith.constant 0 : index
    %c0_8 = arith.constant 0 : index
    %6 = vector.load %arg3[%c0_6, %c0_7, %c0_8] : memref<1x8x512xbf16, #tpu.memory_space<vmem>>, vector<1x8x512xbf16>
    %7 = vector.shape_cast %6 : vector<1x8x512xbf16> to vector<8x512xbf16>
    %cst_9 = arith.constant dense<0.000000e+00> : vector<8x128xf32>
    %8 = tpu.matmul %7, %3, %cst_9 {dimension_numbers = #tpu.dot_dimension_numbers<[1], [0], [0], [1], [0, 0, 1, 1], [], []>} : vector<8x512xbf16>, vector<512x128xbf16>, vector<8x128xf32> -> vector<8x128xf32>
    %9 = vector.extract_strided_slice %5 {offsets = [1, 0], sizes = [159, 128], strides = [1, 1]} : vector<160x128xf32> to vector<159x128xf32>
    %10 = vector.extract_strided_slice %8 {offsets = [0, 0], sizes = [1, 128], strides = [1, 1]} : vector<8x128xf32> to vector<1x128xf32>
    %11 = tpu.concatenate %9, %10 in 0 : vector<159x128xf32>, vector<1x128xf32> -> vector<160x128xf32>
    %12 = arith.addf %4, %11 : vector<160x128xf32>
    %c0_10 = arith.constant 0 : index
    %c0_11 = arith.constant 0 : index
    %13 = vector.load %arg5[%c0_10, %c0_11] : memref<1x128xf32, #tpu.memory_space<vmem>>, vector<1x128xf32>
    %14 = vector.broadcast %13 : vector<1x128xf32> to vector<160x128xf32>
    %15 = arith.addf %12, %14 : vector<160x128xf32>
    %cst_12 = arith.constant dense<0.000000e+00> : vector<160xf32>
    %16 = vector.multi_reduction <add>, %15, %cst_12 [1] : vector<160x128xf32> to vector<160xf32>
    %17 = vector.shape_cast %16 : vector<160xf32> to vector<160x1xf32>
    %cst_13 = arith.constant 1.280000e+02 : f32
    %18 = vector.broadcast %cst_13 : f32 to vector<160x1xf32>
    %19 = arith.divf %17, %18 : vector<160x1xf32>
    %20 = vector.broadcast %19 : vector<160x1xf32> to vector<160x128xf32>
    %21 = arith.subf %15, %20 : vector<160x128xf32>
    %22 = arith.mulf %21, %21 : vector<160x128xf32>
    %cst_14 = arith.constant dense<0.000000e+00> : vector<160xf32>
    %23 = vector.multi_reduction <add>, %22, %cst_14 [1] : vector<160x128xf32> to vector<160xf32>
    %24 = vector.shape_cast %23 : vector<160xf32> to vector<160x1xf32>
    %cst_15 = arith.constant 0.00787401571 : f32
    %25 = vector.broadcast %cst_15 : f32 to vector<160x1xf32>
    %26 = arith.mulf %24, %25 : vector<160x1xf32>
    %cst_16 = arith.constant 9.99999974E-6 : f32
    %27 = vector.broadcast %cst_16 : f32 to vector<160x1xf32>
    %28 = arith.addf %26, %27 : vector<160x1xf32>
    %29 = math.rsqrt %28 : vector<160x1xf32>
    %30 = vector.broadcast %29 : vector<160x1xf32> to vector<160x128xf32>
    %31 = arith.mulf %21, %30 : vector<160x128xf32>
    %c0_17 = arith.constant 0 : index
    %c0_18 = arith.constant 0 : index
    %32 = vector.load %arg6[%c0_17, %c0_18] : memref<1x128xf32, #tpu.memory_space<vmem>>, vector<1x128xf32>
    %33 = vector.broadcast %32 : vector<1x128xf32> to vector<160x128xf32>
    %34 = arith.mulf %31, %33 : vector<160x128xf32>
    %c0_19 = arith.constant 0 : index
    %c0_20 = arith.constant 0 : index
    %35 = vector.load %arg7[%c0_19, %c0_20] : memref<1x128xf32, #tpu.memory_space<vmem>>, vector<1x128xf32>
    %36 = vector.broadcast %35 : vector<1x128xf32> to vector<160x128xf32>
    %37 = arith.addf %34, %36 : vector<160x128xf32>
    %cst_21 = arith.constant 0.000000e+00 : f32
    %38 = vector.broadcast %cst_21 : f32 to vector<160x128xf32>
    %39 = arith.maximumf %37, %38 : vector<160x128xf32>
    %40 = arith.truncf %39 : vector<160x128xf32> to vector<160x128xbf16>
    %c0_22 = arith.constant 0 : index
    %c0_23 = arith.constant 0 : index
    %c0_24 = arith.constant 0 : index
    %41 = vector.load %arg8[%c0_22, %c0_23, %c0_24] : memref<1x160x128xbf16, #tpu.memory_space<vmem>>, vector<1x160x128xbf16>
    %42 = vector.shape_cast %41 : vector<1x160x128xbf16> to vector<160x128xbf16>
    %43 = vector.shape_cast %40 : vector<160x128xbf16> to vector<1x160x128xbf16>
    tpu.vector_store %arg8[%c0_22, %c0_23, %c0_24], %43 {strides = array<i32>} : memref<1x160x128xbf16, #tpu.memory_space<vmem>>, vector<1x160x128xbf16>,
    return
  }
  func.func @transform_0(%arg0: i32, %arg1: i32) -> (i32, i32, i32) {
    %c0_i32 = arith.constant 0 : i32
    %c0_i32_0 = arith.constant 0 : i32
    return %arg0, %arg1, %c0_i32 : i32, i32, i32
  }
  func.func @transform_1(%arg0: i32, %arg1: i32) -> (i32, i32, i32) {
    %c1_i32 = arith.constant 1 : i32
    %0 = arith.addi %arg1, %c1_i32 : i32
    %c20_i32 = arith.constant 20 : i32
    %1 = arith.muli %0, %c20_i32 : i32
    %c0_i32 = arith.constant 0 : i32
    %c0_i32_0 = arith.constant 0 : i32
    return %arg0, %1, %c0_i32 : i32, i32, i32
  }
  func.func @transform_2(%arg0: i32, %arg1: i32) -> (i32, i32) {
    %c0_i32 = arith.constant 0 : i32
    %c0_i32_0 = arith.constant 0 : i32
    %c0_i32_1 = arith.constant 0 : i32
    return %c0_i32, %c0_i32_0 : i32, i32
  }
  func.func @transform_3(%arg0: i32, %arg1: i32) -> (i32, i32) {
    %c0_i32 = arith.constant 0 : i32
    %c0_i32_0 = arith.constant 0 : i32
    %c0_i32_1 = arith.constant 0 : i32
    return %c0_i32, %c0_i32_0 : i32, i32
  }
  func.func @transform_4(%arg0: i32, %arg1: i32) -> (i32, i32) {
    %c0_i32 = arith.constant 0 : i32
    %c0_i32_0 = arith.constant 0 : i32
    %c0_i32_1 = arith.constant 0 : i32
    return %c0_i32, %c0_i32_0 : i32, i32
  }
  func.func @transform_5(%arg0: i32, %arg1: i32) -> (i32, i32) {
    %c0_i32 = arith.constant 0 : i32
    %c0_i32_0 = arith.constant 0 : i32
    %c0_i32_1 = arith.constant 0 : i32
    return %c0_i32, %c0_i32_0 : i32, i32
  }
  func.func @transform_6(%arg0: i32, %arg1: i32) -> (i32, i32, i32) {
    %c0_i32 = arith.constant 0 : i32
    %c0_i32_0 = arith.constant 0 : i32
    return %arg0, %arg1, %c0_i32 : i32, i32, i32
  }
}

module attributes {stable_mosaic.version = 11 : i64} {
  func.func @_fused_layer_kernel(%arg0: i32, %arg1: i32, %arg2: memref<1x80x256xbf16, #tpu.memory_space<vmem>>, %arg3: memref<1x8x256xbf16, #tpu.memory_space<vmem>>, %arg4: memref<512x128xbf16, #tpu.memory_space<vmem>>, %arg5: memref<1x128xf32, #tpu.memory_space<vmem>>, %arg6: memref<1x128xf32, #tpu.memory_space<vmem>>, %arg7: memref<1x128xf32, #tpu.memory_space<vmem>>, %arg8: memref<1x80x128xbf16, #tpu.memory_space<vmem>>) attributes {dimension_semantics = [#tpu.dimension_semantics<parallel>, #tpu.dimension_semantics<parallel>], iteration_bounds = array<i64: 2, 1>, scalar_prefetch = 0 : i64, scratch_operands = 0 : i64, tpu.core_type = #tpu.core_type<tc>, window_params = [{transform_indices = @transform_0, window_bounds = array<i64: 1, 80, 256>}, {transform_indices = @transform_1, window_bounds = array<i64: 1, 8, 256>}, {pipeline_mode = #tpu.pipeline_mode<synchronous>, transform_indices = @transform_2, window_bounds = array<i64: 512, 128>}, {pipeline_mode = #tpu.pipeline_mode<synchronous>, transform_indices = @transform_3, window_bounds = array<i64: 1, 128>}, {pipeline_mode = #tpu.pipeline_mode<synchronous>, transform_indices = @transform_4, window_bounds = array<i64: 1, 128>}, {pipeline_mode = #tpu.pipeline_mode<synchronous>, transform_indices = @transform_5, window_bounds = array<i64: 1, 128>}, {transform_indices = @transform_6, window_bounds = array<i64: 1, 80, 128>}]} {
    %c0 = arith.constant 0 : index
    %c0_0 = arith.constant 0 : index
    %c0_1 = arith.constant 0 : index
    %0 = vector.load %arg2[%c0, %c0_0, %c0_1] : memref<1x80x256xbf16, #tpu.memory_space<vmem>>, vector<1x80x256xbf16>
    %1 = vector.shape_cast %0 : vector<1x80x256xbf16> to vector<80x256xbf16>
    %c0_2 = arith.constant 0 : index
    %c0_3 = arith.constant 0 : index
    %2 = vector.load %arg4[%c0_2, %c0_3] : memref<512x128xbf16, #tpu.memory_space<vmem>>, vector<256x128xbf16>
    %c256 = arith.constant 256 : index
    %c0_4 = arith.constant 0 : index
    %3 = vector.load %arg4[%c256, %c0_4] : memref<512x128xbf16, #tpu.memory_space<vmem>>, vector<256x128xbf16>
    %cst = arith.constant dense<0.000000e+00> : vector<80x128xf32>
    %4 = tpu.matmul %1, %2, %cst {dimension_numbers = #tpu.dot_dimension_numbers<[1], [0], [0], [1], [0, 0, 1, 1], [], []>} : vector<80x256xbf16>, vector<256x128xbf16>, vector<80x128xf32> -> vector<80x128xf32>
    %cst_5 = arith.constant dense<0.000000e+00> : vector<80x128xf32>
    %5 = tpu.matmul %1, %3, %cst_5 {dimension_numbers = #tpu.dot_dimension_numbers<[1], [0], [0], [1], [0, 0, 1, 1], [], []>} : vector<80x256xbf16>, vector<256x128xbf16>, vector<80x128xf32> -> vector<80x128xf32>
    %c0_6 = arith.constant 0 : index
    %c0_7 = arith.constant 0 : index
    %c0_8 = arith.constant 0 : index
    %6 = vector.load %arg3[%c0_6, %c0_7, %c0_8] : memref<1x8x256xbf16, #tpu.memory_space<vmem>>, vector<1x8x256xbf16>
    %7 = vector.shape_cast %6 : vector<1x8x256xbf16> to vector<8x256xbf16>
    %cst_9 = arith.constant dense<0.000000e+00> : vector<8x128xf32>
    %8 = tpu.matmul %7, %3, %cst_9 {dimension_numbers = #tpu.dot_dimension_numbers<[1], [0], [0], [1], [0, 0, 1, 1], [], []>} : vector<8x256xbf16>, vector<256x128xbf16>, vector<8x128xf32> -> vector<8x128xf32>
    %9 = vector.extract_strided_slice %5 {offsets = [1, 0], sizes = [79, 128], strides = [1, 1]} : vector<80x128xf32> to vector<79x128xf32>
    %10 = vector.extract_strided_slice %8 {offsets = [0, 0], sizes = [1, 128], strides = [1, 1]} : vector<8x128xf32> to vector<1x128xf32>
    %11 = tpu.concatenate %9, %10 in 0 : vector<79x128xf32>, vector<1x128xf32> -> vector<80x128xf32>
    %12 = arith.addf %4, %11 : vector<80x128xf32>
    %c0_10 = arith.constant 0 : index
    %c0_11 = arith.constant 0 : index
    %13 = vector.load %arg5[%c0_10, %c0_11] : memref<1x128xf32, #tpu.memory_space<vmem>>, vector<1x128xf32>
    %14 = vector.broadcast %13 : vector<1x128xf32> to vector<80x128xf32>
    %15 = arith.addf %12, %14 : vector<80x128xf32>
    %cst_12 = arith.constant dense<0.000000e+00> : vector<80xf32>
    %16 = vector.multi_reduction <add>, %15, %cst_12 [1] : vector<80x128xf32> to vector<80xf32>
    %17 = vector.shape_cast %16 : vector<80xf32> to vector<80x1xf32>
    %cst_13 = arith.constant 1.280000e+02 : f32
    %18 = vector.broadcast %cst_13 : f32 to vector<80x1xf32>
    %19 = arith.divf %17, %18 : vector<80x1xf32>
    %20 = vector.broadcast %19 : vector<80x1xf32> to vector<80x128xf32>
    %21 = arith.subf %15, %20 : vector<80x128xf32>
    %22 = arith.mulf %21, %21 : vector<80x128xf32>
    %cst_14 = arith.constant dense<0.000000e+00> : vector<80xf32>
    %23 = vector.multi_reduction <add>, %22, %cst_14 [1] : vector<80x128xf32> to vector<80xf32>
    %24 = vector.shape_cast %23 : vector<80xf32> to vector<80x1xf32>
    %cst_15 = arith.constant 0.00787401571 : f32
    %25 = vector.broadcast %cst_15 : f32 to vector<80x1xf32>
    %26 = arith.mulf %24, %25 : vector<80x1xf32>
    %cst_16 = arith.constant 9.99999974E-6 : f32
    %27 = vector.broadcast %cst_16 : f32 to vector<80x1xf32>
    %28 = arith.addf %26, %27 : vector<80x1xf32>
    %29 = math.rsqrt %28 : vector<80x1xf32>
    %30 = vector.broadcast %29 : vector<80x1xf32> to vector<80x128xf32>
    %31 = arith.mulf %21, %30 : vector<80x128xf32>
    %c0_17 = arith.constant 0 : index
    %c0_18 = arith.constant 0 : index
    %32 = vector.load %arg6[%c0_17, %c0_18] : memref<1x128xf32, #tpu.memory_space<vmem>>, vector<1x128xf32>
    %33 = vector.broadcast %32 : vector<1x128xf32> to vector<80x128xf32>
    %34 = arith.mulf %31, %33 : vector<80x128xf32>
    %c0_19 = arith.constant 0 : index
    %c0_20 = arith.constant 0 : index
    %35 = vector.load %arg7[%c0_19, %c0_20] : memref<1x128xf32, #tpu.memory_space<vmem>>, vector<1x128xf32>
    %36 = vector.broadcast %35 : vector<1x128xf32> to vector<80x128xf32>
    %37 = arith.addf %34, %36 : vector<80x128xf32>
    %cst_21 = arith.constant 0.000000e+00 : f32
    %38 = vector.broadcast %cst_21 : f32 to vector<80x128xf32>
    %39 = arith.maximumf %37, %38 : vector<80x128xf32>
    %40 = arith.truncf %39 : vector<80x128xf32> to vector<80x128xbf16>
    %c0_22 = arith.constant 0 : index
    %c0_23 = arith.constant 0 : index
    %c0_24 = arith.constant 0 : index
    %41 = vector.load %arg8[%c0_22, %c0_23, %c0_24] : memref<1x80x128xbf16, #tpu.memory_space<vmem>>, vector<1x80x128xbf16>
    %42 = vector.shape_cast %41 : vector<1x80x128xbf16> to vector<80x128xbf16>
    %43 = vector.shape_cast %40 : vector<80x128xbf16> to vector<1x80x128xbf16>
    tpu.vector_store %arg8[%c0_22, %c0_23, %c0_24], %43 {strides = array<i32>} : memref<1x80x128xbf16, #tpu.memory_space<vmem>>, vector<1x80x128xbf16>,
    return
  }
  func.func @transform_0(%arg0: i32, %arg1: i32) -> (i32, i32, i32) {
    %c0_i32 = arith.constant 0 : i32
    %c0_i32_0 = arith.constant 0 : i32
    return %arg0, %arg1, %c0_i32 : i32, i32, i32
  }
  func.func @transform_1(%arg0: i32, %arg1: i32) -> (i32, i32, i32) {
    %c1_i32 = arith.constant 1 : i32
    %0 = arith.addi %arg1, %c1_i32 : i32
    %c10_i32 = arith.constant 10 : i32
    %1 = arith.muli %0, %c10_i32 : i32
    %c0_i32 = arith.constant 0 : i32
    %c0_i32_0 = arith.constant 0 : i32
    return %arg0, %1, %c0_i32 : i32, i32, i32
  }
  func.func @transform_2(%arg0: i32, %arg1: i32) -> (i32, i32) {
    %c0_i32 = arith.constant 0 : i32
    %c0_i32_0 = arith.constant 0 : i32
    %c0_i32_1 = arith.constant 0 : i32
    return %c0_i32, %c0_i32_0 : i32, i32
  }
  func.func @transform_3(%arg0: i32, %arg1: i32) -> (i32, i32) {
    %c0_i32 = arith.constant 0 : i32
    %c0_i32_0 = arith.constant 0 : i32
    %c0_i32_1 = arith.constant 0 : i32
    return %c0_i32, %c0_i32_0 : i32, i32
  }
  func.func @transform_4(%arg0: i32, %arg1: i32) -> (i32, i32) {
    %c0_i32 = arith.constant 0 : i32
    %c0_i32_0 = arith.constant 0 : i32
    %c0_i32_1 = arith.constant 0 : i32
    return %c0_i32, %c0_i32_0 : i32, i32
  }
  func.func @transform_5(%arg0: i32, %arg1: i32) -> (i32, i32) {
    %c0_i32 = arith.constant 0 : i32
    %c0_i32_0 = arith.constant 0 : i32
    %c0_i32_1 = arith.constant 0 : i32
    return %c0_i32, %c0_i32_0 : i32, i32
  }
  func.func @transform_6(%arg0: i32, %arg1: i32) -> (i32, i32, i32) {
    %c0_i32 = arith.constant 0 : i32
    %c0_i32_0 = arith.constant 0 : i32
    return %arg0, %arg1, %c0_i32 : i32, i32, i32
  }
}

module attributes {stable_mosaic.version = 11 : i64} {
  func.func @_fused_layer_kernel(%arg0: i32, %arg1: i32, %arg2: memref<1x40x256xbf16, #tpu.memory_space<vmem>>, %arg3: memref<1x8x256xbf16, #tpu.memory_space<vmem>>, %arg4: memref<512x128xbf16, #tpu.memory_space<vmem>>, %arg5: memref<1x128xf32, #tpu.memory_space<vmem>>, %arg6: memref<1x128xf32, #tpu.memory_space<vmem>>, %arg7: memref<1x128xf32, #tpu.memory_space<vmem>>, %arg8: memref<1x40x128xbf16, #tpu.memory_space<vmem>>) attributes {dimension_semantics = [#tpu.dimension_semantics<parallel>, #tpu.dimension_semantics<parallel>], iteration_bounds = array<i64: 2, 1>, scalar_prefetch = 0 : i64, scratch_operands = 0 : i64, tpu.core_type = #tpu.core_type<tc>, window_params = [{transform_indices = @transform_0, window_bounds = array<i64: 1, 40, 256>}, {transform_indices = @transform_1, window_bounds = array<i64: 1, 8, 256>}, {pipeline_mode = #tpu.pipeline_mode<synchronous>, transform_indices = @transform_2, window_bounds = array<i64: 512, 128>}, {pipeline_mode = #tpu.pipeline_mode<synchronous>, transform_indices = @transform_3, window_bounds = array<i64: 1, 128>}, {pipeline_mode = #tpu.pipeline_mode<synchronous>, transform_indices = @transform_4, window_bounds = array<i64: 1, 128>}, {pipeline_mode = #tpu.pipeline_mode<synchronous>, transform_indices = @transform_5, window_bounds = array<i64: 1, 128>}, {transform_indices = @transform_6, window_bounds = array<i64: 1, 40, 128>}]} {
    %c0 = arith.constant 0 : index
    %c0_0 = arith.constant 0 : index
    %c0_1 = arith.constant 0 : index
    %0 = vector.load %arg2[%c0, %c0_0, %c0_1] : memref<1x40x256xbf16, #tpu.memory_space<vmem>>, vector<1x40x256xbf16>
    %1 = vector.shape_cast %0 : vector<1x40x256xbf16> to vector<40x256xbf16>
    %c0_2 = arith.constant 0 : index
    %c0_3 = arith.constant 0 : index
    %2 = vector.load %arg4[%c0_2, %c0_3] : memref<512x128xbf16, #tpu.memory_space<vmem>>, vector<256x128xbf16>
    %c256 = arith.constant 256 : index
    %c0_4 = arith.constant 0 : index
    %3 = vector.load %arg4[%c256, %c0_4] : memref<512x128xbf16, #tpu.memory_space<vmem>>, vector<256x128xbf16>
    %cst = arith.constant dense<0.000000e+00> : vector<40x128xf32>
    %4 = tpu.matmul %1, %2, %cst {dimension_numbers = #tpu.dot_dimension_numbers<[1], [0], [0], [1], [0, 0, 1, 1], [], []>} : vector<40x256xbf16>, vector<256x128xbf16>, vector<40x128xf32> -> vector<40x128xf32>
    %cst_5 = arith.constant dense<0.000000e+00> : vector<40x128xf32>
    %5 = tpu.matmul %1, %3, %cst_5 {dimension_numbers = #tpu.dot_dimension_numbers<[1], [0], [0], [1], [0, 0, 1, 1], [], []>} : vector<40x256xbf16>, vector<256x128xbf16>, vector<40x128xf32> -> vector<40x128xf32>
    %c0_6 = arith.constant 0 : index
    %c0_7 = arith.constant 0 : index
    %c0_8 = arith.constant 0 : index
    %6 = vector.load %arg3[%c0_6, %c0_7, %c0_8] : memref<1x8x256xbf16, #tpu.memory_space<vmem>>, vector<1x8x256xbf16>
    %7 = vector.shape_cast %6 : vector<1x8x256xbf16> to vector<8x256xbf16>
    %cst_9 = arith.constant dense<0.000000e+00> : vector<8x128xf32>
    %8 = tpu.matmul %7, %3, %cst_9 {dimension_numbers = #tpu.dot_dimension_numbers<[1], [0], [0], [1], [0, 0, 1, 1], [], []>} : vector<8x256xbf16>, vector<256x128xbf16>, vector<8x128xf32> -> vector<8x128xf32>
    %9 = vector.extract_strided_slice %5 {offsets = [1, 0], sizes = [39, 128], strides = [1, 1]} : vector<40x128xf32> to vector<39x128xf32>
    %10 = vector.extract_strided_slice %8 {offsets = [0, 0], sizes = [1, 128], strides = [1, 1]} : vector<8x128xf32> to vector<1x128xf32>
    %11 = tpu.concatenate %9, %10 in 0 : vector<39x128xf32>, vector<1x128xf32> -> vector<40x128xf32>
    %12 = arith.addf %4, %11 : vector<40x128xf32>
    %c0_10 = arith.constant 0 : index
    %c0_11 = arith.constant 0 : index
    %13 = vector.load %arg5[%c0_10, %c0_11] : memref<1x128xf32, #tpu.memory_space<vmem>>, vector<1x128xf32>
    %14 = vector.broadcast %13 : vector<1x128xf32> to vector<40x128xf32>
    %15 = arith.addf %12, %14 : vector<40x128xf32>
    %cst_12 = arith.constant dense<0.000000e+00> : vector<40xf32>
    %16 = vector.multi_reduction <add>, %15, %cst_12 [1] : vector<40x128xf32> to vector<40xf32>
    %17 = vector.shape_cast %16 : vector<40xf32> to vector<40x1xf32>
    %cst_13 = arith.constant 1.280000e+02 : f32
    %18 = vector.broadcast %cst_13 : f32 to vector<40x1xf32>
    %19 = arith.divf %17, %18 : vector<40x1xf32>
    %20 = vector.broadcast %19 : vector<40x1xf32> to vector<40x128xf32>
    %21 = arith.subf %15, %20 : vector<40x128xf32>
    %22 = arith.mulf %21, %21 : vector<40x128xf32>
    %cst_14 = arith.constant dense<0.000000e+00> : vector<40xf32>
    %23 = vector.multi_reduction <add>, %22, %cst_14 [1] : vector<40x128xf32> to vector<40xf32>
    %24 = vector.shape_cast %23 : vector<40xf32> to vector<40x1xf32>
    %cst_15 = arith.constant 0.00787401571 : f32
    %25 = vector.broadcast %cst_15 : f32 to vector<40x1xf32>
    %26 = arith.mulf %24, %25 : vector<40x1xf32>
    %cst_16 = arith.constant 9.99999974E-6 : f32
    %27 = vector.broadcast %cst_16 : f32 to vector<40x1xf32>
    %28 = arith.addf %26, %27 : vector<40x1xf32>
    %29 = math.rsqrt %28 : vector<40x1xf32>
    %30 = vector.broadcast %29 : vector<40x1xf32> to vector<40x128xf32>
    %31 = arith.mulf %21, %30 : vector<40x128xf32>
    %c0_17 = arith.constant 0 : index
    %c0_18 = arith.constant 0 : index
    %32 = vector.load %arg6[%c0_17, %c0_18] : memref<1x128xf32, #tpu.memory_space<vmem>>, vector<1x128xf32>
    %33 = vector.broadcast %32 : vector<1x128xf32> to vector<40x128xf32>
    %34 = arith.mulf %31, %33 : vector<40x128xf32>
    %c0_19 = arith.constant 0 : index
    %c0_20 = arith.constant 0 : index
    %35 = vector.load %arg7[%c0_19, %c0_20] : memref<1x128xf32, #tpu.memory_space<vmem>>, vector<1x128xf32>
    %36 = vector.broadcast %35 : vector<1x128xf32> to vector<40x128xf32>
    %37 = arith.addf %34, %36 : vector<40x128xf32>
    %cst_21 = arith.constant 0.000000e+00 : f32
    %38 = vector.broadcast %cst_21 : f32 to vector<40x128xf32>
    %39 = arith.maximumf %37, %38 : vector<40x128xf32>
    %40 = arith.truncf %39 : vector<40x128xf32> to vector<40x128xbf16>
    %c0_22 = arith.constant 0 : index
    %c0_23 = arith.constant 0 : index
    %c0_24 = arith.constant 0 : index
    %41 = vector.load %arg8[%c0_22, %c0_23, %c0_24] : memref<1x40x128xbf16, #tpu.memory_space<vmem>>, vector<1x40x128xbf16>
    %42 = vector.shape_cast %41 : vector<1x40x128xbf16> to vector<40x128xbf16>
    %43 = vector.shape_cast %40 : vector<40x128xbf16> to vector<1x40x128xbf16>
    tpu.vector_store %arg8[%c0_22, %c0_23, %c0_24], %43 {strides = array<i32>} : memref<1x40x128xbf16, #tpu.memory_space<vmem>>, vector<1x40x128xbf16>,
    return
  }
  func.func @transform_0(%arg0: i32, %arg1: i32) -> (i32, i32, i32) {
    %c0_i32 = arith.constant 0 : i32
    %c0_i32_0 = arith.constant 0 : i32
    return %arg0, %arg1, %c0_i32 : i32, i32, i32
  }
  func.func @transform_1(%arg0: i32, %arg1: i32) -> (i32, i32, i32) {
    %c1_i32 = arith.constant 1 : i32
    %0 = arith.addi %arg1, %c1_i32 : i32
    %c5_i32 = arith.constant 5 : i32
    %1 = arith.muli %0, %c5_i32 : i32
    %c0_i32 = arith.constant 0 : i32
    %c0_i32_0 = arith.constant 0 : i32
    return %arg0, %1, %c0_i32 : i32, i32, i32
  }
  func.func @transform_2(%arg0: i32, %arg1: i32) -> (i32, i32) {
    %c0_i32 = arith.constant 0 : i32
    %c0_i32_0 = arith.constant 0 : i32
    %c0_i32_1 = arith.constant 0 : i32
    return %c0_i32, %c0_i32_0 : i32, i32
  }
  func.func @transform_3(%arg0: i32, %arg1: i32) -> (i32, i32) {
    %c0_i32 = arith.constant 0 : i32
    %c0_i32_0 = arith.constant 0 : i32
    %c0_i32_1 = arith.constant 0 : i32
    return %c0_i32, %c0_i32_0 : i32, i32
  }
  func.func @transform_4(%arg0: i32, %arg1: i32) -> (i32, i32) {
    %c0_i32 = arith.constant 0 : i32
    %c0_i32_0 = arith.constant 0 : i32
    %c0_i32_1 = arith.constant 0 : i32
    return %c0_i32, %c0_i32_0 : i32, i32
  }
  func.func @transform_5(%arg0: i32, %arg1: i32) -> (i32, i32) {
    %c0_i32 = arith.constant 0 : i32
    %c0_i32_0 = arith.constant 0 : i32
    %c0_i32_1 = arith.constant 0 : i32
    return %c0_i32, %c0_i32_0 : i32, i32
  }
  func.func @transform_6(%arg0: i32, %arg1: i32) -> (i32, i32, i32) {
    %c0_i32 = arith.constant 0 : i32
    %c0_i32_0 = arith.constant 0 : i32
    return %arg0, %arg1, %c0_i32 : i32, i32, i32
  }
}

module attributes {stable_mosaic.version = 11 : i64} {
  func.func @_fused_layer_kernel(%arg0: i32, %arg1: i32, %arg2: memref<1x24x256xbf16, #tpu.memory_space<vmem>>, %arg3: memref<1x8x256xbf16, #tpu.memory_space<vmem>>, %arg4: memref<512x128xbf16, #tpu.memory_space<vmem>>, %arg5: memref<1x128xf32, #tpu.memory_space<vmem>>, %arg6: memref<1x128xf32, #tpu.memory_space<vmem>>, %arg7: memref<1x128xf32, #tpu.memory_space<vmem>>, %arg8: memref<1x24x128xf32, #tpu.memory_space<vmem>>) attributes {dimension_semantics = [#tpu.dimension_semantics<parallel>, #tpu.dimension_semantics<parallel>], iteration_bounds = array<i64: 2, 1>, scalar_prefetch = 0 : i64, scratch_operands = 0 : i64, tpu.core_type = #tpu.core_type<tc>, window_params = [{transform_indices = @transform_0, window_bounds = array<i64: 1, 24, 256>}, {transform_indices = @transform_1, window_bounds = array<i64: 1, 8, 256>}, {pipeline_mode = #tpu.pipeline_mode<synchronous>, transform_indices = @transform_2, window_bounds = array<i64: 512, 128>}, {pipeline_mode = #tpu.pipeline_mode<synchronous>, transform_indices = @transform_3, window_bounds = array<i64: 1, 128>}, {pipeline_mode = #tpu.pipeline_mode<synchronous>, transform_indices = @transform_4, window_bounds = array<i64: 1, 128>}, {pipeline_mode = #tpu.pipeline_mode<synchronous>, transform_indices = @transform_5, window_bounds = array<i64: 1, 128>}, {transform_indices = @transform_6, window_bounds = array<i64: 1, 24, 128>}]} {
    %c0 = arith.constant 0 : index
    %c0_0 = arith.constant 0 : index
    %c0_1 = arith.constant 0 : index
    %0 = vector.load %arg2[%c0, %c0_0, %c0_1] : memref<1x24x256xbf16, #tpu.memory_space<vmem>>, vector<1x24x256xbf16>
    %1 = vector.shape_cast %0 : vector<1x24x256xbf16> to vector<24x256xbf16>
    %c0_2 = arith.constant 0 : index
    %c0_3 = arith.constant 0 : index
    %2 = vector.load %arg4[%c0_2, %c0_3] : memref<512x128xbf16, #tpu.memory_space<vmem>>, vector<256x128xbf16>
    %c256 = arith.constant 256 : index
    %c0_4 = arith.constant 0 : index
    %3 = vector.load %arg4[%c256, %c0_4] : memref<512x128xbf16, #tpu.memory_space<vmem>>, vector<256x128xbf16>
    %cst = arith.constant dense<0.000000e+00> : vector<24x128xf32>
    %4 = tpu.matmul %1, %2, %cst {dimension_numbers = #tpu.dot_dimension_numbers<[1], [0], [0], [1], [0, 0, 1, 1], [], []>} : vector<24x256xbf16>, vector<256x128xbf16>, vector<24x128xf32> -> vector<24x128xf32>
    %cst_5 = arith.constant dense<0.000000e+00> : vector<24x128xf32>
    %5 = tpu.matmul %1, %3, %cst_5 {dimension_numbers = #tpu.dot_dimension_numbers<[1], [0], [0], [1], [0, 0, 1, 1], [], []>} : vector<24x256xbf16>, vector<256x128xbf16>, vector<24x128xf32> -> vector<24x128xf32>
    %c0_6 = arith.constant 0 : index
    %c0_7 = arith.constant 0 : index
    %c0_8 = arith.constant 0 : index
    %6 = vector.load %arg3[%c0_6, %c0_7, %c0_8] : memref<1x8x256xbf16, #tpu.memory_space<vmem>>, vector<1x8x256xbf16>
    %7 = vector.shape_cast %6 : vector<1x8x256xbf16> to vector<8x256xbf16>
    %cst_9 = arith.constant dense<0.000000e+00> : vector<8x128xf32>
    %8 = tpu.matmul %7, %3, %cst_9 {dimension_numbers = #tpu.dot_dimension_numbers<[1], [0], [0], [1], [0, 0, 1, 1], [], []>} : vector<8x256xbf16>, vector<256x128xbf16>, vector<8x128xf32> -> vector<8x128xf32>
    %9 = vector.extract_strided_slice %5 {offsets = [1, 0], sizes = [23, 128], strides = [1, 1]} : vector<24x128xf32> to vector<23x128xf32>
    %10 = vector.extract_strided_slice %8 {offsets = [0, 0], sizes = [1, 128], strides = [1, 1]} : vector<8x128xf32> to vector<1x128xf32>
    %11 = tpu.concatenate %9, %10 in 0 : vector<23x128xf32>, vector<1x128xf32> -> vector<24x128xf32>
    %12 = arith.addf %4, %11 : vector<24x128xf32>
    %c0_10 = arith.constant 0 : index
    %c0_11 = arith.constant 0 : index
    %13 = vector.load %arg5[%c0_10, %c0_11] : memref<1x128xf32, #tpu.memory_space<vmem>>, vector<1x128xf32>
    %14 = vector.broadcast %13 : vector<1x128xf32> to vector<24x128xf32>
    %15 = arith.addf %12, %14 : vector<24x128xf32>
    %cst_12 = arith.constant dense<0.000000e+00> : vector<24xf32>
    %16 = vector.multi_reduction <add>, %15, %cst_12 [1] : vector<24x128xf32> to vector<24xf32>
    %17 = vector.shape_cast %16 : vector<24xf32> to vector<24x1xf32>
    %cst_13 = arith.constant 1.280000e+02 : f32
    %18 = vector.broadcast %cst_13 : f32 to vector<24x1xf32>
    %19 = arith.divf %17, %18 : vector<24x1xf32>
    %20 = vector.broadcast %19 : vector<24x1xf32> to vector<24x128xf32>
    %21 = arith.subf %15, %20 : vector<24x128xf32>
    %22 = arith.mulf %21, %21 : vector<24x128xf32>
    %cst_14 = arith.constant dense<0.000000e+00> : vector<24xf32>
    %23 = vector.multi_reduction <add>, %22, %cst_14 [1] : vector<24x128xf32> to vector<24xf32>
    %24 = vector.shape_cast %23 : vector<24xf32> to vector<24x1xf32>
    %cst_15 = arith.constant 0.00787401571 : f32
    %25 = vector.broadcast %cst_15 : f32 to vector<24x1xf32>
    %26 = arith.mulf %24, %25 : vector<24x1xf32>
    %cst_16 = arith.constant 9.99999974E-6 : f32
    %27 = vector.broadcast %cst_16 : f32 to vector<24x1xf32>
    %28 = arith.addf %26, %27 : vector<24x1xf32>
    %29 = math.rsqrt %28 : vector<24x1xf32>
    %30 = vector.broadcast %29 : vector<24x1xf32> to vector<24x128xf32>
    %31 = arith.mulf %21, %30 : vector<24x128xf32>
    %c0_17 = arith.constant 0 : index
    %c0_18 = arith.constant 0 : index
    %32 = vector.load %arg6[%c0_17, %c0_18] : memref<1x128xf32, #tpu.memory_space<vmem>>, vector<1x128xf32>
    %33 = vector.broadcast %32 : vector<1x128xf32> to vector<24x128xf32>
    %34 = arith.mulf %31, %33 : vector<24x128xf32>
    %c0_19 = arith.constant 0 : index
    %c0_20 = arith.constant 0 : index
    %35 = vector.load %arg7[%c0_19, %c0_20] : memref<1x128xf32, #tpu.memory_space<vmem>>, vector<1x128xf32>
    %36 = vector.broadcast %35 : vector<1x128xf32> to vector<24x128xf32>
    %37 = arith.addf %34, %36 : vector<24x128xf32>
    %cst_21 = arith.constant 0.000000e+00 : f32
    %38 = vector.broadcast %cst_21 : f32 to vector<24x128xf32>
    %39 = arith.maximumf %37, %38 : vector<24x128xf32>
    %c0_22 = arith.constant 0 : index
    %c0_23 = arith.constant 0 : index
    %c0_24 = arith.constant 0 : index
    %40 = vector.load %arg8[%c0_22, %c0_23, %c0_24] : memref<1x24x128xf32, #tpu.memory_space<vmem>>, vector<1x24x128xf32>
    %41 = vector.shape_cast %40 : vector<1x24x128xf32> to vector<24x128xf32>
    %42 = vector.shape_cast %39 : vector<24x128xf32> to vector<1x24x128xf32>
    tpu.vector_store %arg8[%c0_22, %c0_23, %c0_24], %42 {strides = array<i32>} : memref<1x24x128xf32, #tpu.memory_space<vmem>>, vector<1x24x128xf32>,
    return
  }
  func.func @transform_0(%arg0: i32, %arg1: i32) -> (i32, i32, i32) {
    %c0_i32 = arith.constant 0 : i32
    %c0_i32_0 = arith.constant 0 : i32
    return %arg0, %arg1, %c0_i32 : i32, i32, i32
  }
  func.func @transform_1(%arg0: i32, %arg1: i32) -> (i32, i32, i32) {
    %c1_i32 = arith.constant 1 : i32
    %0 = arith.addi %arg1, %c1_i32 : i32
    %c3_i32 = arith.constant 3 : i32
    %1 = arith.muli %0, %c3_i32 : i32
    %c0_i32 = arith.constant 0 : i32
    %c0_i32_0 = arith.constant 0 : i32
    return %arg0, %1, %c0_i32 : i32, i32, i32
  }
  func.func @transform_2(%arg0: i32, %arg1: i32) -> (i32, i32) {
    %c0_i32 = arith.constant 0 : i32
    %c0_i32_0 = arith.constant 0 : i32
    %c0_i32_1 = arith.constant 0 : i32
    return %c0_i32, %c0_i32_0 : i32, i32
  }
  func.func @transform_3(%arg0: i32, %arg1: i32) -> (i32, i32) {
    %c0_i32 = arith.constant 0 : i32
    %c0_i32_0 = arith.constant 0 : i32
    %c0_i32_1 = arith.constant 0 : i32
    return %c0_i32, %c0_i32_0 : i32, i32
  }
  func.func @transform_4(%arg0: i32, %arg1: i32) -> (i32, i32) {
    %c0_i32 = arith.constant 0 : i32
    %c0_i32_0 = arith.constant 0 : i32
    %c0_i32_1 = arith.constant 0 : i32
    return %c0_i32, %c0_i32_0 : i32, i32
  }
  func.func @transform_5(%arg0: i32, %arg1: i32) -> (i32, i32) {
    %c0_i32 = arith.constant 0 : i32
    %c0_i32_0 = arith.constant 0 : i32
    %c0_i32_1 = arith.constant 0 : i32
    return %c0_i32, %c0_i32_0 : i32, i32
  }
  func.func @transform_6(%arg0: i32, %arg1: i32) -> (i32, i32, i32) {
    %c0_i32 = arith.constant 0 : i32
    %c0_i32_0 = arith.constant 0 : i32
    return %arg0, %arg1, %c0_i32 : i32, i32, i32
  }
}

</mosaic_0001>

<bundles_post_ra>
// kernel: cpc_encoder_forward.4
= control target key start
LH: loop header
LB: loop body
LE: loop exit
PB: predicated region body
PF: predicated region fallthrough
CT: control target
= control target key end

     0   :  { %s3085_s21 = smov 0   ;;  %s3087_s22 = smov 0   ;;  %s3998_s0 = inlined_call_operand.vmem [shape: bf16[2,320,512], index: 0, kind: input, shape index: {}, may-alias: {0,1}]   ;;  %s3999_s1 = inlined_call_operand.vmem [shape: bf16[2,320,512], index: 1, kind: input, shape index: {}, may-alias: {0,1}]   ;;  %s4000_s2 = inlined_call_operand.vmem [shape: bf16[1024,128], index: 2, kind: input, shape index: {}]   ;;  %s4001_s3 = inlined_call_operand.vmem [shape: f32[1,128], index: 3, kind: input, shape index: {}]   ;;  %s4002_s4 = inlined_call_operand.vmem [shape: f32[1,128], index: 4, kind: input, shape index: {}]   ;;  %s4003_s5 = inlined_call_operand.vmem [shape: f32[1,128], index: 5, kind: input, shape index: {}]   ;;  %s4004_s6 = inlined_call_operand.vmem [shape: bf16[2,160,128], index: 6, kind: output, shape index: {}]  }
   0x1   :  { %s3089_s23 = smov 0  }
   0x2 LB: > { %s28_s24 = sadd.s32 1, %s3044_s22  ;;  %p2264_p0 = scmp.ge.s32.totalorder %s3048_s23, 1  ;;  %s3048_s23 = sphi %s3089_s23, %s16_s23   ;;  %s3044_s22 = sphi %s3087_s22, %s4006_s22   ;;  %s3040_s21 = sphi %s3085_s21, %s4005_s21  }
   0x3   : > { %p30_p1 = scmp.ge.s32.totalorder %s28_s24, 2  ;;  %p258_p2 = scmp.lt.s32.totalorder %s3048_s23, 3 }
   0x5   : > { %s4008_s24 = smov (%p30_p1, %s28_s24), 0  ;;  %p259_p3 = pnand %p2264_p0, %p258_p2 }
   0x6   : > { %v3106_v0 = vld [vmem:[%s4000_s2 + $0x140] sm:$0xff] (!%p259_p3)   ;;  %p309_p4 = scmp.lt.s32.totalorder (!%p259_p3), %s3040_s21, 1  ;;  %v3131_v4 = vld [vmem:[%s4000_s2 + $0x148] sm:$0xff] (!%p259_p3)   ;;  %v3155_v8 = vld [vmem:[%s4000_s2 + $0x150] sm:$0xff] (!%p259_p3)   ;;  %vm1245_vm0 = vcmask (!%p259_p3), 1046528  }
   0x7   : > { %262 = sbr.rel (%p259_p3) target bundleno = 763 (0x2fb), region = 44  ;;  %v3111_v1 = vld [vmem:[%s4000_s2 + $0x1c0] sm:$0xff] (!%p259_p3)   ;;  %2482 = vmatprep.subr.bf16.mxu0 (!%p259_p3), %v3106_v0  ;;  %v3137_v5 = vld [vmem:[%s4000_s2 + $0x1c8] sm:$0xff] (!%p259_p3)   ;;  %v3161_v9 = vld [vmem:[%s4000_s2 + $0x1d0] sm:$0xff] (!%p259_p3)  }
   0x8   : > { %v3117_v2 = vld [vmem:[%s4000_s2 + $0x100] sm:$0xff] (!%p259_p3)   ;;  %2558 = vmatprep.subr.bf16.mxu1 (!%p259_p3), %v3111_v1  ;;  %v3143_v6 = vld [vmem:[%s4000_s2 + $0x108] sm:$0xff] (!%p259_p3)   ;;  %v3167_v10 = vld [vmem:[%s4000_s2 + $0x110] sm:$0xff] (!%p259_p3)  }
   0x9   : > { %v3123_v3 = vld [vmem:[%s4000_s2 + $0x180] sm:$0xff] (!%p259_p3)   ;;  %2483 = vmatpush3.bf16.msra.mxu0 (!%p259_p3), %v3117_v2  ;;  %v3149_v7 = vld [vmem:[%s4000_s2 + $0x188] sm:$0xff] (!%p259_p3)   ;;  %v3173_v11 = vld [vmem:[%s4000_s2 + $0x190] sm:$0xff] (!%p259_p3)  }
   0xa   : > { %2559 = vmatpush3.bf16.msra.mxu1 (!%p259_p3), %v3123_v3  ;;  %2484 = vmatprep.subr.bf16.mxu0 (!%p259_p3), %v3131_v4  ;;  %v3179_v12 = vld [vmem:[%s4000_s2 + $0x158] sm:$0xff] (!%p259_p3)   ;;  %v3203_v16 = vld [vmem:[%s4000_s2 + $0x160] sm:$0xff] (!%p259_p3)   ;;  %v3227_v20 = vld [vmem:[%s4000_s2 + $0x168] sm:$0xff] (!%p259_p3)  }
   0xb   : > { %2560 = vmatprep.subr.bf16.mxu1 (!%p259_p3), %v3137_v5  ;;  %v3185_v13 = vld [vmem:[%s4000_s2 + $0x1d8] sm:$0xff] (!%p259_p3)   ;;  %v3209_v17 = vld [vmem:[%s4000_s2 + $0x1e0] sm:$0xff] (!%p259_p3)   ;;  %v3233_v21 = vld [vmem:[%s4000_s2 + $0x1e8] sm:$0xff] (!%p259_p3)  }
   0xc   : > { %v3191_v14 = vld [vmem:[%s4000_s2 + $0x118] sm:$0xff] (!%p259_p3)   ;;  %v3215_v18 = vld [vmem:[%s4000_s2 + $0x120] sm:$0xff] (!%p259_p3)   ;;  %v3239_v22 = vld [vmem:[%s4000_s2 + $0x128] sm:$0xff] (!%p259_p3)  }
   0xd   : > { %2485 = vmatpush3.bf16.msra.mxu0 (!%p259_p3), %v3143_v6  ;;  %v3197_v15 = vld [vmem:[%s4000_s2 + $0x198] sm:$0xff] (!%p259_p3)   ;;  %v3221_v19 = vld [vmem:[%s4000_s2 + $0x1a0] sm:$0xff] (!%p259_p3)   ;;  %v3245_v23 = vld [vmem:[%s4000_s2 + $0x1a8] sm:$0xff] (!%p259_p3)  }
   0xe   : > { %s4010_s21 = smov (!%p309_p4, %s3040_s21), 1  ;;  %2561 = vmatpush3.bf16.msra.mxu1 %v3149_v7  ;;  %2486 = vmatprep.subr.bf16.mxu0 %v3155_v8  ;;  %v3251_v24 = vld [vmem:[%s4000_s2 + $0x170] sm:$0xff]   ;;  %v3276_v28 = vld [vmem:[%s4000_s2 + $0x178] sm:$0xff]   ;;  %v2954_v52 = vld [vmem:[%s4000_s2 + $0x40] sm:$0xff]  }
   0xf   : > { %2562 = vmatprep.subr.bf16.mxu1 %v3161_v9  ;;  %v3257_v25 = vld [vmem:[%s4000_s2 + $0x1f0] sm:$0xff]   ;;  %s2830_s13 = smul.u32 640, %s4010_s21  ;;  %v3282_v29 = vld [vmem:[%s4000_s2 + $0x1f8] sm:$0xff]   ;;  %v2955_v53 = vld [vmem:[%s4000_s2 + $0xc0] sm:$0xff]  }
  0x10   : > { %v3264_v26 = vld [vmem:[%s4000_s2 + $0x130] sm:$0xff]   ;;  %v3295_v30 = vld [vmem:[%s4000_s2 + $0x138] sm:$0xff]   ;;  %s2832_s27 = smul.u32 80, %s4010_s21 }
  0x11   : > { %2487 = vmatpush3.bf16.msra.mxu0 %v3167_v10  ;;  %v3270_v27 = vld [vmem:[%s4000_s2 + $0x1b0] sm:$0xff]   ;;  %s3289_s28 = scalar_lea.vmem %s3998_s0, %s2830_s13  ;;  %v3301_v31 = vld [vmem:[%s4000_s2 + $0x1b8] sm:$0xff]   ;;  %s2402_s14 = sadd.s32 320, %s2830_s13 }
  0x12   : > { %2563 = vmatpush3.bf16.msra.mxu1 %v3173_v11  ;;  %2488 = vmatprep.subr.bf16.mxu0 %v3179_v12  ;;  %v3305_v32 = vld [vmem:[%s3289_s28] ss:$16 sps:$4 sm:$0xff]   ;;  %v3309_v33 = vld [vmem:[%s3289_s28 + $0x4] ss:$16 sps:$4 sm:$0xff]   ;;  %v3313_v34 = vld [vmem:[%s3289_s28 + $0x8] ss:$16 sps:$4 sm:$0xff]   ;;  %s329_s17 = scalar_lea.vmem %s3999_s1, %s2402_s14  ;;  %s3925_s30 = scalar_lea.vmem %s4004_s6, %s2832_s27 }
  0x13   : > { %2564 = vmatprep.subr.bf16.mxu1 %v3185_v13  ;;  %v3316_v35 = vld [vmem:[%s3289_s28 + $0xc] ss:$16 sps:$4 sm:$0xff]   ;;  %935 = vmatprep.mubr.bf16.mxu0 %v3309_v33  ;;  %v3321_v36 = vld [vmem:[%s3289_s28 + $0x24] ss:$16 sps:$4 sm:$0xff]   ;;  %v3334_v38 = vld [vmem:[%s3289_s28 + $0x20] ss:$16 sps:$4 sm:$0xff]  }
  0x14   : > { %1048 = vmatprep.mubr.bf16.mxu1 %v3316_v35  ;;  %v3326_v37 = vld [vmem:[%s3289_s28 + $0x2c] ss:$16 sps:$4 sm:$0xff]   ;;  %v3338_v39 = vld [vmem:[%s3289_s28 + $0x28] ss:$16 sps:$4 sm:$0xff]   ;;  %v3343_v40 = vld [vmem:[%s3289_s28 + $0x44] ss:$16 sps:$4 sm:$0xff]  }
  0x15   : > { %2489 = vmatpush3.bf16.msra.mxu0 %v3191_v14  ;;  %v3347_v41 = vld [vmem:[%s3289_s28 + $0x4c] ss:$16 sps:$4 sm:$0xff]   ;;  %v3357_v42 = vld [vmem:[%s3289_s28 + $0x40] ss:$16 sps:$4 sm:$0xff]   ;;  %v3362_v43 = vld [vmem:[%s3289_s28 + $0x48] ss:$16 sps:$4 sm:$0xff]  }
  0x16   : > { %2565 = vmatpush3.bf16.msra.mxu1 %v3197_v15  ;;  %2490 = vmatprep.subr.bf16.mxu0 %v3203_v16  ;;  %v3366_v44 = vld [vmem:[%s3289_s28 + $0x64] ss:$16 sps:$4 sm:$0xff]   ;;  %v3369_v45 = vld [vmem:[%s3289_s28 + $0x6c] ss:$16 sps:$4 sm:$0xff]   ;;  %v3381_v46 = vld [vmem:[%s3289_s28 + $0x60] ss:$16 sps:$4 sm:$0xff]  }
  0x17   : > { %2566 = vmatprep.subr.bf16.mxu1 %v3209_v17  ;;  %v3386_v47 = vld [vmem:[%s3289_s28 + $0x68] ss:$16 sps:$4 sm:$0xff]   ;;  %v3390_v48 = vld [vmem:[%s3289_s28 + $0x84] ss:$16 sps:$4 sm:$0xff]   ;;  %v3393_v49 = vld [vmem:[%s3289_s28 + $0x8c] ss:$16 sps:$4 sm:$0xff]  }
  0x18   : > { %v3404_v50 = vld [vmem:[%s3289_s28 + $0x80] ss:$16 sps:$4 sm:$0xff]   ;;  %v3408_v51 = vld [vmem:[%s3289_s28 + $0x88] ss:$16 sps:$4 sm:$0xff]   ;;  %v3420_v54 = vld [vmem:[%s3289_s28 + $0xa4] ss:$16 sps:$4 sm:$0xff]  }
  0x19   : > { %2491 = vmatpush3.bf16.msra.mxu0 %v3215_v18  ;;  %v3423_v55 = vld [vmem:[%s3289_s28 + $0xac] ss:$16 sps:$4 sm:$0xff]   ;;  %v3432_v56 = vld [vmem:[%s3289_s28 + $0xa0] ss:$16 sps:$4 sm:$0xff]   ;;  %v3435_v57 = vld [vmem:[%s3289_s28 + $0xa8] ss:$16 sps:$4 sm:$0xff]  }
  0x1a   : > { %2567 = vmatpush3.bf16.msra.mxu1 %v3221_v19  ;;  %2492 = vmatprep.subr.bf16.mxu0 %v3227_v20  ;;  %v3438_v58 = vld [vmem:[%s3289_s28 + $0xc4] ss:$16 sps:$4 sm:$0xff]   ;;  %v3441_v59 = vld [vmem:[%s3289_s28 + $0xcc] ss:$16 sps:$4 sm:$0xff]   ;;  %v3448_v60 = vld [vmem:[%s3289_s28 + $0xc0] ss:$16 sps:$4 sm:$0xff]  }
  0x1b   : > { %2568 = vmatprep.subr.bf16.mxu1 %v3233_v21  ;;  %v3451_v61 = vld [vmem:[%s3289_s28 + $0xc8] ss:$16 sps:$4 sm:$0xff]   ;;  %v3454_v62 = vld [vmem:[%s3289_s28 + $0xe4] ss:$16 sps:$4 sm:$0xff]   ;;  %v3457_v63 = vld [vmem:[%s3289_s28 + $0xec] ss:$16 sps:$4 sm:$0xff]  }
  0x1d   : > { %2493 = vmatpush3.bf16.msra.mxu0 %v3239_v22 }
  0x1e   : > { %2569 = vmatpush3.bf16.msra.mxu1 %v3245_v23  ;;  %2494 = vmatprep.subr.bf16.mxu0 %v3251_v24 }
  0x1f   : > { %2570 = vmatprep.subr.bf16.mxu1 %v3257_v25 }
  0x21   : > { %2495 = vmatpush3.bf16.msra.mxu0 %v3264_v26 }
  0x22   : > { %2571 = vmatpush3.bf16.msra.mxu1 %v3270_v27  ;;  %2496 = vmatprep.subr.bf16.mxu0 %v3276_v28 }
  0x23   : > { %2572 = vmatprep.subr.bf16.mxu1 %v3282_v29 }
  0x25   : > { %2497 = vmatpush3.bf16.msra.mxu0 %v3295_v30 }
  0x26   : > { %2573 = vmatpush3.bf16.msra.mxu1 %v3301_v31  ;;  %2634 = vmatprep.subr.bf16.mxu0 %v3106_v0  ;;  %v3464_v0 = vld [vmem:[%s3289_s28 + $0xe0] ss:$16 sps:$4 sm:$0xff]  }
  0x27   : > { %2656 = vmatprep.subr.bf16.mxu1 %v3111_v1  ;;  %v3467_v1 = vld [vmem:[%s3289_s28 + $0xe8] ss:$16 sps:$4 sm:$0xff]  }
  0x28   : > { %936 = vmatmul.mubr.bf16.vlgmr.msra.gmra.mrb[0].mxu0 %v3305_v32 }
  0x29   : > { %1049 = vmatmul.mubr.bf16.vlgmr.msra.gmra.mrb[0].mxu1 %v3313_v34  ;;  %2635 = vmatpush3.bf16.msra.mxu0 %v3117_v2  ;;  %v3470_v2 = vld [vmem:[%s3289_s28 + $0x104] ss:$16 sps:$4 sm:$0xff]  }
  0x2a   : > { %2657 = vmatpush3.bf16.msra.mxu1 %v3123_v3  ;;  %943 = vmatprep.mubr.bf16.mxu0 %v3321_v36  ;;  %v3473_v3 = vld [vmem:[%s3289_s28 + $0x10c] ss:$16 sps:$4 sm:$0xff]  }
  0x2b   : > { %1056 = vmatprep.mubr.bf16.mxu1 %v3326_v37  ;;  %2636 = vmatprep.subr.bf16.mxu0 %v3131_v4  ;;  %v3480_v4 = vld [vmem:[%s3289_s28 + $0x100] ss:$16 sps:$4 sm:$0xff]  }
  0x2c   : > { %2658 = vmatprep.subr.bf16.mxu1 %v3137_v5  ;;  %v3485_v5 = vld [vmem:[%s3289_s28 + $0x108] ss:$16 sps:$4 sm:$0xff]  }
  0x2d   : > { %2637 = vmatpush3.bf16.msra.mxu0 %v3143_v6  ;;  %v3488_v6 = vld [vmem:[%s3289_s28 + $0x124] ss:$16 sps:$4 sm:$0xff]  }
  0x2e   : > { %2659 = vmatpush3.bf16.msra.mxu1 %v3149_v7  ;;  %2638 = vmatprep.subr.bf16.mxu0 %v3155_v8  ;;  %v3491_v7 = vld [vmem:[%s3289_s28 + $0x12c] ss:$16 sps:$4 sm:$0xff]   ;;  %v1129_v8 = vld [vmem:[%s329_s17] sm:$0xff] }
  0x2f   : > { %2660 = vmatprep.subr.bf16.mxu1 %v3161_v9  ;;  %v1130_v9 = vld [vmem:[%s329_s17 + $0x8] sm:$0xff] }
  0x30   : > { %944 = vmatmul.mubr.bf16.gmra.mrb[4].mxu0 %v3334_v38 }
  0x31   : > { %1057 = vmatmul.mubr.bf16.gmra.mrb[4].mxu1 %v3338_v39  ;;  %951 = vmatprep.mubr.bf16.mxu0 %v3343_v40 }
  0x32   : > { %1064 = vmatprep.mubr.bf16.mxu1 %v3347_v41  ;;  %2639 = vmatpush3.bf16.msra.mxu0 %v3167_v10  ;;  %v3501_v10 = vld [vmem:[%s3289_s28 + $0x120] ss:$16 sps:$4 sm:$0xff]  }
  0x33   : > { %2661 = vmatpush3.bf16.msra.mxu1 %v3173_v11  ;;  %2640 = vmatprep.subr.bf16.mxu0 %v3179_v12  ;;  %v3504_v11 = vld [vmem:[%s3289_s28 + $0x128] ss:$16 sps:$4 sm:$0xff]   ;;  %v2341_v12 = vcombine.high %v1129_v8, %v1129_v8 }
  0x34   : > { %2662 = vmatprep.subr.bf16.mxu1 %v3185_v13  ;;  %v2343_v13 = vcombine.high %v1130_v9, %v1130_v9 }
  0x36   : > { %2641 = vmatpush3.bf16.msra.mxu0 %v3191_v14  ;;  %v2340_v14 = vcombine.low %v1129_v8, %v1129_v8  ;;  %v2976_v8 = vld [vmem:[%s4000_s2 + $0x28] sm:$0xff]  }
  0x37   : > { %2663 = vmatpush3.bf16.msra.mxu1 %v3197_v15  ;;  %2642 = vmatprep.subr.bf16.mxu0 %v3203_v16  ;;  %v2342_v15 = vcombine.low %v1130_v9, %v1130_v9  ;;  %v2956_v16 = vld [vmem:[%s4000_s2] sm:$0xff]   ;;  %v2977_v9 = vld [vmem:[%s4000_s2 + $0xa8] sm:$0xff]  }
  0x38   : > { %952 = vmatmul.mubr.bf16.gmra.mrb[8].mxu0 %v3357_v42  ;;  %2664 = vmatprep.subr.bf16.mxu1 %v3209_v17  ;;  %v2957_v17 = vld [vmem:[%s4000_s2 + $0x80] sm:$0xff]  }
  0x39   : > { %1065 = vmatmul.mubr.bf16.gmra.mrb[8].mxu1 %v3362_v43  ;;  %959 = vmatprep.mubr.bf16.mxu0 %v3366_v44 }
  0x3a   : > { %1072 = vmatprep.mubr.bf16.mxu1 %v3369_v45  ;;  %2643 = vmatpush3.bf16.msra.mxu0 %v3215_v18  ;;  %v2958_v18 = vld [vmem:[%s4000_s2 + $0x48] sm:$0xff]  }
  0x3b   : > { %2665 = vmatpush3.bf16.msra.mxu1 %v3221_v19  ;;  %2644 = vmatprep.subr.bf16.mxu0 %v3227_v20  ;;  %v2959_v19 = vld [vmem:[%s4000_s2 + $0xc8] sm:$0xff]  }
  0x3c   : > { %2666 = vmatprep.subr.bf16.mxu1 %v3233_v21  ;;  %v2960_v20 = vld [vmem:[%s4000_s2 + $0x8] sm:$0xff]  }
  0x3d   : > { %v2961_v21 = vld [vmem:[%s4000_s2 + $0x88] sm:$0xff]  }
  0x3e   : > { %2645 = vmatpush3.bf16.msra.mxu0 %v3239_v22  ;;  %v2962_v22 = vld [vmem:[%s4000_s2 + $0x50] sm:$0xff]  }
  0x3f   : > { %2667 = vmatpush3.bf16.msra.mxu1 %v3245_v23  ;;  %2646 = vmatprep.subr.bf16.mxu0 %v3251_v24  ;;  %v2963_v23 = vld [vmem:[%s4000_s2 + $0xd0] sm:$0xff]  }
  0x40   : > { %960 = vmatmul.mubr.bf16.gmra.mrb[12].mxu0 %v3381_v46  ;;  %2668 = vmatprep.subr.bf16.mxu1 %v3257_v25  ;;  %v2964_v24 = vld [vmem:[%s4000_s2 + $0x10] sm:$0xff]  }
  0x41   : > { %1073 = vmatmul.mubr.bf16.gmra.mrb[12].mxu1 %v3386_v47  ;;  %967 = vmatprep.mubr.bf16.mxu0 %v3390_v48  ;;  %v2965_v25 = vld [vmem:[%s4000_s2 + $0x90] sm:$0xff]  }
  0x42   : > { %1080 = vmatprep.mubr.bf16.mxu1 %v3393_v49  ;;  %2647 = vmatpush3.bf16.msra.mxu0 %v3264_v26  ;;  %v2966_v26 = vld [vmem:[%s4000_s2 + $0x58] sm:$0xff]  }
  0x43   : > { %2669 = vmatpush3.bf16.msra.mxu1 %v3270_v27  ;;  %2648 = vmatprep.subr.bf16.mxu0 %v3276_v28  ;;  %v2967_v27 = vld [vmem:[%s4000_s2 + $0xd8] sm:$0xff]  }
  0x44   : > { %2670 = vmatprep.subr.bf16.mxu1 %v3282_v29  ;;  %v2968_v28 = vld [vmem:[%s4000_s2 + $0x18] sm:$0xff]  }
  0x45   : > { %v2969_v29 = vld [vmem:[%s4000_s2 + $0x98] sm:$0xff]  }
  0x46   : > { %2649 = vmatpush3.bf16.msra.mxu0 %v3295_v30  ;;  %v2970_v30 = vld [vmem:[%s4000_s2 + $0x60] sm:$0xff]  }
  0x47   : > { %2671 = vmatpush3.bf16.msra.mxu1 %v3301_v31  ;;  %2678 = vmatprep.subr.bf16.mxu0 %v2954_v52  ;;  %v2971_v31 = vld [vmem:[%s4000_s2 + $0xe0] sm:$0xff]   ;;  %v2974_v52 = vld [vmem:[%s4000_s2 + $0x68] sm:$0xff]  }
  0x48   : > { %968 = vmatmul.mubr.bf16.gmra.mrb[16].mxu0 %v3404_v50  ;;  %2754 = vmatprep.subr.bf16.mxu1 %v2955_v53  ;;  %v2975_v53 = vld [vmem:[%s4000_s2 + $0xe8] sm:$0xff]  }
  0x49   : > { %1081 = vmatmul.mubr.bf16.gmra.mrb[16].mxu1 %v3408_v51  ;;  %975 = vmatprep.mubr.bf16.mxu0 %v3420_v54 }
  0x4a   : > { %1088 = vmatprep.mubr.bf16.mxu1 %v3423_v55 }
  0x50   : > { %976 = vmatmul.mubr.bf16.gmra.mrb[20].mxu0 %v3432_v56 }
  0x51   : > { %1089 = vmatmul.mubr.bf16.gmra.mrb[20].mxu1 %v3435_v57  ;;  %983 = vmatprep.mubr.bf16.mxu0 %v3438_v58 }
  0x52   : > { %1096 = vmatprep.mubr.bf16.mxu1 %v3441_v59 }
  0x58   : > { %984 = vmatmul.mubr.bf16.gmra.mrb[24].mxu0 %v3448_v60 }
  0x59   : > { %1097 = vmatmul.mubr.bf16.gmra.mrb[24].mxu1 %v3451_v61  ;;  %991 = vmatprep.mubr.bf16.mxu0 %v3454_v62 }
  0x5a   : > { %1104 = vmatprep.mubr.bf16.mxu1 %v3457_v63 }
  0x60   : > { %992 = vmatmul.mubr.bf16.gmra.mrb[28].mxu0 %v3464_v0 }
  0x61   : > { %1105 = vmatmul.mubr.bf16.gmra.mrb[28].mxu1 %v3467_v1  ;;  %999 = vmatprep.mubr.bf16.mxu0 %v3470_v2 }
  0x62   : > { %1112 = vmatprep.mubr.bf16.mxu1 %v3473_v3 }
  0x68   : > { %1000 = vmatmul.mubr.bf16.gmra.mrb[32].mxu0 %v3480_v4 }
  0x69   : > { %1113 = vmatmul.mubr.bf16.gmra.mrb[32].mxu1 %v3485_v5  ;;  %1007 = vmatprep.mubr.bf16.mxu0 %v3488_v6 }
  0x6a   : > { %1120 = vmatprep.mubr.bf16.mxu1 %v3491_v7 }
  0x70   : > { %1008 = vmatmul.mubr.bf16.gmra.mrb[36].mxu0 %v3501_v10 }
  0x71   : > { %1121 = vmatmul.mubr.bf16.gmra.mrb[36].mxu1 %v3504_v11  ;;  %1177 = vmatprep.mubr.bf16.mxu0 %v2341_v12  ;;  %v2978_v12 = vld [vmem:[%s4000_s2 + $0x70] sm:$0xff]  }
  0x72   : > { %1217 = vmatprep.mubr.bf16.mxu1 %v2343_v13  ;;  %v2979_v13 = vld [vmem:[%s4000_s2 + $0xf0] sm:$0xff]  }
  0x78   : > { %1178 = vmatmul.mubr.bf16.vlgmr.msra.gmra.mrb[40].mxu0 %v2340_v14  ;;  %v2980_v14 = vld [vmem:[%s4000_s2 + $0x30] sm:$0xff]  }
  0x79   : > { %1218 = vmatmul.mubr.bf16.vlgmr.msra.gmra.mrb[40].mxu1 %v2342_v15  ;;  %2679 = vmatpush3.bf16.msra.mxu0 %v2956_v16  ;;  %v2981_v15 = vld [vmem:[%s4000_s2 + $0xb0] sm:$0xff]   ;;  %v2982_v16 = vld [vmem:[%s4000_s2 + $0x78] sm:$0xff]  }
  0x7a   : > { %2755 = vmatpush3.bf16.msra.mxu1 %v2957_v17  ;;  %2680 = vmatprep.subr.bf16.mxu0 %v2958_v18  ;;  %v2983_v17 = vld [vmem:[%s4000_s2 + $0xf8] sm:$0xff]  }
  0x7b   : > { %2756 = vmatprep.subr.bf16.mxu1 %v2959_v19  ;;  %1533 = vmatprep.mubr.bf16.mxu0 %v3309_v33  ;;  %v2972_v33 = vld [vmem:[%s4000_s2 + $0x20] sm:$0xff]   ;;  %v2984_v18 = vld [vmem:[%s4000_s2 + $0x38] sm:$0xff]  }
  0x7c   : > { %1646 = vmatprep.mubr.bf16.mxu1 %v3316_v35  ;;  %v2973_v35 = vld [vmem:[%s4000_s2 + $0xa0] sm:$0xff]   ;;  %v2985_v19 = vld [vmem:[%s4000_s2 + $0xb8] sm:$0xff]  }
  0x7d   : > { %2681 = vmatpush3.bf16.msra.mxu0 %v2960_v20 }
  0x7e   : > { %2757 = vmatpush3.bf16.msra.mxu1 %v2961_v21  ;;  %2682 = vmatprep.subr.bf16.mxu0 %v2962_v22 }
  0x7f   : > { %2758 = vmatprep.subr.bf16.mxu1 %v2963_v23 }
  0x81   : > { %2683 = vmatpush3.bf16.msra.mxu0 %v2964_v24 }
  0x82   : > { %2759 = vmatpush3.bf16.msra.mxu1 %v2965_v25  ;;  %2684 = vmatprep.subr.bf16.mxu0 %v2966_v26 }
  0x83   : > { %2760 = vmatprep.subr.bf16.mxu1 %v2967_v27 }
  0x85   : > { %2685 = vmatpush3.bf16.msra.mxu0 %v2968_v28 }
  0x86   : > { %2761 = vmatpush3.bf16.msra.mxu1 %v2969_v29  ;;  %2686 = vmatprep.subr.bf16.mxu0 %v2970_v30 }
  0x87   : > { %2762 = vmatprep.subr.bf16.mxu1 %v2971_v31 }
  0x89   : > { %2687 = vmatpush3.bf16.msra.mxu0 %v2972_v33 }
  0x8a   : > { %2763 = vmatpush3.bf16.msra.mxu1 %v2973_v35  ;;  %2688 = vmatprep.subr.bf16.mxu0 %v2974_v52 }
  0x8b   : > { %2764 = vmatprep.subr.bf16.mxu1 %v2975_v53 }
  0x8d   : > { %2689 = vmatpush3.bf16.msra.mxu0 %v2976_v8 }
  0x8e   : > { %2765 = vmatpush3.bf16.msra.mxu1 %v2977_v9  ;;  %2690 = vmatprep.subr.bf16.mxu0 %v2978_v12 }
  0x8f   : > { %2766 = vmatprep.subr.bf16.mxu1 %v2979_v13 }
  0x91   : > { %2691 = vmatpush3.bf16.msra.mxu0 %v2980_v14 }
  0x92   : > { %2767 = vmatpush3.bf16.msra.mxu1 %v2981_v15  ;;  %2692 = vmatprep.subr.bf16.mxu0 %v2982_v16 }
  0x93   : > { %2768 = vmatprep.subr.bf16.mxu1 %v2983_v17 }
  0x95   : > { %2693 = vmatpush3.bf16.msra.mxu0 %v2984_v18 }
  0x96   : > { %2769 = vmatpush3.bf16.msra.mxu1 %v2985_v19 }
  0x98   : > { %1534 = vmatmul.mubr.bf16.vlgmr.msra.gmra.mrb[44].mxu0 %v3305_v32 }
  0x99   : > { %1647 = vmatmul.mubr.bf16.vlgmr.msra.gmra.mrb[44].mxu1 %v3313_v34  ;;  %1541 = vmatprep.mubr.bf16.mxu0 %v3321_v36 }
  0x9a   : > { %1654 = vmatprep.mubr.bf16.mxu1 %v3326_v37 }
  0xa0   : > { %1542 = vmatmul.mubr.bf16.gmra.mrb[48].mxu0 %v3334_v38 }
  0xa1   : > { %1655 = vmatmul.mubr.bf16.gmra.mrb[48].mxu1 %v3338_v39  ;;  %1549 = vmatprep.mubr.bf16.mxu0 %v3343_v40 }
  0xa2   : > { %1662 = vmatprep.mubr.bf16.mxu1 %v3347_v41 }
  0xa8   : > { %1550 = vmatmul.mubr.bf16.gmra.mrb[52].mxu0 %v3357_v42 }
  0xa9   : > { %1663 = vmatmul.mubr.bf16.gmra.mrb[52].mxu1 %v3362_v43  ;;  %1557 = vmatprep.mubr.bf16.mxu0 %v3366_v44 }
  0xaa   : > { %1670 = vmatprep.mubr.bf16.mxu1 %v3369_v45 }
  0xb0   : > { %1558 = vmatmul.mubr.bf16.gmra.mrb[56].mxu0 %v3381_v46 }
  0xb1   : > { %1671 = vmatmul.mubr.bf16.gmra.mrb[56].mxu1 %v3386_v47  ;;  %1565 = vmatprep.mubr.bf16.mxu0 %v3390_v48 }
  0xb2   : > { %1678 = vmatprep.mubr.bf16.mxu1 %v3393_v49 }
  0xb8   : > { %1566 = vmatmul.mubr.bf16.gmra.mrb[60].mxu0 %v3404_v50 }
  0xb9   : > { %1679 = vmatmul.mubr.bf16.gmra.mrb[60].mxu1 %v3408_v51  ;;  %1573 = vmatprep.mubr.bf16.mxu0 %v3420_v54 }
  0xba   : > { %1686 = vmatprep.mubr.bf16.mxu1 %v3423_v55 }
  0xc0   : > { %1574 = vmatmul.mubr.bf16.gmra.mrb[64].mxu0 %v3432_v56 }
  0xc1   : > { %1687 = vmatmul.mubr.bf16.gmra.mrb[64].mxu1 %v3435_v57  ;;  %1581 = vmatprep.mubr.bf16.mxu0 %v3438_v58 }
  0xc2   : > { %1694 = vmatprep.mubr.bf16.mxu1 %v3441_v59 }
  0xc8   : > { %1582 = vmatmul.mubr.bf16.gmra.mrb[68].mxu0 %v3448_v60 }
  0xc9   : > { %1695 = vmatmul.mubr.bf16.gmra.mrb[68].mxu1 %v3451_v61  ;;  %1589 = vmatprep.mubr.bf16.mxu0 %v3454_v62 }
  0xca   : > { %1702 = vmatprep.mubr.bf16.mxu1 %v3457_v63 }
  0xd0   : > { %1590 = vmatmul.mubr.bf16.gmra.mrb[72].mxu0 %v3464_v0 }
  0xd1   : > { %1703 = vmatmul.mubr.bf16.gmra.mrb[72].mxu1 %v3467_v1  ;;  %1597 = vmatprep.mubr.bf16.mxu0 %v3470_v2 }
  0xd2   : > { %1710 = vmatprep.mubr.bf16.mxu1 %v3473_v3 }
  0xd8   : > { %1598 = vmatmul.mubr.bf16.gmra.mrb[76].mxu0 %v3480_v4 }
  0xd9   : > { %1711 = vmatmul.mubr.bf16.gmra.mrb[76].mxu1 %v3485_v5  ;;  %1605 = vmatprep.mubr.bf16.mxu0 %v3488_v6 }
  0xda   : > { %1718 = vmatprep.mubr.bf16.mxu1 %v3491_v7 }
  0xe0   : > { %1606 = vmatmul.mubr.bf16.gmra.mrb[80].mxu0 %v3501_v10 }
  0xe1   : > { %1719 = vmatmul.mubr.bf16.gmra.mrb[80].mxu1 %v3504_v11 }
  0xfb   : > { %v2498_v32 = vpop.f32.mrb[0].mxu0 }
  0xfc   : > { %v2574_v34 = vpop.f32.mrb[0].mxu1  ;;  %v2499_v36 = vpop.f32.mrb[1].mxu0 }
  0xfd   : > { %v2500_v37 = vadd.f32 %v2499_v36, %v2498_v32  ;;  %v2575_v38 = vpop.f32.mrb[1].mxu1  ;;  %v2501_v39 = vpop.f32.mrb[2].mxu0 }
  0xfe   : > { %v2576_v40 = vadd.f32 %v2575_v38, %v2574_v34  ;;  %v2577_v41 = vpop.f32.mrb[2].mxu1  ;;  %v2502_v42 = vpop.f32.mrb[3].mxu0 }
  0xff   : > { %v2503_v43 = vadd.f32 %v2502_v42, %v2501_v39  ;;  %v2578_v44 = vpop.f32.mrb[3].mxu1 }
 0x100   : > { %v1051_v45 = vadd.f32 %v2576_v40, %v2500_v37  ;;  %v2579_v46 = vadd.f32 %v2578_v44, %v2577_v41 }
 0x102   : > { %v1054_v47 = vadd.f32 %v2579_v46, %v2503_v43  ;;  %v1246_v49 = vrot.slane %v1051_v45, 1 }
 0x103   : > { %v2504_v48 = vpop.f32.mrb[4].mxu0 }
 0x104   : > { %v1247_v50 = vrot.slane %v1054_v47, 1  ;;  %v2580_v51 = vpop.f32.mrb[4].mxu1  ;;  %v2505_v54 = vpop.f32.mrb[5].mxu0 }
 0x105   : > { %v2506_v55 = vadd.f32 %v2505_v54, %v2504_v48  ;;  %v2581_v56 = vpop.f32.mrb[5].mxu1  ;;  %v2507_v57 = vpop.f32.mrb[6].mxu0 }
 0x106   : > { %v2582_v58 = vadd.f32 %v2581_v56, %v2580_v51  ;;  %v2583_v59 = vpop.f32.mrb[6].mxu1  ;;  %v2508_v60 = vpop.f32.mrb[7].mxu0  ;;  %v3639_v61 = vsel %vm1245_vm0, %v1246_v49, %v1247_v50 }
 0x107   : > { %v2509_v62 = vadd.f32 %v2508_v60, %v2507_v57  ;;  %v2584_v63 = vpop.f32.mrb[7].mxu1 }
 0x108   : > { %v1059_v0 = vadd.f32 %v2582_v58, %v2506_v55  ;;  %v2585_v1 = vadd.f32 %v2584_v63, %v2583_v59 }
 0x10a   : > { %v1249_v2 = vrot.slane %v1059_v0, 1  ;;  %v1062_v3 = vadd.f32 %v2585_v1, %v2509_v62 }
 0x10b   : > { %v2510_v4 = vpop.f32.mrb[8].mxu0 }
 0x10c   : > { %v1251_v5 = vrot.slane %v1062_v3, 1  ;;  %v2586_v6 = vpop.f32.mrb[8].mxu1  ;;  %v2511_v7 = vpop.f32.mrb[9].mxu0  ;;  %v3642_v10 = vsel %vm1245_vm0, %v1247_v50, %v1249_v2 }
 0x10d   : > { %v2512_v11 = vadd.f32 %v2511_v7, %v2510_v4  ;;  %v2587_v20 = vpop.f32.mrb[9].mxu1  ;;  %v2513_v21 = vpop.f32.mrb[10].mxu0 }
 0x10e   : > { %v2588_v22 = vadd.f32 %v2587_v20, %v2586_v6  ;;  %v2589_v23 = vpop.f32.mrb[10].mxu1  ;;  %v2514_v24 = vpop.f32.mrb[11].mxu0  ;;  %v3645_v25 = vsel %vm1245_vm0, %v1249_v2, %v1251_v5 }
 0x10f   : > { %v2515_v26 = vadd.f32 %v2514_v24, %v2513_v21  ;;  %v2590_v27 = vpop.f32.mrb[11].mxu1 }
 0x110   : > { %v1067_v28 = vadd.f32 %v2588_v22, %v2512_v11  ;;  %v2591_v29 = vadd.f32 %v2590_v27, %v2589_v23 }
 0x112   : > { %v1253_v30 = vrot.slane %v1067_v28, 1  ;;  %v1070_v31 = vadd.f32 %v2591_v29, %v2515_v26 }
 0x113   : > { %v2516_v33 = vpop.f32.mrb[12].mxu0 }
 0x114   : > { %v1255_v35 = vrot.slane %v1070_v31, 1  ;;  %v2592_v52 = vpop.f32.mrb[12].mxu1  ;;  %v2517_v53 = vpop.f32.mrb[13].mxu0  ;;  %v3648_v8 = vsel %vm1245_vm0, %v1251_v5, %v1253_v30 }
 0x115   : > { %v2518_v9 = vadd.f32 %v2517_v53, %v2516_v33  ;;  %v2593_v12 = vpop.f32.mrb[13].mxu1  ;;  %v2519_v13 = vpop.f32.mrb[14].mxu0 }
 0x116   : > { %v2594_v14 = vadd.f32 %v2593_v12, %v2592_v52  ;;  %v2595_v15 = vpop.f32.mrb[14].mxu1  ;;  %v2520_v16 = vpop.f32.mrb[15].mxu0  ;;  %v3651_v17 = vsel %vm1245_vm0, %v1253_v30, %v1255_v35 }
 0x117   : > { %v2521_v18 = vadd.f32 %v2520_v16, %v2519_v13  ;;  %v2596_v19 = vpop.f32.mrb[15].mxu1 }
 0x118   : > { %v1075_v32 = vadd.f32 %v2594_v14, %v2518_v9  ;;  %v2597_v34 = vadd.f32 %v2596_v19, %v2595_v15 }
 0x11a   : > { %v1257_v36 = vrot.slane %v1075_v32, 1  ;;  %v1078_v37 = vadd.f32 %v2597_v34, %v2521_v18 }
 0x11b   : > { %v2522_v38 = vpop.f32.mrb[16].mxu0 }
 0x11c   : > { %v1259_v39 = vrot.slane %v1078_v37, 1  ;;  %v2598_v40 = vpop.f32.mrb[16].mxu1  ;;  %v2523_v41 = vpop.f32.mrb[17].mxu0  ;;  %v3654_v42 = vsel %vm1245_vm0, %v1255_v35, %v1257_v36 }
 0x11d   : > { %v2524_v43 = vadd.f32 %v2523_v41, %v2522_v38  ;;  %v2599_v44 = vpop.f32.mrb[17].mxu1  ;;  %v2525_v45 = vpop.f32.mrb[18].mxu0 }
 0x11e   : > { %v2600_v46 = vadd.f32 %v2599_v44, %v2598_v40  ;;  %v2601_v47 = vpop.f32.mrb[18].mxu1  ;;  %v2526_v48 = vpop.f32.mrb[19].mxu0  ;;  %v3657_v49 = vsel %vm1245_vm0, %v1257_v36, %v1259_v39 }
 0x11f   : > { %v2527_v50 = vadd.f32 %v2526_v48, %v2525_v45  ;;  %v2602_v51 = vpop.f32.mrb[19].mxu1 }
 0x120   : > { %v1083_v54 = vadd.f32 %v2600_v46, %v2524_v43  ;;  %v2603_v55 = vadd.f32 %v2602_v51, %v2601_v47 }
 0x122   : > { %v1261_v56 = vrot.slane %v1083_v54, 1  ;;  %v1086_v57 = vadd.f32 %v2603_v55, %v2527_v50 }
 0x123   : > { %v2528_v58 = vpop.f32.mrb[20].mxu0 }
 0x124   : > { %v1263_v59 = vrot.slane %v1086_v57, 1  ;;  %v2604_v60 = vpop.f32.mrb[20].mxu1  ;;  %v2529_v62 = vpop.f32.mrb[21].mxu0  ;;  %v3660_v63 = vsel %vm1245_vm0, %v1259_v39, %v1261_v56 }
 0x125   : > { %v2530_v0 = vadd.f32 %v2529_v62, %v2528_v58  ;;  %v2605_v1 = vpop.f32.mrb[21].mxu1  ;;  %v2531_v2 = vpop.f32.mrb[22].mxu0 }
 0x126   : > { %v2606_v3 = vadd.f32 %v2605_v1, %v2604_v60  ;;  %v2607_v4 = vpop.f32.mrb[22].mxu1  ;;  %v2532_v5 = vpop.f32.mrb[23].mxu0  ;;  %v3663_v6 = vsel %vm1245_vm0, %v1261_v56, %v1263_v59 }
 0x127   : > { %v2533_v7 = vadd.f32 %v2532_v5, %v2531_v2  ;;  %v2608_v11 = vpop.f32.mrb[23].mxu1 }
 0x128   : > { %v1091_v20 = vadd.f32 %v2606_v3, %v2530_v0  ;;  %v2609_v21 = vadd.f32 %v2608_v11, %v2607_v4 }
 0x12a   : > { %v1265_v22 = vrot.slane %v1091_v20, 1  ;;  %v1094_v23 = vadd.f32 %v2609_v21, %v2533_v7 }
 0x12b   : > { %v2534_v24 = vpop.f32.mrb[24].mxu0 }
 0x12c   : > { %v1267_v26 = vrot.slane %v1094_v23, 1  ;;  %v2610_v27 = vpop.f32.mrb[24].mxu1  ;;  %v2535_v28 = vpop.f32.mrb[25].mxu0  ;;  %v3666_v29 = vsel %vm1245_vm0, %v1263_v59, %v1265_v22 }
 0x12d   : > { %v2536_v30 = vadd.f32 %v2535_v28, %v2534_v24  ;;  %v2611_v31 = vpop.f32.mrb[25].mxu1  ;;  %v2537_v33 = vpop.f32.mrb[26].mxu0 }
 0x12e   : > { %v2612_v35 = vadd.f32 %v2611_v31, %v2610_v27  ;;  %v2613_v52 = vpop.f32.mrb[26].mxu1  ;;  %v2538_v53 = vpop.f32.mrb[27].mxu0  ;;  %v3669_v9 = vsel %vm1245_vm0, %v1265_v22, %v1267_v26 }
 0x12f   : > { %v2539_v12 = vadd.f32 %v2538_v53, %v2537_v33  ;;  %v2614_v13 = vpop.f32.mrb[27].mxu1 }
 0x130   : > { %v1099_v14 = vadd.f32 %v2612_v35, %v2536_v30  ;;  %v2615_v15 = vadd.f32 %v2614_v13, %v2613_v52 }
 0x132   : > { %v1269_v16 = vrot.slane %v1099_v14, 1  ;;  %v1102_v18 = vadd.f32 %v2615_v15, %v2539_v12 }
 0x133   : > { %v2540_v19 = vpop.f32.mrb[28].mxu0 }
 0x134   : > { %v1271_v32 = vrot.slane %v1102_v18, 1  ;;  %v2616_v34 = vpop.f32.mrb[28].mxu1  ;;  %v2541_v36 = vpop.f32.mrb[29].mxu0  ;;  %v3672_v37 = vsel %vm1245_vm0, %v1267_v26, %v1269_v16 }
 0x135   : > { %v2542_v38 = vadd.f32 %v2541_v36, %v2540_v19  ;;  %v2617_v39 = vpop.f32.mrb[29].mxu1  ;;  %v2543_v40 = vpop.f32.mrb[30].mxu0 }
 0x136   : > { %v2618_v41 = vadd.f32 %v2617_v39, %v2616_v34  ;;  %v2619_v43 = vpop.f32.mrb[30].mxu1  ;;  %v2544_v44 = vpop.f32.mrb[31].mxu0  ;;  %v3675_v45 = vsel %vm1245_vm0, %v1269_v16, %v1271_v32 }
 0x137   : > { %v2545_v46 = vadd.f32 %v2544_v44, %v2543_v40  ;;  %v2620_v47 = vpop.f32.mrb[31].mxu1 }
 0x138   : > { %v1107_v48 = vadd.f32 %v2618_v41, %v2542_v38  ;;  %v2621_v50 = vadd.f32 %v2620_v47, %v2619_v43 }
 0x13a   : > { %v1273_v51 = vrot.slane %v1107_v48, 1  ;;  %v1110_v54 = vadd.f32 %v2621_v50, %v2545_v46 }
 0x13b   : > { %v2546_v55 = vpop.f32.mrb[32].mxu0 }
 0x13c   : > { %v1275_v56 = vrot.slane %v1110_v54, 1  ;;  %v2622_v57 = vpop.f32.mrb[32].mxu1  ;;  %v2547_v58 = vpop.f32.mrb[33].mxu0  ;;  %v3678_v59 = vsel %vm1245_vm0, %v1271_v32, %v1273_v51 }
 0x13d   : > { %v2548_v60 = vadd.f32 %v2547_v58, %v2546_v55  ;;  %v2623_v62 = vpop.f32.mrb[33].mxu1  ;;  %v2549_v0 = vpop.f32.mrb[34].mxu0 }
 0x13e   : > { %v2624_v1 = vadd.f32 %v2623_v62, %v2622_v57  ;;  %v2625_v2 = vpop.f32.mrb[34].mxu1  ;;  %v2550_v3 = vpop.f32.mrb[35].mxu0  ;;  %v3681_v4 = vsel %vm1245_vm0, %v1273_v51, %v1275_v56 }
 0x13f   : > { %v2551_v5 = vadd.f32 %v2550_v3, %v2549_v0  ;;  %v2626_v7 = vpop.f32.mrb[35].mxu1 }
 0x140   : > { %v1115_v11 = vadd.f32 %v2624_v1, %v2548_v60  ;;  %v2627_v20 = vadd.f32 %v2626_v7, %v2625_v2 }
 0x142   : > { %v1277_v21 = vrot.slane %v1115_v11, 1  ;;  %v1118_v22 = vadd.f32 %v2627_v20, %v2551_v5 }
 0x143   : > { %v2552_v23 = vpop.f32.mrb[36].mxu0 }
 0x144   : > { %v1279_v24 = vrot.slane %v1118_v22, 1  ;;  %v2628_v26 = vpop.f32.mrb[36].mxu1  ;;  %v2553_v27 = vpop.f32.mrb[37].mxu0  ;;  %v3684_v28 = vsel %vm1245_vm0, %v1275_v56, %v1277_v21 }
 0x145   : > { %v2554_v30 = vadd.f32 %v2553_v27, %v2552_v23  ;;  %v2629_v31 = vpop.f32.mrb[37].mxu1  ;;  %v2555_v33 = vpop.f32.mrb[38].mxu0 }
 0x146   : > { %v2630_v35 = vadd.f32 %v2629_v31, %v2628_v26  ;;  %v2631_v52 = vpop.f32.mrb[38].mxu1  ;;  %v2556_v53 = vpop.f32.mrb[39].mxu0  ;;  %v3687_v12 = vsel %vm1245_vm0, %v1277_v21, %v1279_v24  ;;  %v3702_v21 = vld [vmem:[%s4001_s3] ss:$0 sm:$0xff] }
 0x147   : > { %v2557_v13 = vadd.f32 %v2556_v53, %v2555_v33  ;;  %v2632_v14 = vpop.f32.mrb[39].mxu1 }
 0x148   : > { %v1123_v15 = vadd.f32 %v2630_v35, %v2554_v30  ;;  %v2633_v16 = vadd.f32 %v2632_v14, %v2631_v52 }
 0x14a   : > { %v1281_v18 = vrot.slane %v1123_v15, 1  ;;  %v1126_v19 = vadd.f32 %v2633_v16, %v2557_v13 }
 0x14b   : > { %v2650_v32 = vpop.f32.mrb[40].mxu0 }
 0x14c   : > { %v1283_v34 = vrot.slane %v1126_v19, 1  ;;  %v2672_v36 = vpop.f32.mrb[40].mxu1  ;;  %v2651_v38 = vpop.f32.mrb[41].mxu0  ;;  %v3690_v39 = vsel %vm1245_vm0, %v1279_v24, %v1281_v18 }
 0x14d   : > { %v2652_v40 = vadd.f32 %v2651_v38, %v2650_v32  ;;  %v2673_v41 = vpop.f32.mrb[41].mxu1  ;;  %v2653_v43 = vpop.f32.mrb[42].mxu0 }
 0x14e   : > { %v2674_v44 = vadd.f32 %v2673_v41, %v2672_v36  ;;  %v2675_v46 = vpop.f32.mrb[42].mxu1  ;;  %v2654_v47 = vpop.f32.mrb[43].mxu0  ;;  %v3693_v48 = vsel %vm1245_vm0, %v1281_v18, %v1283_v34 }
 0x14f   : > { %v2676_v50 = vpop.f32.mrb[43].mxu1 }
 0x150   : > { %v1220_v51 = vadd.f32 %v2674_v44, %v2652_v40 }
 0x152   : > { %v1306_v54 = vrot.slane %v1220_v51, 1 }
 0x154   : > { %v3696_v55 = vsel %vm1245_vm0, %v1283_v34, %v1306_v54 }
 0x16b   : > { %v2694_v56 = vpop.f32.mrb[44].mxu0 }
 0x16c   : > { %v2770_v57 = vpop.f32.mrb[44].mxu1  ;;  %v2695_v58 = vpop.f32.mrb[45].mxu0 }
 0x16d   : > { %v2696_v60 = vadd.f32 %v2695_v58, %v2694_v56  ;;  %v2771_v62 = vpop.f32.mrb[45].mxu1  ;;  %v2697_v0 = vpop.f32.mrb[46].mxu0 }
 0x16e   : > { %v2772_v1 = vadd.f32 %v2771_v62, %v2770_v57  ;;  %v2773_v2 = vpop.f32.mrb[46].mxu1  ;;  %v2698_v3 = vpop.f32.mrb[47].mxu0 }
 0x16f   : > { %v1536_v5 = vadd.f32 %v2696_v60, %v3639_v61  ;;  %v2699_v7 = vadd.f32 %v2698_v3, %v2697_v0  ;;  %v2774_v11 = vpop.f32.mrb[47].mxu1 }
 0x170   : > { %v2775_v20 = vadd.f32 %v2774_v11, %v2773_v2 }
 0x171   : > { %v1649_v22 = vadd.f32 %v2772_v1, %v1536_v5  ;;  %v1539_v23 = vadd.f32 %v2699_v7, %v3642_v10 }
 0x173   : > { %v1652_v24 = vadd.f32 %v2775_v20, %v1539_v23  ;;  %v2700_v26 = vpop.f32.mrb[48].mxu0  ;;  %v3706_v27 = vadd.f32 %v3702_v21, %v1649_v22 }
 0x174   : > { %v2776_v30 = vpop.f32.mrb[48].mxu1  ;;  %v2701_v31 = vpop.f32.mrb[49].mxu0 }
 0x175   : > { %v2702_v33 = vadd.f32 %v2701_v31, %v2700_v26  ;;  %v2777_v61 = vpop.f32.mrb[49].mxu1  ;;  %v2703_v35 = vpop.f32.mrb[50].mxu0  ;;  %1754 = vadd.xlane.f32.xlu0 %v3706_v27  ;;  %v3711_v10 = vadd.f32 %v3702_v21, %v1652_v24 }
 0x176   : > { %v2778_v52 = vadd.f32 %v2777_v61, %v2776_v30  ;;  %v2779_v53 = vpop.f32.mrb[50].mxu1  ;;  %v2704_v13 = vpop.f32.mrb[51].mxu0 }
 0x177   : > { %v1544_v14 = vadd.f32 %v2702_v33, %v3645_v25  ;;  %v2705_v15 = vadd.f32 %v2704_v13, %v2703_v35  ;;  %v2780_v16 = vpop.f32.mrb[51].mxu1 }
 0x178   : > { %v2781_v18 = vadd.f32 %v2780_v16, %v2779_v53 }
 0x179   : > { %v1657_v19 = vadd.f32 %v2778_v52, %v1544_v14  ;;  %v1547_v32 = vadd.f32 %v2705_v15, %v3648_v8  ;;  %1756 = vadd.xlane.f32.xlu0 %v3711_v10 }
 0x17b   : > { %v1660_v34 = vadd.f32 %v2781_v18, %v1547_v32  ;;  %v2706_v36 = vpop.f32.mrb[52].mxu0  ;;  %v3716_v38 = vadd.f32 %v3702_v21, %v1657_v19 }
 0x17c   : > { %v2782_v40 = vpop.f32.mrb[52].mxu1  ;;  %v2707_v41 = vpop.f32.mrb[53].mxu0 }
 0x17d   : > { %v2708_v43 = vadd.f32 %v2707_v41, %v2706_v36  ;;  %v2783_v25 = vpop.f32.mrb[53].mxu1  ;;  %v2709_v44 = vpop.f32.mrb[54].mxu0  ;;  %1758 = vadd.xlane.f32.xlu1 %v3716_v38  ;;  %v3721_v56 = vadd.f32 %v3702_v21, %v1660_v34 }
 0x17e   : > { %v2784_v46 = vadd.f32 %v2783_v25, %v2782_v40  ;;  %v2785_v47 = vpop.f32.mrb[54].mxu1  ;;  %v2710_v50 = vpop.f32.mrb[55].mxu0 }
 0x17f   : > { %v1552_v51 = vadd.f32 %v2708_v43, %v3651_v17  ;;  %v2711_v8 = vadd.f32 %v2710_v50, %v2709_v44  ;;  %v2786_v54 = vpop.f32.mrb[55].mxu1 }
 0x180   : > { %v2787_v57 = vadd.f32 %v2786_v54, %v2785_v47 }
 0x181   : > { %v1665_v58 = vadd.f32 %v2784_v46, %v1552_v51  ;;  %v1555_v60 = vadd.f32 %v2711_v8, %v3654_v42  ;;  %1760 = vadd.xlane.f32.xlu1 %v3721_v56 }
 0x183   : > { %v1668_v62 = vadd.f32 %v2787_v57, %v1555_v60  ;;  %v2712_v0 = vpop.f32.mrb[56].mxu0  ;;  %v3726_v1 = vadd.f32 %v3702_v21, %v1665_v58 }
 0x184   : > { %v2788_v2 = vpop.f32.mrb[56].mxu1  ;;  %v2713_v3 = vpop.f32.mrb[57].mxu0 }
 0x185   : > { %v2714_v5 = vadd.f32 %v2713_v3, %v2712_v0  ;;  %v2789_v17 = vpop.f32.mrb[57].mxu1  ;;  %v2715_v7 = vpop.f32.mrb[58].mxu0  ;;  %1762 = vadd.xlane.f32.xlu0 %v3726_v1  ;;  %v3730_v11 = vadd.f32 %v3702_v21, %v1668_v62 }
 0x186   : > { %v2790_v20 = vadd.f32 %v2789_v17, %v2788_v2  ;;  %v2791_v22 = vpop.f32.mrb[58].mxu1  ;;  %v2716_v42 = vpop.f32.mrb[59].mxu0 }
 0x187   : > { %v1560_v23 = vadd.f32 %v2714_v5, %v3657_v49  ;;  %v2717_v24 = vadd.f32 %v2716_v42, %v2715_v7  ;;  %v2792_v26 = vpop.f32.mrb[59].mxu1  ;;  %1764 = vadd.xlane.f32.xlu1 %v3730_v11 }
 0x188   : > { %v2793_v30 = vadd.f32 %v2792_v26, %v2791_v22 }
 0x189   : > { %v1673_v31 = vadd.f32 %v2790_v20, %v1560_v23  ;;  %v1563_v33 = vadd.f32 %v2717_v24, %v3660_v63 }
 0x18b   : > { %v1676_v61 = vadd.f32 %v2793_v30, %v1563_v33  ;;  %v2718_v35 = vpop.f32.mrb[60].mxu0  ;;  %v3736_v52 = vadd.f32 %v3702_v21, %v1673_v31 }
 0x18c   : > { %v2794_v53 = vpop.f32.mrb[60].mxu1  ;;  %v2719_v13 = vpop.f32.mrb[61].mxu0 }
 0x18d   : > { %v2720_v14 = vadd.f32 %v2719_v13, %v2718_v35  ;;  %v2795_v15 = vpop.f32.mrb[61].mxu1  ;;  %v2721_v16 = vpop.f32.mrb[62].mxu0  ;;  %1766 = vadd.xlane.f32.xlu0 %v3736_v52  ;;  %v3740_v49 = vadd.f32 %v3702_v21, %v1676_v61 }
 0x18e   : > { %v2796_v18 = vadd.f32 %v2795_v15, %v2794_v53  ;;  %v2797_v19 = vpop.f32.mrb[62].mxu1  ;;  %v2722_v32 = vpop.f32.mrb[63].mxu0 }
 0x18f   : > { %v1568_v63 = vadd.f32 %v2720_v14, %v3663_v6  ;;  %v2723_v34 = vadd.f32 %v2722_v32, %v2721_v16  ;;  %v2798_v36 = vpop.f32.mrb[63].mxu1  ;;  %1768 = vadd.xlane.f32.xlu1 %v3740_v49 }
 0x190   : > { %v2799_v40 = vadd.f32 %v2798_v36, %v2797_v19 }
 0x191   : > { %v1681_v41 = vadd.f32 %v2796_v18, %v1568_v63  ;;  %v1571_v43 = vadd.f32 %v2723_v34, %v3666_v29 }
 0x193   : > { %v1684_v25 = vadd.f32 %v2799_v40, %v1571_v43  ;;  %v2724_v44 = vpop.f32.mrb[64].mxu0  ;;  %v3746_v46 = vadd.f32 %v3702_v21, %v1681_v41 }
 0x194   : > { %v2800_v47 = vpop.f32.mrb[64].mxu1  ;;  %v2725_v50 = vpop.f32.mrb[65].mxu0 }
 0x195   : > { %v2726_v51 = vadd.f32 %v2725_v50, %v2724_v44  ;;  %v2801_v8 = vpop.f32.mrb[65].mxu1  ;;  %v2727_v54 = vpop.f32.mrb[66].mxu0  ;;  %1770 = vadd.xlane.f32.xlu0 %v3746_v46  ;;  %v3750_v6 = vadd.f32 %v3702_v21, %v1684_v25 }
 0x196   : > { %v2802_v57 = vadd.f32 %v2801_v8, %v2800_v47  ;;  %v2803_v58 = vpop.f32.mrb[66].mxu1  ;;  %v2728_v60 = vpop.f32.mrb[67].mxu0 }
 0x197   : > { %v1576_v29 = vadd.f32 %v2726_v51, %v3669_v9  ;;  %v2729_v62 = vadd.f32 %v2728_v60, %v2727_v54  ;;  %v2804_v0 = vpop.f32.mrb[67].mxu1  ;;  %1772 = vadd.xlane.f32.xlu1 %v3750_v6 }
 0x198   : > { %v2805_v2 = vadd.f32 %v2804_v0, %v2803_v58 }
 0x199   : > { %v1689_v3 = vadd.f32 %v2802_v57, %v1576_v29  ;;  %v1579_v5 = vadd.f32 %v2729_v62, %v3672_v37 }
 0x19b   : > { %v1692_v17 = vadd.f32 %v2805_v2, %v1579_v5  ;;  %v2730_v7 = vpop.f32.mrb[68].mxu0  ;;  %v3756_v20 = vadd.f32 %v3702_v21, %v1689_v3 }
 0x19c   : > { %v2806_v22 = vpop.f32.mrb[68].mxu1  ;;  %v2731_v42 = vpop.f32.mrb[69].mxu0 }
 0x19d   : > { %v2732_v23 = vadd.f32 %v2731_v42, %v2730_v7  ;;  %v2807_v24 = vpop.f32.mrb[69].mxu1  ;;  %v2733_v26 = vpop.f32.mrb[70].mxu0  ;;  %1774 = vadd.xlane.f32.xlu0 %v3756_v20  ;;  %v3760_v9 = vadd.f32 %v3702_v21, %v1692_v17 }
 0x19e   : > { %v2808_v30 = vadd.f32 %v2807_v24, %v2806_v22  ;;  %v2809_v31 = vpop.f32.mrb[70].mxu1  ;;  %v2734_v33 = vpop.f32.mrb[71].mxu0 }
 0x19f   : > { %v1584_v37 = vadd.f32 %v2732_v23, %v3675_v45  ;;  %v2735_v61 = vadd.f32 %v2734_v33, %v2733_v26  ;;  %v2810_v35 = vpop.f32.mrb[71].mxu1  ;;  %1776 = vadd.xlane.f32.xlu1 %v3760_v9 }
 0x1a0   : > { %v2811_v53 = vadd.f32 %v2810_v35, %v2809_v31 }
 0x1a1   : > { %v1697_v13 = vadd.f32 %v2808_v30, %v1584_v37  ;;  %v1587_v14 = vadd.f32 %v2735_v61, %v3678_v59 }
 0x1a3   : > { %v1700_v15 = vadd.f32 %v2811_v53, %v1587_v14  ;;  %v2736_v16 = vpop.f32.mrb[72].mxu0  ;;  %v3766_v18 = vadd.f32 %v3702_v21, %v1697_v13 }
 0x1a4   : > { %v2812_v19 = vpop.f32.mrb[72].mxu1  ;;  %v2737_v32 = vpop.f32.mrb[73].mxu0 }
 0x1a5   : > { %v2738_v63 = vadd.f32 %v2737_v32, %v2736_v16  ;;  %v2813_v34 = vpop.f32.mrb[73].mxu1  ;;  %v2739_v36 = vpop.f32.mrb[74].mxu0  ;;  %1778 = vadd.xlane.f32.xlu0 %v3766_v18  ;;  %v3770_v45 = vadd.f32 %v3702_v21, %v1700_v15 }
 0x1a6   : > { %v2814_v40 = vadd.f32 %v2813_v34, %v2812_v19  ;;  %v2815_v41 = vpop.f32.mrb[74].mxu1  ;;  %v2740_v43 = vpop.f32.mrb[75].mxu0 }
 0x1a7   : > { %v1592_v59 = vadd.f32 %v2738_v63, %v3681_v4  ;;  %v2741_v25 = vadd.f32 %v2740_v43, %v2739_v36  ;;  %v2816_v44 = vpop.f32.mrb[75].mxu1  ;;  %1780 = vadd.xlane.f32.xlu1 %v3770_v45 }
 0x1a8   : > { %v2817_v47 = vadd.f32 %v2816_v44, %v2815_v41 }
 0x1a9   : > { %v1705_v50 = vadd.f32 %v2814_v40, %v1592_v59  ;;  %v1595_v51 = vadd.f32 %v2741_v25, %v3684_v28 }
 0x1ab   : > { %v1708_v8 = vadd.f32 %v2817_v47, %v1595_v51  ;;  %v2742_v54 = vpop.f32.mrb[76].mxu0  ;;  %v3776_v57 = vadd.f32 %v3702_v21, %v1705_v50 }
 0x1ac   : > { %v2818_v58 = vpop.f32.mrb[76].mxu1  ;;  %v2743_v60 = vpop.f32.mrb[77].mxu0 }
 0x1ad   : > { %v2744_v29 = vadd.f32 %v2743_v60, %v2742_v54  ;;  %v2819_v62 = vpop.f32.mrb[77].mxu1  ;;  %v2745_v0 = vpop.f32.mrb[78].mxu0  ;;  %1782 = vadd.xlane.f32.xlu0 %v3776_v57  ;;  %v3780_v4 = vadd.f32 %v3702_v21, %v1708_v8 }
 0x1ae   : > { %v2820_v2 = vadd.f32 %v2819_v62, %v2818_v58  ;;  %v2821_v3 = vpop.f32.mrb[78].mxu1  ;;  %v2746_v5 = vpop.f32.mrb[79].mxu0 }
 0x1af   : > { %v1600_v28 = vadd.f32 %v2744_v29, %v3687_v12  ;;  %v2747_v17 = vadd.f32 %v2746_v5, %v2745_v0  ;;  %v2822_v7 = vpop.f32.mrb[79].mxu1  ;;  %1784 = vadd.xlane.f32.xlu1 %v3780_v4 }
 0x1b0   : > { %v2823_v22 = vadd.f32 %v2822_v7, %v2821_v3 }
 0x1b1   : > { %v1713_v42 = vadd.f32 %v2820_v2, %v1600_v28  ;;  %v1603_v23 = vadd.f32 %v2747_v17, %v3690_v39 }
 0x1b3   : > { %v1716_v24 = vadd.f32 %v2823_v22, %v1603_v23  ;;  %v2748_v26 = vpop.f32.mrb[80].mxu0  ;;  %v3786_v30 = vadd.f32 %v3702_v21, %v1713_v42 }
 0x1b4   : > { %v2824_v31 = vpop.f32.mrb[80].mxu1  ;;  %v2749_v33 = vpop.f32.mrb[81].mxu0 }
 0x1b5   : > { %v2750_v37 = vadd.f32 %v2749_v33, %v2748_v26  ;;  %v2825_v61 = vpop.f32.mrb[81].mxu1  ;;  %v2751_v35 = vpop.f32.mrb[82].mxu0  ;;  %1786 = vadd.xlane.f32.xlu0 %v3786_v30  ;;  %v3790_v12 = vadd.f32 %v3702_v21, %v1716_v24 }
 0x1b6   : > { %v2826_v53 = vadd.f32 %v2825_v61, %v2824_v31  ;;  %v2827_v13 = vpop.f32.mrb[82].mxu1  ;;  %v2752_v14 = vpop.f32.mrb[83].mxu0 }
 0x1b7   : > { %v1608_v39 = vadd.f32 %v2750_v37, %v3693_v48  ;;  %v2753_v15 = vadd.f32 %v2752_v14, %v2751_v35  ;;  %v2828_v16 = vpop.f32.mrb[83].mxu1  ;;  %1788 = vadd.xlane.f32.xlu1 %v3790_v12 }
 0x1b8   : > { %v2829_v19 = vadd.f32 %v2828_v16, %v2827_v13 }
 0x1b9   : > { %v1721_v32 = vadd.f32 %v2826_v53, %v1608_v39  ;;  %v1611_v63 = vadd.f32 %v2753_v15, %v3696_v55 }
 0x1bb   : > { %v1724_v34 = vadd.f32 %v2829_v19, %v1611_v63  ;;  %v3796_v36 = vadd.f32 %v3702_v21, %v1721_v32 }
 0x1bd   : > { %1790 = vadd.xlane.f32.xlu0 %v3796_v36  ;;  %v3800_v40 = vadd.f32 %v3702_v21, %v1724_v34 }
 0x1bf   : > { %1792 = vadd.xlane.f32.xlu1 %v3800_v40 }
 0x202   : > { %v1755_v48 = vpop.xlane.xlu0 %1754 }
 0x203   : > { %v1795_v41 = vmul.f32 0.0078125, %v1755_v48 }
 0x205   : > { %v3804_v43 = vsub.f32 %v3706_v27, %v1795_v41 }
 0x206   : > { %v1757_v59 = vpop.xlane.xlu0 %1756 }
 0x207   : > { %v1796_v25 = vmul.f32 0.0078125, %v1757_v59  ;;  %v1835_v55 = vmul.f32 %v3804_v43, %v3804_v43 }
 0x209   : > { %v3809_v44 = vsub.f32 %v3711_v10, %v1796_v25  ;;  %1855 = vadd.xlane.f32.xlu0 %v1835_v55 }
 0x20a   : > { %v1759_v47 = vpop.xlane.xlu1 %1758 }
 0x20b   : > { %v1797_v50 = vmul.f32 0.0078125, %v1759_v47  ;;  %v1836_v21 = vmul.f32 %v3809_v44, %v3809_v44 }
 0x20d   : > { %v3814_v51 = vsub.f32 %v3716_v38, %v1797_v50  ;;  %1857 = vadd.xlane.f32.xlu1 %v1836_v21 }
 0x20e   : > { %v1761_v27 = vpop.xlane.xlu1 %1760 }
 0x20f   : > { %v1798_v8 = vmul.f32 0.0078125, %v1761_v27  ;;  %v1837_v54 = vmul.f32 %v3814_v51, %v3814_v51 }
 0x211   : > { %v3819_v58 = vsub.f32 %v3721_v56, %v1798_v8  ;;  %1859 = vadd.xlane.f32.xlu0 %v1837_v54 }
 0x212   : > { %v1763_v10 = vpop.xlane.xlu0 %1762 }
 0x213   : > { %v1799_v60 = vmul.f32 0.0078125, %v1763_v10  ;;  %v1838_v29 = vmul.f32 %v3819_v58, %v3819_v58 }
 0x214   : > { %v1765_v62 = vpop.xlane.xlu1 %1764 }
 0x215   : > { %v3824_v0 = vsub.f32 %v3726_v1, %v1799_v60  ;;  %v1800_v38 = vmul.f32 0.0078125, %v1765_v62  ;;  %1861 = vadd.xlane.f32.xlu1 %v1838_v29 }
 0x217   : > { %v3827_v2 = vsub.f32 %v3730_v11, %v1800_v38  ;;  %v1839_v3 = vmul.f32 %v3824_v0, %v3824_v0 }
 0x219   : > { %1863 = vadd.xlane.f32.xlu0 %v1839_v3  ;;  %v1840_v56 = vmul.f32 %v3827_v2, %v3827_v2 }
 0x21a   : > { %v1767_v5 = vpop.xlane.xlu0 %1766 }
 0x21b   : > { %v1801_v28 = vmul.f32 0.0078125, %v1767_v5  ;;  %1865 = vadd.xlane.f32.xlu1 %v1840_v56 }
 0x21c   : > { %v1769_v17 = vpop.xlane.xlu1 %1768 }
 0x21d   : > { %v3834_v7 = vsub.f32 %v3736_v52, %v1801_v28  ;;  %v1802_v1 = vmul.f32 0.0078125, %v1769_v17 }
 0x21f   : > { %v3837_v22 = vsub.f32 %v3740_v49, %v1802_v1  ;;  %v1841_v11 = vmul.f32 %v3834_v7, %v3834_v7 }
 0x221   : > { %1867 = vadd.xlane.f32.xlu0 %v1841_v11  ;;  %v1842_v42 = vmul.f32 %v3837_v22, %v3837_v22 }
 0x222   : > { %v1771_v23 = vpop.xlane.xlu0 %1770 }
 0x223   : > { %v1803_v24 = vmul.f32 0.0078125, %v1771_v23  ;;  %1869 = vadd.xlane.f32.xlu1 %v1842_v42 }
 0x224   : > { %v1773_v26 = vpop.xlane.xlu1 %1772 }
 0x225   : > { %v3844_v31 = vsub.f32 %v3746_v46, %v1803_v24  ;;  %v1804_v52 = vmul.f32 0.0078125, %v1773_v26 }
 0x227   : > { %v3847_v33 = vsub.f32 %v3750_v6, %v1804_v52  ;;  %v1843_v49 = vmul.f32 %v3844_v31, %v3844_v31 }
 0x229   : > { %1871 = vadd.xlane.f32.xlu0 %v1843_v49  ;;  %v1844_v37 = vmul.f32 %v3847_v33, %v3847_v33  ;;  %v3906_v49 = vld [vmem:[%s4002_s4] ss:$0 sm:$0xff] }
 0x22a   : > { %v1775_v61 = vpop.xlane.xlu0 %1774 }
 0x22b   : > { %v1805_v35 = vmul.f32 0.0078125, %v1775_v61  ;;  %1873 = vadd.xlane.f32.xlu1 %v1844_v37 }
 0x22c   : > { %v1777_v53 = vpop.xlane.xlu1 %1776 }
 0x22d   : > { %v3854_v13 = vsub.f32 %v3756_v20, %v1805_v35  ;;  %v1806_v46 = vmul.f32 0.0078125, %v1777_v53 }
 0x22f   : > { %v3857_v14 = vsub.f32 %v3760_v9, %v1806_v46  ;;  %v1845_v6 = vmul.f32 %v3854_v13, %v3854_v13 }
 0x231   : > { %1875 = vadd.xlane.f32.xlu0 %v1845_v6  ;;  %v1846_v39 = vmul.f32 %v3857_v14, %v3857_v14 }
 0x232   : > { %v1779_v15 = vpop.xlane.xlu0 %1778 }
 0x233   : > { %v1807_v16 = vmul.f32 0.0078125, %v1779_v15  ;;  %1877 = vadd.xlane.f32.xlu1 %v1846_v39  ;;  %v3913_v15 = vld [vmem:[%s4003_s5] ss:$0 sm:$0xff] }
 0x234   : > { %v1781_v19 = vpop.xlane.xlu1 %1780 }
 0x235   : > { %v3864_v32 = vsub.f32 %v3766_v18, %v1807_v16  ;;  %v1808_v20 = vmul.f32 0.0078125, %v1781_v19 }
 0x237   : > { %v3867_v63 = vsub.f32 %v3770_v45, %v1808_v20  ;;  %v1847_v9 = vmul.f32 %v3864_v32, %v3864_v32 }
 0x239   : > { %1879 = vadd.xlane.f32.xlu0 %v1847_v9  ;;  %v1848_v34 = vmul.f32 %v3867_v63, %v3867_v63 }
 0x23a   : > { %v1783_v48 = vpop.xlane.xlu0 %1782 }
 0x23b   : > { %v1809_v41 = vmul.f32 0.0078125, %v1783_v48  ;;  %1881 = vadd.xlane.f32.xlu1 %v1848_v34 }
 0x23c   : > { %v1785_v59 = vpop.xlane.xlu1 %1784 }
 0x23d   : > { %v3874_v25 = vsub.f32 %v3776_v57, %v1809_v41  ;;  %v1810_v18 = vmul.f32 0.0078125, %v1785_v59 }
 0x23f   : > { %v3877_v55 = vsub.f32 %v3780_v4, %v1810_v18  ;;  %v1849_v45 = vmul.f32 %v3874_v25, %v3874_v25 }
 0x241   : > { %1883 = vadd.xlane.f32.xlu0 %v1849_v45  ;;  %v1850_v47 = vmul.f32 %v3877_v55, %v3877_v55 }
 0x242   : > { %v1787_v50 = vpop.xlane.xlu0 %1786 }
 0x243   : > { %v1811_v21 = vmul.f32 0.0078125, %v1787_v50  ;;  %1885 = vadd.xlane.f32.xlu1 %v1850_v47 }
 0x244   : > { %v1789_v27 = vpop.xlane.xlu1 %1788 }
 0x245   : > { %v3884_v8 = vsub.f32 %v3786_v30, %v1811_v21  ;;  %v1812_v57 = vmul.f32 0.0078125, %v1789_v27 }
 0x247   : > { %v3887_v54 = vsub.f32 %v3790_v12, %v1812_v57  ;;  %v1851_v4 = vmul.f32 %v3884_v8, %v3884_v8 }
 0x249   : > { %1887 = vadd.xlane.f32.xlu0 %v1851_v4  ;;  %v1852_v10 = vmul.f32 %v3887_v54, %v3887_v54 }
 0x24a   : > { %v1791_v60 = vpop.xlane.xlu0 %1790 }
 0x24b   : > { %v1813_v29 = vmul.f32 0.0078125, %v1791_v60  ;;  %1889 = vadd.xlane.f32.xlu1 %v1852_v10 }
 0x24c   : > { %v1793_v62 = vpop.xlane.xlu1 %1792 }
 0x24d   : > { %v3894_v38 = vsub.f32 %v3796_v36, %v1813_v29  ;;  %v1814_v30 = vmul.f32 0.0078125, %v1793_v62 }
 0x24f   : > { %v3897_v3 = vsub.f32 %v3800_v40, %v1814_v30  ;;  %v1853_v12 = vmul.f32 %v3894_v38, %v3894_v38 }
 0x251   : > { %1891 = vadd.xlane.f32.xlu0 %v1853_v12  ;;  %v1854_v56 = vmul.f32 %v3897_v3, %v3897_v3 }
 0x253   : > { %1893 = vadd.xlane.f32.xlu1 %v1854_v56 }
 0x296   : > { %v1856_v5 = vpop.xlane.xlu0 %1855 }
 0x297   : > { %v1895_v28 = vmul.f32 0.007874016, %v1856_v5 }
 0x299   : > { %v1915_v17 = vadd.f32 1e-05, %v1895_v28 }
 0x29a   : > { %v1858_v1 = vpop.xlane.xlu1 %1857 }
 0x29b   : > { %2986 = vrsqrt.f32 %v1915_v17  ;;  %v1896_v11 = vmul.f32 0.007874016, %v1858_v1 }
 0x29d   : > { %v1916_v36 = vadd.f32 1e-05, %v1896_v11 }
 0x29e   : > { %v1860_v42 = vpop.xlane.xlu0 %1859 }
 0x29f   : > { %2988 = vrsqrt.f32 %v1916_v36  ;;  %v1897_v23 = vmul.f32 0.007874016, %v1860_v42 }
 0x2a1   : > { %v1917_v40 = vadd.f32 1e-05, %v1897_v23 }
 0x2a2   : > { %v1862_v24 = vpop.xlane.xlu1 %1861 }
 0x2a3   : > { %2990 = vrsqrt.f32 %v1917_v40  ;;  %v1898_v26 = vmul.f32 0.007874016, %v1862_v24 }
 0x2a5   : > { %v2987_v52 = vpop.eup %2986  ;;  %v1918_v37 = vadd.f32 1e-05, %v1898_v26 }
 0x2a6   : > { %v1955_v61 = vmul.f32 %v2987_v52, %v3804_v43  ;;  %v1864_v35 = vpop.xlane.xlu0 %1863 }
 0x2a7   : > { %2992 = vrsqrt.f32 %v1918_v37  ;;  %v1899_v53 = vmul.f32 0.007874016, %v1864_v35 }
 0x2a8   : > { %v1982_v46 = vmul.f32 %v3906_v49, %v1955_v61  ;;  %v1866_v6 = vpop.xlane.xlu1 %1865 }
 0x2a9   : > { %v2989_v39 = vpop.eup %2988  ;;  %v1919_v16 = vadd.f32 1e-05, %v1899_v53  ;;  %v1900_v19 = vmul.f32 0.007874016, %v1866_v6 }
 0x2aa   : > { %v1956_v20 = vmul.f32 %v2989_v39, %v3809_v44  ;;  %v2009_v43 = vadd.f32 %v3913_v15, %v1982_v46 }
 0x2ab   : > { %2994 = vrsqrt.f32 %v1919_v16  ;;  %v1920_v9 = vadd.f32 1e-05, %v1900_v19 }
 0x2ac   : > { %v1983_v34 = vmul.f32 %v3906_v49, %v1956_v20  ;;  %v2029_v47 = vmax.f32 %v2009_v43, 0.0 }
 0x2ad   : > { %v2991_v48 = vpop.eup %2990  ;;  %2996 = vrsqrt.f32 %v1920_v9 }
 0x2ae   : > { %v2010_v41 = vadd.f32 %v3913_v15, %v1983_v34  ;;  %v1957_v59 = vmul.f32 %v2991_v48, %v3814_v51  ;;  %v1868_v18 = vpop.xlane.xlu0 %1867 }
 0x2af   : > { %v1901_v45 = vmul.f32 0.007874016, %v1868_v18 }
 0x2b0   : > { %v2030_v50 = vmax.f32 %v2010_v41, 0.0  ;;  %v1984_v21 = vmul.f32 %v3906_v49, %v1957_v59  ;;  %v1870_v44 = vpop.xlane.xlu1 %1869 }
 0x2b1   : > { %v2993_v27 = vpop.eup %2992  ;;  %v1921_v57 = vadd.f32 1e-05, %v1901_v45  ;;  %v1902_v4 = vmul.f32 0.007874016, %v1870_v44 }
 0x2b2   : > { %v2426_v10 = vpack.c.bf16 %v2030_v50, %v2029_v47  ;;  %v1958_v60 = vmul.f32 %v2993_v27, %v3819_v58  ;;  %v2011_v29 = vadd.f32 %v3913_v15, %v1984_v21 }
 0x2b3   : > { %2998 = vrsqrt.f32 %v1921_v57  ;;  %v1922_v51 = vadd.f32 1e-05, %v1902_v4 }
 0x2b4   : > { %2427 = vst [vmem:[%s3925_s30] sm:$0xff] %v2426_v10   ;;  %v1985_v62 = vmul.f32 %v3906_v49, %v1958_v60  ;;  %v2031_v1 = vmax.f32 %v2011_v29, 0.0 }
 0x2b5   : > { %v2995_v30 = vpop.eup %2994  ;;  %3000 = vrsqrt.f32 %v1922_v51 }
 0x2b6   : > { %v2012_v12 = vadd.f32 %v3913_v15, %v1985_v62  ;;  %v1959_v56 = vmul.f32 %v2995_v30, %v3824_v0  ;;  %v1872_v5 = vpop.xlane.xlu0 %1871 }
 0x2b7   : > { %v2997_v28 = vpop.eup %2996  ;;  %v1903_v17 = vmul.f32 0.007874016, %v1872_v5 }
 0x2b8   : > { %v2032_v11 = vmax.f32 %v2012_v12, 0.0  ;;  %v1986_v58 = vmul.f32 %v3906_v49, %v1959_v56  ;;  %v1960_v36 = vmul.f32 %v2997_v28, %v3827_v2  ;;  %v1874_v42 = vpop.xlane.xlu1 %1873 }
 0x2b9   : > { %v1923_v23 = vadd.f32 1e-05, %v1903_v17  ;;  %v1904_v40 = vmul.f32 0.007874016, %v1874_v42 }
 0x2ba   : > { %v2431_v24 = vpack.c.bf16 %v2032_v11, %v2031_v1  ;;  %v2013_v26 = vadd.f32 %v3913_v15, %v1986_v58  ;;  %v1987_v52 = vmul.f32 %v3906_v49, %v1960_v36 }
 0x2bb   : > { %3002 = vrsqrt.f32 %v1923_v23  ;;  %v1924_v0 = vadd.f32 1e-05, %v1904_v40 }
 0x2bc   : > { %2473 = vst [vmem:[%s3925_s30 + $0x8] sm:$0xff] %v2431_v24   ;;  %v2014_v37 = vadd.f32 %v3913_v15, %v1987_v52  ;;  %v2033_v35 = vmax.f32 %v2013_v26, 0.0 }
 0x2bd   : > { %v2999_v61 = vpop.eup %2998  ;;  %3004 = vrsqrt.f32 %v1924_v0 }
 0x2be   : > { %v2034_v53 = vmax.f32 %v2014_v37, 0.0  ;;  %v1961_v2 = vmul.f32 %v2999_v61, %v3834_v7  ;;  %v1876_v46 = vpop.xlane.xlu0 %1875 }
 0x2bf   : > { %v3001_v6 = vpop.eup %3000  ;;  %v1905_v39 = vmul.f32 0.007874016, %v1876_v46 }
 0x2c0   : > { %v2436_v16 = vpack.c.bf16 %v2034_v53, %v2033_v35  ;;  %v1988_v19 = vmul.f32 %v3906_v49, %v1961_v2  ;;  %v1962_v20 = vmul.f32 %v3001_v6, %v3837_v22  ;;  %v1878_v9 = vpop.xlane.xlu1 %1877 }
 0x2c1   : > { %v1925_v43 = vadd.f32 1e-05, %v1905_v39  ;;  %v1906_v34 = vmul.f32 0.007874016, %v1878_v9 }
 0x2c2   : > { %2474 = vst [vmem:[%s3925_s30 + $0x10] sm:$0xff] %v2436_v16   ;;  %v2015_v48 = vadd.f32 %v3913_v15, %v1988_v19  ;;  %v1989_v41 = vmul.f32 %v3906_v49, %v1962_v20 }
 0x2c3   : > { %3006 = vrsqrt.f32 %v1925_v43  ;;  %v1926_v59 = vadd.f32 1e-05, %v1906_v34 }
 0x2c4   : > { %v2016_v7 = vadd.f32 %v3913_v15, %v1989_v41  ;;  %v2035_v45 = vmax.f32 %v2015_v48, 0.0 }
 0x2c5   : > { %v3003_v18 = vpop.eup %3002  ;;  %3008 = vrsqrt.f32 %v1926_v59 }
 0x2c6   : > { %v2036_v47 = vmax.f32 %v2016_v7, 0.0  ;;  %v1963_v50 = vmul.f32 %v3003_v18, %v3844_v31  ;;  %v1880_v22 = vpop.xlane.xlu0 %1879 }
 0x2c7   : > { %v3005_v21 = vpop.eup %3004  ;;  %v1907_v44 = vmul.f32 0.007874016, %v1880_v22 }
 0x2c8   : > { %v2441_v27 = vpack.c.bf16 %v2036_v47, %v2035_v45  ;;  %v1990_v57 = vmul.f32 %v3906_v49, %v1963_v50  ;;  %v1964_v4 = vmul.f32 %v3005_v21, %v3847_v33  ;;  %v1882_v10 = vpop.xlane.xlu1 %1881 }
 0x2c9   : > { %v1927_v60 = vadd.f32 1e-05, %v1907_v44  ;;  %v1908_v51 = vmul.f32 0.007874016, %v1882_v10 }
 0x2ca   : > { %2475 = vst [vmem:[%s3925_s30 + $0x18] sm:$0xff] %v2441_v27   ;;  %v2017_v29 = vadd.f32 %v3913_v15, %v1990_v57  ;;  %v1991_v62 = vmul.f32 %v3906_v49, %v1964_v4 }
 0x2cb   : > { %3010 = vrsqrt.f32 %v1927_v60  ;;  %v1928_v30 = vadd.f32 1e-05, %v1908_v51 }
 0x2cc   : > { %v2018_v31 = vadd.f32 %v3913_v15, %v1991_v62  ;;  %v2037_v56 = vmax.f32 %v2017_v29, 0.0 }
 0x2cd   : > { %v3007_v12 = vpop.eup %3006  ;;  %3012 = vrsqrt.f32 %v1928_v30 }
 0x2ce   : > { %v2038_v5 = vmax.f32 %v2018_v31, 0.0  ;;  %v1965_v28 = vmul.f32 %v3007_v12, %v3854_v13  ;;  %v1884_v33 = vpop.xlane.xlu0 %1883 }
 0x2cf   : > { %v3009_v17 = vpop.eup %3008  ;;  %v1909_v1 = vmul.f32 0.007874016, %v1884_v33 }
 0x2d0   : > { %v2446_v11 = vpack.c.bf16 %v2038_v5, %v2037_v56  ;;  %v1992_v58 = vmul.f32 %v3906_v49, %v1965_v28  ;;  %v1966_v36 = vmul.f32 %v3009_v17, %v3857_v14  ;;  %v1886_v42 = vpop.xlane.xlu1 %1885 }
 0x2d1   : > { %v1929_v23 = vadd.f32 1e-05, %v1909_v1  ;;  %v1910_v40 = vmul.f32 0.007874016, %v1886_v42 }
 0x2d2   : > { %2476 = vst [vmem:[%s3925_s30 + $0x20] sm:$0xff] %v2446_v11   ;;  %v2019_v24 = vadd.f32 %v3913_v15, %v1992_v58  ;;  %v1993_v26 = vmul.f32 %v3906_v49, %v1966_v36 }
 0x2d3   : > { %3014 = vrsqrt.f32 %v1929_v23  ;;  %v1930_v52 = vadd.f32 1e-05, %v1910_v40 }
 0x2d4   : > { %v2020_v13 = vadd.f32 %v3913_v15, %v1993_v26  ;;  %v2039_v37 = vmax.f32 %v2019_v24, 0.0 }
 0x2d5   : > { %v3011_v0 = vpop.eup %3010  ;;  %3016 = vrsqrt.f32 %v1930_v52 }
 0x2d6   : > { %v2040_v61 = vmax.f32 %v2020_v13, 0.0  ;;  %v1967_v35 = vmul.f32 %v3011_v0, %v3864_v32  ;;  %v1888_v14 = vpop.xlane.xlu0 %1887 }
 0x2d7   : > { %v3013_v53 = vpop.eup %3012  ;;  %v1911_v2 = vmul.f32 0.007874016, %v1888_v14 }
 0x2d8   : > { %v2451_v46 = vpack.c.bf16 %v2040_v61, %v2039_v37  ;;  %v1994_v6 = vmul.f32 %v3906_v49, %v1967_v35  ;;  %v1968_v39 = vmul.f32 %v3013_v53, %v3867_v63  ;;  %v1890_v16 = vpop.xlane.xlu1 %1889 }
 0x2d9   : > { %v1931_v19 = vadd.f32 1e-05, %v1911_v2  ;;  %v1912_v20 = vmul.f32 0.007874016, %v1890_v16 }
 0x2da   : > { %2477 = vst [vmem:[%s3925_s30 + $0x28] sm:$0xff] %v2451_v46   ;;  %v2021_v9 = vadd.f32 %v3913_v15, %v1994_v6  ;;  %v1995_v43 = vmul.f32 %v3906_v49, %v1968_v39 }
 0x2db   : > { %3018 = vrsqrt.f32 %v1931_v19  ;;  %v1932_v34 = vadd.f32 1e-05, %v1912_v20 }
 0x2dc   : > { %v2022_v32 = vadd.f32 %v3913_v15, %v1995_v43  ;;  %v2041_v41 = vmax.f32 %v2021_v9, 0.0 }
 0x2dd   : > { %v3015_v48 = vpop.eup %3014  ;;  %3020 = vrsqrt.f32 %v1932_v34 }
 0x2de   : > { %v2042_v59 = vmax.f32 %v2022_v32, 0.0  ;;  %v1969_v7 = vmul.f32 %v3015_v48, %v3874_v25  ;;  %v1892_v63 = vpop.xlane.xlu0 %1891 }
 0x2df   : > { %v3017_v18 = vpop.eup %3016  ;;  %v1913_v45 = vmul.f32 0.007874016, %v1892_v63 }
 0x2e0   : > { %v2456_v47 = vpack.c.bf16 %v2042_v59, %v2041_v41  ;;  %v1996_v50 = vmul.f32 %v3906_v49, %v1969_v7  ;;  %v1970_v22 = vmul.f32 %v3017_v18, %v3877_v55  ;;  %v1894_v21 = vpop.xlane.xlu1 %1893 }
 0x2e1   : > { %v1933_v44 = vadd.f32 1e-05, %v1913_v45  ;;  %v1914_v27 = vmul.f32 0.007874016, %v1894_v21 }
 0x2e2   : > { %2478 = vst [vmem:[%s3925_s30 + $0x30] sm:$0xff] %v2456_v47   ;;  %v2023_v57 = vadd.f32 %v3913_v15, %v1996_v50  ;;  %v1997_v4 = vmul.f32 %v3906_v49, %v1970_v22 }
 0x2e3   : > { %3022 = vrsqrt.f32 %v1933_v44  ;;  %v1934_v10 = vadd.f32 1e-05, %v1914_v27 }
 0x2e4   : > { %v2024_v25 = vadd.f32 %v3913_v15, %v1997_v4  ;;  %v2043_v51 = vmax.f32 %v2023_v57, 0.0 }
 0x2e5   : > { %v3019_v60 = vpop.eup %3018  ;;  %3024 = vrsqrt.f32 %v1934_v10 }
 0x2e6   : > { %v2044_v29 = vmax.f32 %v2024_v25, 0.0  ;;  %v1971_v62 = vmul.f32 %v3019_v60, %v3884_v8 }
 0x2e7   : > { %v3021_v55 = vpop.eup %3020 }
 0x2e8   : > { %v2461_v30 = vpack.c.bf16 %v2044_v29, %v2043_v51  ;;  %v1998_v31 = vmul.f32 %v3906_v49, %v1971_v62  ;;  %v1972_v12 = vmul.f32 %v3021_v55, %v3887_v54 }
 0x2ea   : > { %2479 = vst [vmem:[%s3925_s30 + $0x38] sm:$0xff] %v2461_v30   ;;  %v2025_v56 = vadd.f32 %v3913_v15, %v1998_v31  ;;  %v1999_v5 = vmul.f32 %v3906_v49, %v1972_v12 }
 0x2ec   : > { %v2026_v28 = vadd.f32 %v3913_v15, %v1999_v5  ;;  %v2045_v17 = vmax.f32 %v2025_v56, 0.0 }
 0x2ed   : > { %v3023_v33 = vpop.eup %3022 }
 0x2ee   : > { %v2046_v1 = vmax.f32 %v2026_v28, 0.0  ;;  %v1973_v8 = vmul.f32 %v3023_v33, %v3894_v38 }
 0x2ef   : > { %v3025_v11 = vpop.eup %3024 }
 0x2f0   : > { %v2466_v58 = vpack.c.bf16 %v2046_v1, %v2045_v17  ;;  %v2000_v36 = vmul.f32 %v3906_v49, %v1973_v8  ;;  %v1974_v42 = vmul.f32 %v3025_v11, %v3897_v3 }
 0x2f2   : > { %2480 = vst [vmem:[%s3925_s30 + $0x40] sm:$0xff] %v2466_v58   ;;  %v2027_v54 = vadd.f32 %v3913_v15, %v2000_v36  ;;  %v2001_v23 = vmul.f32 %v3906_v49, %v1974_v42 }
 0x2f4   : > { %v2028_v40 = vadd.f32 %v3913_v15, %v2001_v23  ;;  %v2047_v24 = vmax.f32 %v2027_v54, 0.0 }
 0x2f6   : > { %v2048_v26 = vmax.f32 %v2028_v40, 0.0 }
 0x2f8   : > { %v2471_v52 = vpack.c.bf16 %v2048_v26, %v2047_v24 }
 0x2fa   : > { %2481 = vst [vmem:[%s3925_s30 + $0x48] sm:$0xff] %v2471_v52  }
 0x2fb PF: > { %s16_s23 = sadd.s32 1, %s3048_s23   ;;  %s4005_s21 = smov %s3044_s22 }
 0x2fc   : > { %p13_p5 = scmp.ge.s32.totalorder %s16_s23, 4   ;;  %s4006_s22 = smov %s4008_s24 }
 0x2fe   :  { %15 = sbr.rel (!%p13_p5) target bundleno = 2 (0x2), region = 77 }

// kernel: cpc_encoder_forward.5
= control target key start
LH: loop header
LB: loop body
LE: loop exit
PB: predicated region body
PF: predicated region fallthrough
CT: control target
= control target key end

     0   :  { %s1607_s21 = smov 0   ;;  %s1609_s22 = smov 0   ;;  %s1935_s0 = inlined_call_operand.vmem [shape: bf16[2,160,256], index: 0, kind: input, shape index: {}, may-alias: {0,1}]   ;;  %s1936_s1 = inlined_call_operand.vmem [shape: bf16[2,160,256], index: 1, kind: input, shape index: {}, may-alias: {0,1}]   ;;  %s1937_s2 = inlined_call_operand.vmem [shape: bf16[512,128], index: 2, kind: input, shape index: {}]   ;;  %s1938_s3 = inlined_call_operand.vmem [shape: f32[1,128], index: 3, kind: input, shape index: {}]   ;;  %s1939_s4 = inlined_call_operand.vmem [shape: f32[1,128], index: 4, kind: input, shape index: {}]   ;;  %s1940_s5 = inlined_call_operand.vmem [shape: f32[1,128], index: 5, kind: input, shape index: {}]   ;;  %s1941_s6 = inlined_call_operand.vmem [shape: bf16[2,80,128], index: 6, kind: output, shape index: {}]  }
   0x1   :  { %s1611_s23 = smov 0  }
   0x2 LB: > { %s28_s24 = sadd.s32 1, %s1566_s22  ;;  %p1234_p0 = scmp.ge.s32.totalorder %s1570_s23, 1  ;;  %s1570_s23 = sphi %s1611_s23, %s16_s23   ;;  %s1566_s22 = sphi %s1609_s22, %s1943_s22   ;;  %s1562_s21 = sphi %s1607_s21, %s1942_s21  }
   0x3   : > { %p30_p1 = scmp.ge.s32.totalorder %s28_s24, 2  ;;  %p258_p2 = scmp.lt.s32.totalorder %s1570_s23, 3 }
   0x5   : > { %s1945_s24 = smov (%p30_p1, %s28_s24), 0  ;;  %p259_p3 = pnand %p1234_p0, %p258_p2 }
   0x6   : > { %v1630_v0 = vld [vmem:[%s1937_s2 + $0xc0] sm:$0xff] (!%p259_p3)   ;;  %v1641_v2 = vld [vmem:[%s1937_s2 + $0xc8] sm:$0xff] (!%p259_p3)   ;;  %v1659_v6 = vld [vmem:[%s1937_s2 + $0xd0] sm:$0xff] (!%p259_p3)   ;;  %p309_p4 = scmp.lt.s32.totalorder (!%p259_p3), %s1562_s21, 1  ;;  %vm694_vm0 = vcmask (!%p259_p3), 1046528  }
   0x7   : > { %262 = sbr.rel (%p259_p3) target bundleno = 617 (0x269), region = 44  ;;  %v1635_v1 = vld [vmem:[%s1937_s2 + $0x80] sm:$0xff] (!%p259_p3)   ;;  %1338 = vmatprep.subr.bf16.mxu0 (!%p259_p3), %v1630_v0  ;;  %v1647_v3 = vld [vmem:[%s1937_s2 + $0x88] sm:$0xff] (!%p259_p3)   ;;  %v1665_v7 = vld [vmem:[%s1937_s2 + $0x90] sm:$0xff] (!%p259_p3)  }
   0x8   : > { %1339 = vmatpush3.bf16.msra.mxu0 (!%p259_p3), %v1635_v1  ;;  %v1483_v4 = vld [vmem:[%s1937_s2 + $0x40] sm:$0xff] (!%p259_p3)   ;;  %v1487_v8 = vld [vmem:[%s1937_s2 + $0x48] sm:$0xff] (!%p259_p3)   ;;  %v1677_v10 = vld [vmem:[%s1937_s2 + $0xd8] sm:$0xff] (!%p259_p3)  }
   0x9   : > { %1340 = vmatprep.subr.bf16.mxu0 (!%p259_p3), %v1641_v2  ;;  %v1484_v5 = vld [vmem:[%s1937_s2] sm:$0xff] (!%p259_p3)   ;;  %1406 = vmatprep.subr.bf16.mxu1 (!%p259_p3), %v1483_v4  ;;  %v1488_v9 = vld [vmem:[%s1937_s2 + $0x8] sm:$0xff] (!%p259_p3)   ;;  %v1683_v11 = vld [vmem:[%s1937_s2 + $0x98] sm:$0xff] (!%p259_p3)  }
   0xa   : > { %1407 = vmatpush3.bf16.msra.mxu1 (!%p259_p3), %v1484_v5  ;;  %v1491_v12 = vld [vmem:[%s1937_s2 + $0x50] sm:$0xff] (!%p259_p3)   ;;  %v1695_v14 = vld [vmem:[%s1937_s2 + $0xe0] sm:$0xff] (!%p259_p3)   ;;  %v1495_v16 = vld [vmem:[%s1937_s2 + $0x58] sm:$0xff] (!%p259_p3)  }
   0xb   : > { %1408 = vmatprep.subr.bf16.mxu1 (!%p259_p3), %v1487_v8  ;;  %v1492_v13 = vld [vmem:[%s1937_s2 + $0x10] sm:$0xff] (!%p259_p3)   ;;  %v1701_v15 = vld [vmem:[%s1937_s2 + $0xa0] sm:$0xff] (!%p259_p3)   ;;  %v1496_v17 = vld [vmem:[%s1937_s2 + $0x18] sm:$0xff] (!%p259_p3)  }
   0xc   : > { %1341 = vmatpush3.bf16.msra.mxu0 (!%p259_p3), %v1647_v3  ;;  %v1497_v18 = vld [vmem:[%s1937_s2 + $0xe8] sm:$0xff] (!%p259_p3)   ;;  %v1499_v20 = vld [vmem:[%s1937_s2 + $0x60] sm:$0xff] (!%p259_p3)   ;;  %v1501_v22 = vld [vmem:[%s1937_s2 + $0xf0] sm:$0xff] (!%p259_p3)  }
   0xd   : > { %1342 = vmatprep.subr.bf16.mxu0 (!%p259_p3), %v1659_v6  ;;  %v1498_v19 = vld [vmem:[%s1937_s2 + $0xa8] sm:$0xff] (!%p259_p3)   ;;  %v1500_v21 = vld [vmem:[%s1937_s2 + $0x20] sm:$0xff] (!%p259_p3)   ;;  %v1502_v23 = vld [vmem:[%s1937_s2 + $0xb0] sm:$0xff] (!%p259_p3)  }
   0xe   : > { %1409 = vmatpush3.bf16.msra.mxu1 %v1488_v9  ;;  %s1947_s21 = smov (!%p309_p4, %s1562_s21), 1  ;;  %v1503_v24 = vld [vmem:[%s1937_s2 + $0x68] sm:$0xff]   ;;  %v1505_v26 = vld [vmem:[%s1937_s2 + $0xf8] sm:$0xff]   ;;  %v1507_v28 = vld [vmem:[%s1937_s2 + $0x70] sm:$0xff]  }
   0xf   : > { %1410 = vmatprep.subr.bf16.mxu1 %v1491_v12  ;;  %s1452_s9 = smul.u32 160, %s1947_s21  ;;  %v1504_v25 = vld [vmem:[%s1937_s2 + $0x28] sm:$0xff]   ;;  %v1506_v27 = vld [vmem:[%s1937_s2 + $0xb8] sm:$0xff]   ;;  %v1508_v29 = vld [vmem:[%s1937_s2 + $0x30] sm:$0xff]  }
  0x10   : > { %1343 = vmatpush3.bf16.msra.mxu0 %v1665_v7  ;;  %v1512_v32 = vld [vmem:[%s1937_s2 + $0x78] sm:$0xff]   ;;  %v1794_v61 = vld [vmem:[%s1938_s3] ss:$0 sm:$0xff]  ;;  %s1453_s19 = smul.u32 40, %s1947_s21 }
  0x11   : > { %1344 = vmatprep.subr.bf16.mxu0 %v1677_v10  ;;  %s1751_s20 = scalar_lea.vmem %s1935_s0, %s1452_s9  ;;  %v1513_v33 = vld [vmem:[%s1937_s2 + $0x38] sm:$0xff]   ;;  %s1298_s10 = sadd.s32 80, %s1452_s9 }
  0x12   : > { %1411 = vmatpush3.bf16.msra.mxu1 %v1492_v13  ;;  %v1509_v30 = vld [vmem:[%s1751_s20] ss:$8 sps:$4 sm:$0xff]   ;;  %v1511_v31 = vld [vmem:[%s1751_s20 + $0x4] ss:$8 sps:$4 sm:$0xff]   ;;  %v1514_v34 = vld [vmem:[%s1751_s20 + $0x14] ss:$8 sps:$4 sm:$0xff]   ;;  %s329_s13 = scalar_lea.vmem %s1936_s1, %s1298_s10  ;;  %s1897_s26 = scalar_lea.vmem %s1941_s6, %s1453_s19 }
  0x13   : > { %1412 = vmatprep.subr.bf16.mxu1 %v1495_v16  ;;  %595 = vmatprep.mubr.bf16.mxu0 %v1511_v31  ;;  %v1516_v35 = vld [vmem:[%s1751_s20 + $0x10] ss:$8 sps:$4 sm:$0xff]   ;;  %v1517_v36 = vld [vmem:[%s1751_s20 + $0x24] ss:$8 sps:$4 sm:$0xff]   ;;  %v1519_v37 = vld [vmem:[%s1751_s20 + $0x20] ss:$8 sps:$4 sm:$0xff]  }
  0x14   : > { %1345 = vmatpush3.bf16.msra.mxu0 %v1683_v11  ;;  %856 = vmatprep.mubr.bf16.mxu1 %v1511_v31  ;;  %v1520_v38 = vld [vmem:[%s1751_s20 + $0x34] ss:$8 sps:$4 sm:$0xff]   ;;  %v1522_v39 = vld [vmem:[%s1751_s20 + $0x30] ss:$8 sps:$4 sm:$0xff]   ;;  %v1523_v40 = vld [vmem:[%s1751_s20 + $0x44] ss:$8 sps:$4 sm:$0xff]  }
  0x15   : > { %1346 = vmatprep.subr.bf16.mxu0 %v1695_v14  ;;  %v636_v41 = vld [vmem:[%s329_s13] sm:$0xff] }
  0x16   : > { %1413 = vmatpush3.bf16.msra.mxu1 %v1496_v17  ;;  %v1525_v42 = vld [vmem:[%s1751_s20 + $0x40] ss:$8 sps:$4 sm:$0xff]   ;;  %v1265_v43 = vcombine.high %v636_v41, %v636_v41  ;;  %v1264_v44 = vcombine.low %v636_v41, %v636_v41 }
  0x17   : > { %1414 = vmatprep.subr.bf16.mxu1 %v1499_v20 }
  0x18   : > { %1347 = vmatpush3.bf16.msra.mxu0 %v1701_v15 }
  0x19   : > { %1348 = vmatprep.subr.bf16.mxu0 %v1497_v18 }
  0x1a   : > { %1415 = vmatpush3.bf16.msra.mxu1 %v1500_v21 }
  0x1b   : > { %1416 = vmatprep.subr.bf16.mxu1 %v1503_v24 }
  0x1c   : > { %1349 = vmatpush3.bf16.msra.mxu0 %v1498_v19 }
  0x1d   : > { %1350 = vmatprep.subr.bf16.mxu0 %v1501_v22 }
  0x1e   : > { %1417 = vmatpush3.bf16.msra.mxu1 %v1504_v25 }
  0x1f   : > { %1418 = vmatprep.subr.bf16.mxu1 %v1507_v28 }
  0x20   : > { %1351 = vmatpush3.bf16.msra.mxu0 %v1502_v23 }
  0x21   : > { %1352 = vmatprep.subr.bf16.mxu0 %v1505_v26 }
  0x22   : > { %1419 = vmatpush3.bf16.msra.mxu1 %v1508_v29 }
  0x23   : > { %1420 = vmatprep.subr.bf16.mxu1 %v1512_v32 }
  0x24   : > { %1353 = vmatpush3.bf16.msra.mxu0 %v1506_v27 }
  0x25   : > { %1384 = vmatprep.subr.bf16.mxu0 %v1630_v0 }
  0x26   : > { %1421 = vmatpush3.bf16.msra.mxu1 %v1513_v33 }
  0x27   : > { %596 = vmatmul.mubr.bf16.vlgmr.msra.gmra.mrb[0].mxu0 %v1509_v30 }
  0x28   : > { %1385 = vmatpush3.bf16.msra.mxu0 %v1635_v1  ;;  %603 = vmatprep.mubr.bf16.mxu0 %v1514_v34 }
  0x29   : > { %1386 = vmatprep.subr.bf16.mxu0 %v1641_v2  ;;  %857 = vmatmul.mubr.bf16.vlgmr.msra.gmra.mrb[0].mxu1 %v1509_v30 }
  0x2a   : > { %864 = vmatprep.mubr.bf16.mxu1 %v1514_v34 }
  0x2c   : > { %1387 = vmatpush3.bf16.msra.mxu0 %v1647_v3 }
  0x2d   : > { %1388 = vmatprep.subr.bf16.mxu0 %v1659_v6 }
  0x2f   : > { %604 = vmatmul.mubr.bf16.gmra.mrb[4].mxu0 %v1516_v35 }
  0x30   : > { %1389 = vmatpush3.bf16.msra.mxu0 %v1665_v7  ;;  %611 = vmatprep.mubr.bf16.mxu0 %v1517_v36 }
  0x31   : > { %1390 = vmatprep.subr.bf16.mxu0 %v1677_v10  ;;  %865 = vmatmul.mubr.bf16.gmra.mrb[4].mxu1 %v1516_v35 }
  0x32   : > { %872 = vmatprep.mubr.bf16.mxu1 %v1517_v36 }
  0x34   : > { %1391 = vmatpush3.bf16.msra.mxu0 %v1683_v11 }
  0x35   : > { %1392 = vmatprep.subr.bf16.mxu0 %v1695_v14 }
  0x37   : > { %612 = vmatmul.mubr.bf16.gmra.mrb[8].mxu0 %v1519_v37 }
  0x38   : > { %1393 = vmatpush3.bf16.msra.mxu0 %v1701_v15  ;;  %619 = vmatprep.mubr.bf16.mxu0 %v1520_v38 }
  0x39   : > { %1394 = vmatprep.subr.bf16.mxu0 %v1497_v18  ;;  %873 = vmatmul.mubr.bf16.gmra.mrb[8].mxu1 %v1519_v37 }
  0x3a   : > { %880 = vmatprep.mubr.bf16.mxu1 %v1520_v38 }
  0x3c   : > { %1395 = vmatpush3.bf16.msra.mxu0 %v1498_v19 }
  0x3d   : > { %1396 = vmatprep.subr.bf16.mxu0 %v1501_v22 }
  0x3f   : > { %620 = vmatmul.mubr.bf16.gmra.mrb[12].mxu0 %v1522_v39 }
  0x40   : > { %627 = vmatprep.mubr.bf16.mxu0 %v1523_v40  ;;  %1397 = vmatpush3.bf16.msra.mxu0 %v1502_v23 }
  0x41   : > { %1398 = vmatprep.subr.bf16.mxu0 %v1505_v26  ;;  %881 = vmatmul.mubr.bf16.gmra.mrb[12].mxu1 %v1522_v39 }
  0x42   : > { %888 = vmatprep.mubr.bf16.mxu1 %v1523_v40 }
  0x44   : > { %1399 = vmatpush3.bf16.msra.mxu0 %v1506_v27 }
  0x47   : > { %628 = vmatmul.mubr.bf16.gmra.mrb[16].mxu0 %v1525_v42 }
  0x48   : > { %676 = vmatprep.mubr.bf16.mxu0 %v1265_v43 }
  0x49   : > { %889 = vmatmul.mubr.bf16.gmra.mrb[16].mxu1 %v1525_v42 }
  0x4f   : > { %677 = vmatmul.mubr.bf16.vlgmr.msra.gmra.mrb[20].mxu0 %v1264_v44 }
  0xfa   : > { %v1354_v45 = vpop.f32.mrb[0].mxu0 }
  0xfb   : > { %v1355_v46 = vpop.f32.mrb[1].mxu0 }
  0xfc   : > { %v1356_v47 = vadd.f32 %v1355_v46, %v1354_v45  ;;  %v1357_v48 = vpop.f32.mrb[2].mxu0  ;;  %v1422_v51 = vpop.f32.mrb[0].mxu1 }
  0xfd   : > { %v1358_v49 = vpop.f32.mrb[3].mxu0  ;;  %v1423_v52 = vpop.f32.mrb[1].mxu1 }
  0xfe   : > { %v1359_v50 = vadd.f32 %v1358_v49, %v1357_v48  ;;  %v695_v53 = vrot.slane %v1356_v47, 1  ;;  %v1424_v55 = vadd.f32 %v1423_v52, %v1422_v51  ;;  %v1425_v56 = vpop.f32.mrb[2].mxu1 }
  0xff   : > { %v1426_v57 = vpop.f32.mrb[3].mxu1 }
 0x100   : > { %v696_v54 = vrot.slane %v1359_v50, 1  ;;  %v1427_v60 = vadd.f32 %v1426_v57, %v1425_v56 }
 0x102   : > { %v697_v58 = vsel %vm694_vm0, %v695_v53, %v696_v54  ;;  %v1360_v59 = vpop.f32.mrb[4].mxu0 }
 0x103   : > { %v859_v62 = vadd.f32 %v1424_v55, %v697_v58  ;;  %v1361_v63 = vpop.f32.mrb[5].mxu0 }
 0x104   : > { %v1362_v0 = vadd.f32 %v1361_v63, %v1360_v59  ;;  %v1363_v1 = vpop.f32.mrb[6].mxu0  ;;  %v1428_v6 = vpop.f32.mrb[4].mxu1 }
 0x105   : > { %v1364_v2 = vpop.f32.mrb[7].mxu0  ;;  %v1797_v3 = vadd.f32 %v1794_v61, %v859_v62  ;;  %v1429_v7 = vpop.f32.mrb[5].mxu1 }
 0x106   : > { %v698_v4 = vrot.slane %v1362_v0, 1  ;;  %v1365_v5 = vadd.f32 %v1364_v2, %v1363_v1  ;;  %v1430_v10 = vadd.f32 %v1429_v7, %v1428_v6  ;;  %v1431_v11 = vpop.f32.mrb[6].mxu1 }
 0x107   : > { %914 = vadd.xlane.f32.xlu0 %v1797_v3  ;;  %v1432_v13 = vpop.f32.mrb[7].mxu1 }
 0x108   : > { %v699_v8 = vsel %vm694_vm0, %v696_v54, %v698_v4  ;;  %v700_v9 = vrot.slane %v1365_v5, 1  ;;  %v1433_v16 = vadd.f32 %v1432_v13, %v1431_v11 }
 0x109   : > { %v862_v12 = vadd.f32 %v1427_v60, %v699_v8 }
 0x10a   : > { %v701_v14 = vsel %vm694_vm0, %v698_v4, %v700_v9  ;;  %v1366_v15 = vpop.f32.mrb[8].mxu0 }
 0x10b   : > { %v867_v17 = vadd.f32 %v1430_v10, %v701_v14  ;;  %v1367_v18 = vpop.f32.mrb[9].mxu0  ;;  %v1803_v19 = vadd.f32 %v1794_v61, %v862_v12 }
 0x10c   : > { %v1368_v20 = vadd.f32 %v1367_v18, %v1366_v15  ;;  %v1369_v21 = vpop.f32.mrb[10].mxu0  ;;  %v1434_v26 = vpop.f32.mrb[8].mxu1 }
 0x10d   : > { %v1370_v22 = vpop.f32.mrb[11].mxu0  ;;  %916 = vadd.xlane.f32.xlu0 %v1803_v19  ;;  %v1807_v23 = vadd.f32 %v1794_v61, %v867_v17  ;;  %v1435_v27 = vpop.f32.mrb[9].mxu1 }
 0x10e   : > { %v702_v24 = vrot.slane %v1368_v20, 1  ;;  %v1371_v25 = vadd.f32 %v1370_v22, %v1369_v21  ;;  %v1436_v30 = vadd.f32 %v1435_v27, %v1434_v26  ;;  %v1437_v31 = vpop.f32.mrb[10].mxu1 }
 0x10f   : > { %918 = vadd.xlane.f32.xlu1 %v1807_v23  ;;  %v1438_v33 = vpop.f32.mrb[11].mxu1 }
 0x110   : > { %v703_v28 = vsel %vm694_vm0, %v700_v9, %v702_v24  ;;  %v704_v29 = vrot.slane %v1371_v25, 1  ;;  %v1439_v36 = vadd.f32 %v1438_v33, %v1437_v31 }
 0x111   : > { %v870_v32 = vadd.f32 %v1433_v16, %v703_v28 }
 0x112   : > { %v705_v34 = vsel %vm694_vm0, %v702_v24, %v704_v29  ;;  %v1372_v35 = vpop.f32.mrb[12].mxu0 }
 0x113   : > { %v875_v37 = vadd.f32 %v1436_v30, %v705_v34  ;;  %v1373_v38 = vpop.f32.mrb[13].mxu0  ;;  %v1813_v39 = vadd.f32 %v1794_v61, %v870_v32 }
 0x114   : > { %v1374_v40 = vadd.f32 %v1373_v38, %v1372_v35  ;;  %v1375_v41 = vpop.f32.mrb[14].mxu0  ;;  %v1440_v46 = vpop.f32.mrb[12].mxu1 }
 0x115   : > { %v1376_v42 = vpop.f32.mrb[15].mxu0  ;;  %920 = vadd.xlane.f32.xlu1 %v1813_v39  ;;  %v1817_v43 = vadd.f32 %v1794_v61, %v875_v37  ;;  %v1441_v47 = vpop.f32.mrb[13].mxu1 }
 0x116   : > { %v706_v44 = vrot.slane %v1374_v40, 1  ;;  %v1377_v45 = vadd.f32 %v1376_v42, %v1375_v41  ;;  %v1442_v50 = vadd.f32 %v1441_v47, %v1440_v46  ;;  %v1443_v51 = vpop.f32.mrb[14].mxu1 }
 0x117   : > { %922 = vadd.xlane.f32.xlu0 %v1817_v43  ;;  %v1444_v53 = vpop.f32.mrb[15].mxu1 }
 0x118   : > { %v707_v48 = vsel %vm694_vm0, %v704_v29, %v706_v44  ;;  %v708_v49 = vrot.slane %v1377_v45, 1  ;;  %v1445_v56 = vadd.f32 %v1444_v53, %v1443_v51 }
 0x119   : > { %v878_v52 = vadd.f32 %v1439_v36, %v707_v48 }
 0x11a   : > { %v709_v54 = vsel %vm694_vm0, %v706_v44, %v708_v49  ;;  %v1378_v55 = vpop.f32.mrb[16].mxu0 }
 0x11b   : > { %v883_v57 = vadd.f32 %v1442_v50, %v709_v54  ;;  %v1379_v58 = vpop.f32.mrb[17].mxu0  ;;  %v909_v59 = vadd.f32 %v1794_v61, %v878_v52 }
 0x11c   : > { %v1380_v60 = vadd.f32 %v1379_v58, %v1378_v55  ;;  %v1381_v62 = vpop.f32.mrb[18].mxu0  ;;  %v1446_v4 = vpop.f32.mrb[16].mxu1 }
 0x11d   : > { %v1382_v63 = vpop.f32.mrb[19].mxu0  ;;  %924 = vadd.xlane.f32.xlu1 %v909_v59  ;;  %v910_v0 = vadd.f32 %v1794_v61, %v883_v57  ;;  %v1447_v5 = vpop.f32.mrb[17].mxu1 }
 0x11e   : > { %v710_v1 = vrot.slane %v1380_v60, 1  ;;  %v1383_v2 = vadd.f32 %v1382_v63, %v1381_v62  ;;  %v1448_v8 = vadd.f32 %v1447_v5, %v1446_v4  ;;  %v1449_v9 = vpop.f32.mrb[18].mxu1 }
 0x11f   : > { %926 = vadd.xlane.f32.xlu0 %v910_v0  ;;  %v1450_v11 = vpop.f32.mrb[19].mxu1 }
 0x120   : > { %v711_v6 = vsel %vm694_vm0, %v708_v49, %v710_v1  ;;  %v712_v7 = vrot.slane %v1383_v2, 1  ;;  %v1451_v14 = vadd.f32 %v1450_v11, %v1449_v9 }
 0x121   : > { %v886_v10 = vadd.f32 %v1445_v56, %v711_v6 }
 0x122   : > { %v713_v12 = vsel %vm694_vm0, %v710_v1, %v712_v7  ;;  %v1400_v13 = vpop.f32.mrb[20].mxu0 }
 0x123   : > { %v891_v15 = vadd.f32 %v1448_v8, %v713_v12  ;;  %v1401_v16 = vpop.f32.mrb[21].mxu0  ;;  %v911_v17 = vadd.f32 %v1794_v61, %v886_v10 }
 0x124   : > { %v1402_v18 = vadd.f32 %v1401_v16, %v1400_v13  ;;  %v1403_v20 = vpop.f32.mrb[22].mxu0  ;;  %v1879_v16 = vld [vmem:[%s1939_s4] ss:$0 sm:$0xff] }
 0x125   : > { %v1404_v21 = vpop.f32.mrb[23].mxu0  ;;  %928 = vadd.xlane.f32.xlu1 %v911_v17  ;;  %v912_v22 = vadd.f32 %v1794_v61, %v891_v15 }
 0x126   : > { %v725_v24 = vrot.slane %v1402_v18, 1 }
 0x127   : > { %930 = vadd.xlane.f32.xlu0 %v912_v22 }
 0x128   : > { %v727_v25 = vsel %vm694_vm0, %v712_v7, %v725_v24  ;;  %v1885_v24 = vld [vmem:[%s1940_s5] ss:$0 sm:$0xff] }
 0x129   : > { %v894_v26 = vadd.f32 %v1451_v14, %v727_v25 }
 0x12b   : > { %v913_v27 = vadd.f32 %v1794_v61, %v894_v26 }
 0x12d   : > { %932 = vadd.xlane.f32.xlu1 %v913_v27 }
 0x194   : > { %v915_v28 = vpop.xlane.xlu0 %914 }
 0x195   : > { %v935_v29 = vmul.f32 0.0078125, %v915_v28 }
 0x197   : > { %v1831_v30 = vsub.f32 %v1797_v3, %v935_v29 }
 0x199   : > { %v955_v31 = vmul.f32 %v1831_v30, %v1831_v30 }
 0x19a   : > { %v917_v32 = vpop.xlane.xlu0 %916 }
 0x19b   : > { %v936_v33 = vmul.f32 0.0078125, %v917_v32  ;;  %965 = vadd.xlane.f32.xlu0 %v955_v31 }
 0x19c   : > { %v919_v34 = vpop.xlane.xlu1 %918 }
 0x19d   : > { %v1836_v35 = vsub.f32 %v1803_v19, %v936_v33  ;;  %v937_v36 = vmul.f32 0.0078125, %v919_v34 }
 0x19f   : > { %v1839_v37 = vsub.f32 %v1807_v23, %v937_v36  ;;  %v956_v61 = vmul.f32 %v1836_v35, %v1836_v35 }
 0x1a1   : > { %967 = vadd.xlane.f32.xlu1 %v956_v61  ;;  %v957_v3 = vmul.f32 %v1839_v37, %v1839_v37 }
 0x1a2   : > { %v921_v38 = vpop.xlane.xlu1 %920 }
 0x1a3   : > { %v938_v40 = vmul.f32 0.0078125, %v921_v38  ;;  %969 = vadd.xlane.f32.xlu0 %v957_v3 }
 0x1a4   : > { %v923_v41 = vpop.xlane.xlu0 %922 }
 0x1a5   : > { %v1846_v42 = vsub.f32 %v1813_v39, %v938_v40  ;;  %v939_v19 = vmul.f32 0.0078125, %v923_v41 }
 0x1a7   : > { %v1849_v44 = vsub.f32 %v1817_v43, %v939_v19  ;;  %v958_v23 = vmul.f32 %v1846_v42, %v1846_v42 }
 0x1a9   : > { %971 = vadd.xlane.f32.xlu1 %v958_v23  ;;  %v959_v45 = vmul.f32 %v1849_v44, %v1849_v44 }
 0x1aa   : > { %v925_v46 = vpop.xlane.xlu1 %924 }
 0x1ab   : > { %v940_v47 = vmul.f32 0.0078125, %v925_v46  ;;  %973 = vadd.xlane.f32.xlu0 %v959_v45 }
 0x1ac   : > { %v927_v48 = vpop.xlane.xlu0 %926 }
 0x1ad   : > { %v1855_v49 = vsub.f32 %v909_v59, %v940_v47  ;;  %v941_v50 = vmul.f32 0.0078125, %v927_v48 }
 0x1af   : > { %v1857_v39 = vsub.f32 %v910_v0, %v941_v50  ;;  %v960_v43 = vmul.f32 %v1855_v49, %v1855_v49 }
 0x1b1   : > { %975 = vadd.xlane.f32.xlu1 %v960_v43  ;;  %v961_v51 = vmul.f32 %v1857_v39, %v1857_v39 }
 0x1b2   : > { %v929_v52 = vpop.xlane.xlu1 %928 }
 0x1b3   : > { %v942_v53 = vmul.f32 0.0078125, %v929_v52  ;;  %977 = vadd.xlane.f32.xlu0 %v961_v51 }
 0x1b4   : > { %v931_v54 = vpop.xlane.xlu0 %930 }
 0x1b5   : > { %v1863_v55 = vsub.f32 %v911_v17, %v942_v53  ;;  %v943_v56 = vmul.f32 0.0078125, %v931_v54 }
 0x1b7   : > { %v1865_v57 = vsub.f32 %v912_v22, %v943_v56  ;;  %v962_v58 = vmul.f32 %v1863_v55, %v1863_v55 }
 0x1b9   : > { %979 = vadd.xlane.f32.xlu1 %v962_v58  ;;  %v963_v59 = vmul.f32 %v1865_v57, %v1865_v57 }
 0x1ba   : > { %v933_v60 = vpop.xlane.xlu1 %932 }
 0x1bb   : > { %v944_v62 = vmul.f32 0.0078125, %v933_v60  ;;  %981 = vadd.xlane.f32.xlu0 %v963_v59 }
 0x1bd   : > { %v1871_v63 = vsub.f32 %v913_v27, %v944_v62 }
 0x1bf   : > { %v964_v0 = vmul.f32 %v1871_v63, %v1871_v63 }
 0x1c1   : > { %983 = vadd.xlane.f32.xlu1 %v964_v0 }
 0x228   : > { %v966_v1 = vpop.xlane.xlu0 %965 }
 0x229   : > { %v985_v2 = vmul.f32 0.007874016, %v966_v1 }
 0x22b   : > { %v995_v4 = vadd.f32 1e-05, %v985_v2 }
 0x22d   : > { %1528 = vrsqrt.f32 %v995_v4 }
 0x22e   : > { %v968_v5 = vpop.xlane.xlu1 %967 }
 0x22f   : > { %v986_v6 = vmul.f32 0.007874016, %v968_v5 }
 0x230   : > { %v970_v7 = vpop.xlane.xlu0 %969 }
 0x231   : > { %v996_v8 = vadd.f32 1e-05, %v986_v6  ;;  %v987_v9 = vmul.f32 0.007874016, %v970_v7 }
 0x233   : > { %1530 = vrsqrt.f32 %v996_v8  ;;  %v997_v10 = vadd.f32 1e-05, %v987_v9 }
 0x235   : > { %1532 = vrsqrt.f32 %v997_v10 }
 0x236   : > { %v972_v11 = vpop.xlane.xlu1 %971 }
 0x237   : > { %v1529_v12 = vpop.eup %1528  ;;  %v988_v13 = vmul.f32 0.007874016, %v972_v11 }
 0x238   : > { %v1015_v14 = vmul.f32 %v1529_v12, %v1831_v30  ;;  %v974_v15 = vpop.xlane.xlu0 %973 }
 0x239   : > { %v998_v17 = vadd.f32 1e-05, %v988_v13  ;;  %v989_v18 = vmul.f32 0.007874016, %v974_v15 }
 0x23a   : > { %v1032_v21 = vmul.f32 %v1879_v16, %v1015_v14 }
 0x23b   : > { %1534 = vrsqrt.f32 %v998_v17  ;;  %v999_v20 = vadd.f32 1e-05, %v989_v18 }
 0x23c   : > { %v1049_v29 = vadd.f32 %v1885_v24, %v1032_v21 }
 0x23d   : > { %v1531_v22 = vpop.eup %1530  ;;  %1536 = vrsqrt.f32 %v999_v20 }
 0x23e   : > { %v1016_v25 = vmul.f32 %v1531_v22, %v1836_v35  ;;  %v976_v26 = vpop.xlane.xlu1 %975  ;;  %v1059_v3 = vmax.f32 %v1049_v29, 0.0 }
 0x23f   : > { %v1533_v27 = vpop.eup %1532  ;;  %v990_v28 = vmul.f32 0.007874016, %v976_v26 }
 0x240   : > { %v1033_v30 = vmul.f32 %v1879_v16, %v1016_v25  ;;  %v1017_v31 = vmul.f32 %v1533_v27, %v1839_v37  ;;  %v978_v32 = vpop.xlane.xlu0 %977 }
 0x241   : > { %v1000_v33 = vadd.f32 1e-05, %v990_v28  ;;  %v991_v34 = vmul.f32 0.007874016, %v978_v32 }
 0x242   : > { %v1050_v36 = vadd.f32 %v1885_v24, %v1033_v30  ;;  %v1034_v35 = vmul.f32 %v1879_v16, %v1017_v31 }
 0x243   : > { %1538 = vrsqrt.f32 %v1000_v33  ;;  %v1001_v61 = vadd.f32 1e-05, %v991_v34 }
 0x244   : > { %v1060_v38 = vmax.f32 %v1050_v36, 0.0  ;;  %v1051_v46 = vadd.f32 %v1885_v24, %v1034_v35 }
 0x245   : > { %v1535_v40 = vpop.eup %1534  ;;  %1540 = vrsqrt.f32 %v1001_v61 }
 0x246   : > { %v1312_v37 = vpack.c.bf16 %v1060_v38, %v1059_v3  ;;  %v1018_v41 = vmul.f32 %v1535_v40, %v1846_v42  ;;  %v980_v19 = vpop.xlane.xlu1 %979  ;;  %v1061_v54 = vmax.f32 %v1051_v46, 0.0 }
 0x247   : > { %v1537_v23 = vpop.eup %1536  ;;  %v992_v45 = vmul.f32 0.007874016, %v980_v19 }
 0x248   : > { %1313 = vst [vmem:[%s1897_s26] sm:$0xff] %v1312_v37   ;;  %v1035_v47 = vmul.f32 %v1879_v16, %v1018_v41  ;;  %v1019_v48 = vmul.f32 %v1537_v23, %v1849_v44  ;;  %v982_v50 = vpop.xlane.xlu0 %981 }
 0x249   : > { %v1002_v43 = vadd.f32 1e-05, %v992_v45  ;;  %v993_v51 = vmul.f32 0.007874016, %v982_v50 }
 0x24a   : > { %v1052_v52 = vadd.f32 %v1885_v24, %v1035_v47  ;;  %v1036_v56 = vmul.f32 %v1879_v16, %v1019_v48 }
 0x24b   : > { %1542 = vrsqrt.f32 %v1002_v43  ;;  %v1003_v53 = vadd.f32 1e-05, %v993_v51 }
 0x24c   : > { %v1062_v42 = vmax.f32 %v1052_v52, 0.0  ;;  %v1053_v1 = vadd.f32 %v1885_v24, %v1036_v56 }
 0x24d   : > { %v1539_v58 = vpop.eup %1538  ;;  %1544 = vrsqrt.f32 %v1003_v53 }
 0x24e   : > { %v1317_v59 = vpack.c.bf16 %v1062_v42, %v1061_v54  ;;  %v1020_v60 = vmul.f32 %v1539_v58, %v1855_v49  ;;  %v984_v62 = vpop.xlane.xlu1 %983  ;;  %v1063_v7 = vmax.f32 %v1053_v1, 0.0 }
 0x24f   : > { %v1541_v0 = vpop.eup %1540  ;;  %v994_v44 = vmul.f32 0.007874016, %v984_v62 }
 0x250   : > { %1334 = vst [vmem:[%s1897_s26 + $0x8] sm:$0xff] %v1317_v59   ;;  %v1037_v2 = vmul.f32 %v1879_v16, %v1020_v60  ;;  %v1021_v4 = vmul.f32 %v1541_v0, %v1857_v39 }
 0x251   : > { %v1004_v5 = vadd.f32 1e-05, %v994_v44 }
 0x252   : > { %v1054_v6 = vadd.f32 %v1885_v24, %v1037_v2  ;;  %v1038_v9 = vmul.f32 %v1879_v16, %v1021_v4 }
 0x253   : > { %1546 = vrsqrt.f32 %v1004_v5 }
 0x254   : > { %v1064_v8 = vmax.f32 %v1054_v6, 0.0  ;;  %v1055_v13 = vadd.f32 %v1885_v24, %v1038_v9 }
 0x255   : > { %v1543_v49 = vpop.eup %1542 }
 0x256   : > { %v1322_v10 = vpack.c.bf16 %v1064_v8, %v1063_v7  ;;  %v1022_v11 = vmul.f32 %v1543_v49, %v1863_v55  ;;  %v1065_v17 = vmax.f32 %v1055_v13, 0.0 }
 0x257   : > { %v1545_v12 = vpop.eup %1544 }
 0x258   : > { %1335 = vst [vmem:[%s1897_s26 + $0x10] sm:$0xff] %v1322_v10   ;;  %v1039_v14 = vmul.f32 %v1879_v16, %v1022_v11  ;;  %v1023_v39 = vmul.f32 %v1545_v12, %v1865_v57 }
 0x25a   : > { %v1056_v15 = vadd.f32 %v1885_v24, %v1039_v14  ;;  %v1040_v20 = vmul.f32 %v1879_v16, %v1023_v39 }
 0x25c   : > { %v1066_v18 = vmax.f32 %v1056_v15, 0.0  ;;  %v1057_v55 = vadd.f32 %v1885_v24, %v1040_v20 }
 0x25d   : > { %v1547_v21 = vpop.eup %1546 }
 0x25e   : > { %v1327_v22 = vpack.c.bf16 %v1066_v18, %v1065_v17  ;;  %v1024_v25 = vmul.f32 %v1547_v21, %v1871_v63  ;;  %v1067_v28 = vmax.f32 %v1057_v55, 0.0 }
 0x260   : > { %1336 = vst [vmem:[%s1897_s26 + $0x18] sm:$0xff] %v1327_v22   ;;  %v1041_v26 = vmul.f32 %v1879_v16, %v1024_v25 }
 0x262   : > { %v1058_v27 = vadd.f32 %v1885_v24, %v1041_v26 }
 0x264   : > { %v1068_v29 = vmax.f32 %v1058_v27, 0.0 }
 0x266   : > { %v1332_v57 = vpack.c.bf16 %v1068_v29, %v1067_v28 }
 0x268   : > { %1337 = vst [vmem:[%s1897_s26 + $0x20] sm:$0xff] %v1332_v57  }
 0x269 PF: > { %s16_s23 = sadd.s32 1, %s1570_s23   ;;  %s1942_s21 = smov %s1566_s22 }
 0x26a   : > { %p13_p5 = scmp.ge.s32.totalorder %s16_s23, 4   ;;  %s1943_s22 = smov %s1945_s24 }
 0x26c   :  { %15 = sbr.rel (!%p13_p5) target bundleno = 2 (0x2), region = 77 }

// kernel: cpc_encoder_forward.6
= control target key start
LH: loop header
LB: loop body
LE: loop exit
PB: predicated region body
PF: predicated region fallthrough
CT: control target
= control target key end

     0   :  { %s1353_s21 = smov 0   ;;  %s1355_s22 = smov 0   ;;  %s1559_s0 = inlined_call_operand.vmem [shape: bf16[2,80,256], index: 0, kind: input, shape index: {}, may-alias: {0,1}]   ;;  %s1560_s1 = inlined_call_operand.vmem [shape: bf16[2,80,256], index: 1, kind: input, shape index: {}, may-alias: {0,1}]   ;;  %s1561_s2 = inlined_call_operand.vmem [shape: bf16[512,128], index: 2, kind: input, shape index: {}]   ;;  %s1562_s3 = inlined_call_operand.vmem [shape: f32[1,128], index: 3, kind: input, shape index: {}]   ;;  %s1563_s4 = inlined_call_operand.vmem [shape: f32[1,128], index: 4, kind: input, shape index: {}]   ;;  %s1564_s5 = inlined_call_operand.vmem [shape: f32[1,128], index: 5, kind: input, shape index: {}]   ;;  %s1565_s6 = inlined_call_operand.vmem [shape: bf16[2,40,128], index: 6, kind: output, shape index: {}]  }
   0x1   :  { %s1357_s23 = smov 0  }
   0x2 LB: > { %s28_s24 = sadd.s32 1, %s1312_s22  ;;  %p1053_p0 = scmp.ge.s32.totalorder %s1316_s23, 1  ;;  %s1316_s23 = sphi %s1357_s23, %s16_s23   ;;  %s1312_s22 = sphi %s1355_s22, %s1567_s22   ;;  %s1308_s21 = sphi %s1353_s21, %s1566_s21  }
   0x3   : > { %p30_p1 = scmp.ge.s32.totalorder %s28_s24, 2  ;;  %p258_p2 = scmp.lt.s32.totalorder %s1316_s23, 3 }
   0x5   : > { %s1569_s24 = smov (%p30_p1, %s28_s24), 0  ;;  %p259_p3 = pnand %p1053_p0, %p258_p2 }
   0x6   : > { %v1376_v0 = vld [vmem:[%s1561_s2 + $0xc0] sm:$0xff] (!%p259_p3)   ;;  %v1387_v2 = vld [vmem:[%s1561_s2 + $0xc8] sm:$0xff] (!%p259_p3)   ;;  %v1405_v6 = vld [vmem:[%s1561_s2 + $0xd0] sm:$0xff] (!%p259_p3)   ;;  %p309_p4 = scmp.lt.s32.totalorder (!%p259_p3), %s1308_s21, 1  ;;  %vm644_vm0 = vcmask (!%p259_p3), 1046528  }
   0x7   : > { %262 = sbr.rel (%p259_p3) target bundleno = 609 (0x261), region = 44  ;;  %v1381_v1 = vld [vmem:[%s1561_s2 + $0x80] sm:$0xff] (!%p259_p3)   ;;  %1125 = vmatprep.subr.bf16.mxu1 (!%p259_p3), %v1376_v0  ;;  %v1393_v3 = vld [vmem:[%s1561_s2 + $0x88] sm:$0xff] (!%p259_p3)   ;;  %v1411_v7 = vld [vmem:[%s1561_s2 + $0x90] sm:$0xff] (!%p259_p3)  }
   0x8   : > { %1126 = vmatpush3.bf16.msra.mxu1 (!%p259_p3), %v1381_v1  ;;  %v1246_v4 = vld [vmem:[%s1561_s2 + $0x40] sm:$0xff] (!%p259_p3)   ;;  %v1250_v8 = vld [vmem:[%s1561_s2 + $0x48] sm:$0xff] (!%p259_p3)   ;;  %v1423_v10 = vld [vmem:[%s1561_s2 + $0xd8] sm:$0xff] (!%p259_p3)  }
   0x9   : > { %1127 = vmatprep.subr.bf16.mxu1 (!%p259_p3), %v1387_v2  ;;  %v1247_v5 = vld [vmem:[%s1561_s2] sm:$0xff] (!%p259_p3)   ;;  %1181 = vmatprep.subr.bf16.mxu0 (!%p259_p3), %v1246_v4  ;;  %v1251_v9 = vld [vmem:[%s1561_s2 + $0x8] sm:$0xff] (!%p259_p3)   ;;  %v1429_v11 = vld [vmem:[%s1561_s2 + $0x98] sm:$0xff] (!%p259_p3)  }
   0xa   : > { %1182 = vmatpush3.bf16.msra.mxu0 (!%p259_p3), %v1247_v5  ;;  %v1254_v12 = vld [vmem:[%s1561_s2 + $0x50] sm:$0xff] (!%p259_p3)   ;;  %v1441_v14 = vld [vmem:[%s1561_s2 + $0xe0] sm:$0xff] (!%p259_p3)   ;;  %v1258_v16 = vld [vmem:[%s1561_s2 + $0x58] sm:$0xff] (!%p259_p3)  }
   0xb   : > { %1183 = vmatprep.subr.bf16.mxu0 (!%p259_p3), %v1250_v8  ;;  %v1255_v13 = vld [vmem:[%s1561_s2 + $0x10] sm:$0xff] (!%p259_p3)   ;;  %v1447_v15 = vld [vmem:[%s1561_s2 + $0xa0] sm:$0xff] (!%p259_p3)   ;;  %v1259_v17 = vld [vmem:[%s1561_s2 + $0x18] sm:$0xff] (!%p259_p3)  }
   0xc   : > { %1128 = vmatpush3.bf16.msra.mxu1 (!%p259_p3), %v1393_v3  ;;  %v1460_v18 = vld [vmem:[%s1561_s2 + $0xe8] sm:$0xff] (!%p259_p3)   ;;  %v1262_v20 = vld [vmem:[%s1561_s2 + $0x60] sm:$0xff] (!%p259_p3)   ;;  %v1264_v22 = vld [vmem:[%s1561_s2 + $0xf0] sm:$0xff] (!%p259_p3)  }
   0xd   : > { %1129 = vmatprep.subr.bf16.mxu1 (!%p259_p3), %v1405_v6  ;;  %v1466_v19 = vld [vmem:[%s1561_s2 + $0xa8] sm:$0xff] (!%p259_p3)   ;;  %v1263_v21 = vld [vmem:[%s1561_s2 + $0x20] sm:$0xff] (!%p259_p3)   ;;  %v1265_v23 = vld [vmem:[%s1561_s2 + $0xb0] sm:$0xff] (!%p259_p3)  }
   0xe   : > { %1184 = vmatpush3.bf16.msra.mxu0 %v1251_v9  ;;  %s1571_s21 = smov (!%p309_p4, %s1308_s21), 1  ;;  %v1266_v24 = vld [vmem:[%s1561_s2 + $0x68] sm:$0xff]   ;;  %v1268_v26 = vld [vmem:[%s1561_s2 + $0xf8] sm:$0xff]   ;;  %v1270_v28 = vld [vmem:[%s1561_s2 + $0x70] sm:$0xff]  }
   0xf   : > { %1185 = vmatprep.subr.bf16.mxu0 %v1254_v12  ;;  %s1215_s9 = smul.u32 80, %s1571_s21  ;;  %v1267_v25 = vld [vmem:[%s1561_s2 + $0x28] sm:$0xff]   ;;  %v1269_v27 = vld [vmem:[%s1561_s2 + $0xb8] sm:$0xff]   ;;  %v1271_v29 = vld [vmem:[%s1561_s2 + $0x30] sm:$0xff]  }
  0x10   : > { %1130 = vmatpush3.bf16.msra.mxu1 %v1411_v7  ;;  %v1275_v32 = vld [vmem:[%s1561_s2 + $0x78] sm:$0xff]   ;;  %v1097_v58 = vld [vmem:[%s1562_s3] ss:$0 sm:$0xff]  ;;  %s1216_s19 = smul.u32 20, %s1571_s21 }
  0x11   : > { %1131 = vmatprep.subr.bf16.mxu1 %v1423_v10  ;;  %s317_s20 = scalar_lea.vmem %s1559_s0, %s1215_s9  ;;  %v1276_v33 = vld [vmem:[%s1561_s2 + $0x38] sm:$0xff]   ;;  %s1108_s10 = sadd.s32 40, %s1215_s9 }
  0x12   : > { %1186 = vmatpush3.bf16.msra.mxu0 %v1255_v13  ;;  %v1272_v30 = vld [vmem:[%s317_s20] ss:$8 sps:$4 sm:$0xff]   ;;  %v1274_v31 = vld [vmem:[%s317_s20 + $0x4] ss:$8 sps:$4 sm:$0xff]   ;;  %v1277_v34 = vld [vmem:[%s317_s20 + $0x14] ss:$8 sps:$4 sm:$0xff]   ;;  %s329_s13 = scalar_lea.vmem %s1560_s1, %s1108_s10  ;;  %s340_s26 = scalar_lea.vmem %s1565_s6, %s1216_s19 }
  0x13   : > { %1187 = vmatprep.subr.bf16.mxu0 %v1258_v16  ;;  %567 = vmatprep.mubr.bf16.mxu1 %v1274_v31  ;;  %v347_v35 = vld [vmem:[%s317_s20 + $0x20] sm:$0xff]  ;;  %v1279_v36 = vld [vmem:[%s317_s20 + $0x10] ss:$8 sps:$4 sm:$0xff]  }
  0x14   : > { %1132 = vmatpush3.bf16.msra.mxu1 %v1429_v11  ;;  %791 = vmatprep.mubr.bf16.mxu0 %v1274_v31  ;;  %v1062_v37 = vcombine.high %v347_v35, %v347_v35  ;;  %v591_v38 = vld [vmem:[%s329_s13] sm:$0xff]  ;;  %v1061_v39 = vcombine.low %v347_v35, %v347_v35 }
  0x15   : > { %1133 = vmatprep.subr.bf16.mxu1 %v1441_v14  ;;  %v1080_v40 = vcombine.high %v591_v38, %v591_v38  ;;  %v1079_v41 = vcombine.low %v591_v38, %v591_v38 }
  0x16   : > { %1188 = vmatpush3.bf16.msra.mxu0 %v1259_v17 }
  0x17   : > { %1189 = vmatprep.subr.bf16.mxu0 %v1262_v20 }
  0x18   : > { %1134 = vmatpush3.bf16.msra.mxu1 %v1447_v15 }
  0x19   : > { %1135 = vmatprep.subr.bf16.mxu1 %v1460_v18 }
  0x1a   : > { %1190 = vmatpush3.bf16.msra.mxu0 %v1263_v21 }
  0x1b   : > { %1191 = vmatprep.subr.bf16.mxu0 %v1266_v24 }
  0x1c   : > { %1136 = vmatpush3.bf16.msra.mxu1 %v1466_v19 }
  0x1d   : > { %1137 = vmatprep.subr.bf16.mxu1 %v1264_v22 }
  0x1e   : > { %1192 = vmatpush3.bf16.msra.mxu0 %v1267_v25 }
  0x1f   : > { %1193 = vmatprep.subr.bf16.mxu0 %v1270_v28 }
  0x20   : > { %1138 = vmatpush3.bf16.msra.mxu1 %v1265_v23 }
  0x21   : > { %1139 = vmatprep.subr.bf16.mxu1 %v1268_v26 }
  0x22   : > { %1194 = vmatpush3.bf16.msra.mxu0 %v1271_v29 }
  0x23   : > { %1195 = vmatprep.subr.bf16.mxu0 %v1275_v32 }
  0x24   : > { %1140 = vmatpush3.bf16.msra.mxu1 %v1269_v27 }
  0x25   : > { %1159 = vmatprep.subr.bf16.mxu1 %v1376_v0 }
  0x26   : > { %1196 = vmatpush3.bf16.msra.mxu0 %v1276_v33 }
  0x27   : > { %568 = vmatmul.mubr.bf16.vlgmr.msra.gmra.mrb[0].mxu1 %v1272_v30 }
  0x28   : > { %1160 = vmatpush3.bf16.msra.mxu1 %v1381_v1  ;;  %575 = vmatprep.mubr.bf16.mxu1 %v1277_v34 }
  0x29   : > { %1161 = vmatprep.subr.bf16.mxu1 %v1387_v2  ;;  %792 = vmatmul.mubr.bf16.vlgmr.msra.gmra.mrb[0].mxu0 %v1272_v30 }
  0x2a   : > { %799 = vmatprep.mubr.bf16.mxu0 %v1277_v34 }
  0x2c   : > { %1162 = vmatpush3.bf16.msra.mxu1 %v1393_v3 }
  0x2d   : > { %1163 = vmatprep.subr.bf16.mxu1 %v1405_v6 }
  0x2f   : > { %576 = vmatmul.mubr.bf16.gmra.mrb[4].mxu1 %v1279_v36 }
  0x30   : > { %1164 = vmatpush3.bf16.msra.mxu1 %v1411_v7  ;;  %583 = vmatprep.mubr.bf16.mxu1 %v1062_v37 }
  0x31   : > { %1165 = vmatprep.subr.bf16.mxu1 %v1423_v10  ;;  %800 = vmatmul.mubr.bf16.gmra.mrb[4].mxu0 %v1279_v36 }
  0x32   : > { %807 = vmatprep.mubr.bf16.mxu0 %v1062_v37 }
  0x34   : > { %1166 = vmatpush3.bf16.msra.mxu1 %v1429_v11 }
  0x35   : > { %1167 = vmatprep.subr.bf16.mxu1 %v1441_v14 }
  0x37   : > { %584 = vmatmul.mubr.bf16.gmra.mrb[8].mxu1 %v1061_v39 }
  0x38   : > { %1168 = vmatpush3.bf16.msra.mxu1 %v1447_v15  ;;  %631 = vmatprep.mubr.bf16.mxu1 %v1080_v40 }
  0x39   : > { %1169 = vmatprep.subr.bf16.mxu1 %v1460_v18  ;;  %808 = vmatmul.mubr.bf16.gmra.mrb[8].mxu0 %v1061_v39 }
  0x3c   : > { %1170 = vmatpush3.bf16.msra.mxu1 %v1466_v19 }
  0x3d   : > { %1171 = vmatprep.subr.bf16.mxu1 %v1264_v22 }
  0x40   : > { %1172 = vmatpush3.bf16.msra.mxu1 %v1265_v23 }
  0x41   : > { %1173 = vmatprep.subr.bf16.mxu1 %v1268_v26 }
  0x44   : > { %1174 = vmatpush3.bf16.msra.mxu1 %v1269_v27 }
  0x47   : > { %632 = vmatmul.mubr.bf16.vlgmr.msra.gmra.mrb[12].mxu1 %v1079_v41 }
  0xfa   : > { %v1141_v42 = vpop.f32.mrb[0].mxu1 }
  0xfb   : > { %v1142_v43 = vpop.f32.mrb[1].mxu1 }
  0xfc   : > { %v1143_v44 = vadd.f32 %v1142_v43, %v1141_v42  ;;  %v1144_v45 = vpop.f32.mrb[2].mxu1  ;;  %v1197_v48 = vpop.f32.mrb[0].mxu0 }
  0xfd   : > { %v1145_v46 = vpop.f32.mrb[3].mxu1  ;;  %v1198_v49 = vpop.f32.mrb[1].mxu0 }
  0xfe   : > { %v1146_v47 = vadd.f32 %v1145_v46, %v1144_v45  ;;  %v645_v50 = vrot.slane %v1143_v44, 1  ;;  %v1199_v52 = vadd.f32 %v1198_v49, %v1197_v48  ;;  %v1200_v53 = vpop.f32.mrb[2].mxu0 }
  0xff   : > { %v1201_v54 = vpop.f32.mrb[3].mxu0 }
 0x100   : > { %v646_v51 = vrot.slane %v1146_v47, 1  ;;  %v1202_v57 = vadd.f32 %v1201_v54, %v1200_v53 }
 0x102   : > { %v647_v55 = vsel %vm644_vm0, %v645_v50, %v646_v51  ;;  %v1147_v56 = vpop.f32.mrb[4].mxu1 }
 0x103   : > { %v794_v59 = vadd.f32 %v1199_v52, %v647_v55  ;;  %v1148_v60 = vpop.f32.mrb[5].mxu1 }
 0x104   : > { %v1149_v61 = vadd.f32 %v1148_v60, %v1147_v56  ;;  %v1150_v62 = vpop.f32.mrb[6].mxu1  ;;  %v1203_v3 = vpop.f32.mrb[4].mxu0 }
 0x105   : > { %v1151_v63 = vpop.f32.mrb[7].mxu1  ;;  %v822_v0 = vadd.f32 %v1097_v58, %v794_v59  ;;  %v1204_v4 = vpop.f32.mrb[5].mxu0 }
 0x106   : > { %v648_v1 = vrot.slane %v1149_v61, 1  ;;  %v1152_v2 = vadd.f32 %v1151_v63, %v1150_v62  ;;  %v1205_v7 = vadd.f32 %v1204_v4, %v1203_v3  ;;  %v1206_v8 = vpop.f32.mrb[6].mxu0 }
 0x107   : > { %827 = vadd.xlane.f32.xlu0 %v822_v0  ;;  %v1207_v10 = vpop.f32.mrb[7].mxu0 }
 0x108   : > { %v650_v5 = vrot.slane %v1152_v2, 1  ;;  %v649_v6 = vsel %vm644_vm0, %v646_v51, %v648_v1  ;;  %v1208_v13 = vadd.f32 %v1207_v10, %v1206_v8  ;;  %v1098_v8 = vld [vmem:[%s1563_s4] ss:$0 sm:$0xff] }
 0x109   : > { %v797_v9 = vadd.f32 %v1202_v57, %v649_v6 }
 0x10a   : > { %v651_v11 = vsel %vm644_vm0, %v648_v1, %v650_v5  ;;  %v1153_v12 = vpop.f32.mrb[8].mxu1 }
 0x10b   : > { %v802_v14 = vadd.f32 %v1205_v7, %v651_v11  ;;  %v1154_v15 = vpop.f32.mrb[9].mxu1  ;;  %v823_v16 = vadd.f32 %v1097_v58, %v797_v9 }
 0x10c   : > { %v1155_v17 = vadd.f32 %v1154_v15, %v1153_v12  ;;  %v1156_v18 = vpop.f32.mrb[10].mxu1  ;;  %v1209_v22 = vpop.f32.mrb[8].mxu0  ;;  %v1099_v12 = vld [vmem:[%s1564_s5] ss:$0 sm:$0xff] }
 0x10d   : > { %829 = vadd.xlane.f32.xlu0 %v823_v16  ;;  %v824_v19 = vadd.f32 %v1097_v58, %v802_v14  ;;  %v1157_v20 = vpop.f32.mrb[11].mxu1  ;;  %v1210_v23 = vpop.f32.mrb[9].mxu0 }
 0x10e   : > { %v652_v21 = vrot.slane %v1155_v17, 1  ;;  %v1211_v25 = vadd.f32 %v1210_v23, %v1209_v22  ;;  %v1212_v26 = vpop.f32.mrb[10].mxu0 }
 0x10f   : > { %831 = vadd.xlane.f32.xlu1 %v824_v19  ;;  %v1213_v28 = vpop.f32.mrb[11].mxu0 }
 0x110   : > { %v653_v24 = vsel %vm644_vm0, %v650_v5, %v652_v21 }
 0x111   : > { %v805_v27 = vadd.f32 %v1208_v13, %v653_v24 }
 0x113   : > { %v825_v29 = vadd.f32 %v1097_v58, %v805_v27 }
 0x115   : > { %833 = vadd.xlane.f32.xlu1 %v825_v29 }
 0x11a   : > { %v1175_v30 = vpop.f32.mrb[12].mxu1 }
 0x11b   : > { %v1176_v31 = vpop.f32.mrb[13].mxu1 }
 0x11c   : > { %v1177_v32 = vadd.f32 %v1176_v31, %v1175_v30  ;;  %v1178_v33 = vpop.f32.mrb[14].mxu1 }
 0x11d   : > { %v1179_v34 = vpop.f32.mrb[15].mxu1 }
 0x11e   : > { %v660_v35 = vrot.slane %v1177_v32, 1 }
 0x120   : > { %v662_v36 = vsel %vm644_vm0, %v652_v21, %v660_v35 }
 0x121   : > { %v810_v37 = vadd.f32 %v1211_v25, %v662_v36 }
 0x123   : > { %v826_v38 = vadd.f32 %v1097_v58, %v810_v37 }
 0x125   : > { %835 = vadd.xlane.f32.xlu0 %v826_v38 }
 0x194   : > { %v828_v39 = vpop.xlane.xlu0 %827 }
 0x195   : > { %v838_v40 = vmul.f32 0.0078125, %v828_v39 }
 0x197   : > { %v843_v41 = vsub.f32 %v822_v0, %v838_v40 }
 0x199   : > { %v848_v42 = vmul.f32 %v843_v41, %v843_v41 }
 0x19a   : > { %v830_v43 = vpop.xlane.xlu0 %829 }
 0x19b   : > { %v839_v44 = vmul.f32 0.0078125, %v830_v43  ;;  %853 = vadd.xlane.f32.xlu1 %v848_v42 }
 0x19c   : > { %v832_v45 = vpop.xlane.xlu1 %831 }
 0x19d   : > { %v844_v46 = vsub.f32 %v823_v16, %v839_v44  ;;  %v840_v47 = vmul.f32 0.0078125, %v832_v45 }
 0x19f   : > { %v845_v48 = vsub.f32 %v824_v19, %v840_v47  ;;  %v849_v49 = vmul.f32 %v844_v46, %v844_v46 }
 0x1a1   : > { %855 = vadd.xlane.f32.xlu0 %v849_v49  ;;  %v850_v50 = vmul.f32 %v845_v48, %v845_v48 }
 0x1a2   : > { %v834_v51 = vpop.xlane.xlu1 %833 }
 0x1a3   : > { %v841_v52 = vmul.f32 0.0078125, %v834_v51  ;;  %857 = vadd.xlane.f32.xlu1 %v850_v50 }
 0x1a5   : > { %v846_v53 = vsub.f32 %v825_v29, %v841_v52 }
 0x1a7   : > { %v851_v54 = vmul.f32 %v846_v53, %v846_v53 }
 0x1a9   : > { %859 = vadd.xlane.f32.xlu0 %v851_v54 }
 0x1b2   : > { %v836_v55 = vpop.xlane.xlu0 %835 }
 0x1b3   : > { %v842_v56 = vmul.f32 0.0078125, %v836_v55 }
 0x1b5   : > { %v847_v57 = vsub.f32 %v826_v38, %v842_v56 }
 0x1b7   : > { %v852_v58 = vmul.f32 %v847_v57, %v847_v57 }
 0x1b9   : > { %861 = vadd.xlane.f32.xlu1 %v852_v58 }
 0x228   : > { %v854_v59 = vpop.xlane.xlu1 %853 }
 0x229   : > { %v863_v60 = vmul.f32 0.007874016, %v854_v59 }
 0x22b   : > { %v868_v61 = vadd.f32 1e-05, %v863_v60 }
 0x22d   : > { %1284 = vrsqrt.f32 %v868_v61 }
 0x22e   : > { %v856_v62 = vpop.xlane.xlu0 %855 }
 0x22f   : > { %v864_v63 = vmul.f32 0.007874016, %v856_v62 }
 0x230   : > { %v858_v0 = vpop.xlane.xlu1 %857 }
 0x231   : > { %v869_v1 = vadd.f32 1e-05, %v864_v63  ;;  %v865_v2 = vmul.f32 0.007874016, %v858_v0 }
 0x233   : > { %1286 = vrsqrt.f32 %v869_v1  ;;  %v870_v3 = vadd.f32 1e-05, %v865_v2 }
 0x235   : > { %1288 = vrsqrt.f32 %v870_v3 }
 0x236   : > { %v860_v4 = vpop.xlane.xlu0 %859 }
 0x237   : > { %v1285_v5 = vpop.eup %1284  ;;  %v866_v6 = vmul.f32 0.007874016, %v860_v4 }
 0x238   : > { %v878_v7 = vmul.f32 %v1285_v5, %v843_v41 }
 0x239   : > { %v871_v9 = vadd.f32 1e-05, %v866_v6 }
 0x23a   : > { %v890_v10 = vmul.f32 %v1098_v8, %v878_v7 }
 0x23b   : > { %1290 = vrsqrt.f32 %v871_v9 }
 0x23c   : > { %v902_v15 = vadd.f32 %v1099_v12, %v890_v10 }
 0x23d   : > { %v1287_v11 = vpop.eup %1286 }
 0x23e   : > { %v879_v13 = vmul.f32 %v1287_v11, %v844_v46  ;;  %v907_v19 = vmax.f32 %v902_v15, 0.0 }
 0x23f   : > { %v1289_v14 = vpop.eup %1288 }
 0x240   : > { %v891_v16 = vmul.f32 %v1098_v8, %v879_v13  ;;  %v880_v17 = vmul.f32 %v1289_v14, %v845_v48 }
 0x242   : > { %v903_v18 = vadd.f32 %v1099_v12, %v891_v16  ;;  %v892_v21 = vmul.f32 %v1098_v8, %v880_v17 }
 0x244   : > { %v908_v20 = vmax.f32 %v903_v18, 0.0  ;;  %v904_v27 = vadd.f32 %v1099_v12, %v892_v21 }
 0x245   : > { %v1291_v22 = vpop.eup %1290 }
 0x246   : > { %v1117_v23 = vpack.c.bf16 %v908_v20, %v907_v19  ;;  %v881_v24 = vmul.f32 %v1291_v22, %v846_v53  ;;  %v862_v25 = vpop.xlane.xlu1 %861  ;;  %v909_v31 = vmax.f32 %v904_v27, 0.0 }
 0x247   : > { %v867_v26 = vmul.f32 0.007874016, %v862_v25 }
 0x248   : > { %1118 = vst [vmem:[%s340_s26] sm:$0xff] %v1117_v23   ;;  %v893_v28 = vmul.f32 %v1098_v8, %v881_v24 }
 0x249   : > { %v872_v29 = vadd.f32 1e-05, %v867_v26 }
 0x24a   : > { %v905_v30 = vadd.f32 %v1099_v12, %v893_v28 }
 0x24b   : > { %1292 = vrsqrt.f32 %v872_v29 }
 0x24c   : > { %v910_v32 = vmax.f32 %v905_v30, 0.0 }
 0x24e   : > { %v1122_v33 = vpack.c.bf16 %v910_v32, %v909_v31 }
 0x250   : > { %1124 = vst [vmem:[%s340_s26 + $0x8] sm:$0xff] %v1122_v33  }
 0x255   : > { %v1293_v34 = vpop.eup %1292 }
 0x256   : > { %v882_v35 = vmul.f32 %v1293_v34, %v847_v57 }
 0x258   : > { %v894_v36 = vmul.f32 %v1098_v8, %v882_v35 }
 0x25a   : > { %v906_v37 = vadd.f32 %v1099_v12, %v894_v36 }
 0x25c   : > { %v911_v38 = vmax.f32 %v906_v37, 0.0 }
 0x25e   : > { %v1113_v39 = vpack.c.bf16 %v911_v38, %v911_v38 }
 0x260   : > { %937 = vst [vmem:[%s340_s26 + $0x10] sm:$0xf] %v1113_v39 }
 0x261 PF: > { %s16_s23 = sadd.s32 1, %s1316_s23   ;;  %s1566_s21 = smov %s1312_s22 }
 0x262   : > { %p13_p5 = scmp.ge.s32.totalorder %s16_s23, 4   ;;  %s1567_s22 = smov %s1569_s24 }
 0x264   :  { %15 = sbr.rel (!%p13_p5) target bundleno = 2 (0x2), region = 77 }

// kernel: cpc_encoder_forward.7
= control target key start
LH: loop header
LB: loop body
LE: loop exit
PB: predicated region body
PF: predicated region fallthrough
CT: control target
= control target key end

     0   :  { %s1223_s21 = smov 0   ;;  %s1225_s22 = smov 0   ;;  %s1411_s0 = inlined_call_operand.vmem [shape: bf16[2,48,256], index: 0, kind: input, shape index: {}, may-alias: {0,1}]   ;;  %s1412_s1 = inlined_call_operand.vmem [shape: bf16[2,48,256], index: 1, kind: input, shape index: {}, may-alias: {0,1}]   ;;  %s1413_s2 = inlined_call_operand.vmem [shape: bf16[512,128], index: 2, kind: input, shape index: {}]   ;;  %s1414_s3 = inlined_call_operand.vmem [shape: f32[1,128], index: 3, kind: input, shape index: {}]   ;;  %s1415_s4 = inlined_call_operand.vmem [shape: f32[1,128], index: 4, kind: input, shape index: {}]   ;;  %s1416_s5 = inlined_call_operand.vmem [shape: f32[1,128], index: 5, kind: input, shape index: {}]   ;;  %s1417_s6 = inlined_call_operand.vmem [shape: f32[2,24,128], index: 6, kind: output, shape index: {}]  }
   0x1   :  { %s1227_s23 = smov 0  }
   0x2 LB: > { %s28_s24 = sadd.s32 1, %s1182_s22  ;;  %p964_p0 = scmp.ge.s32.totalorder %s1186_s23, 1  ;;  %s1186_s23 = sphi %s1227_s23, %s16_s23   ;;  %s1182_s22 = sphi %s1225_s22, %s1419_s22   ;;  %s1178_s21 = sphi %s1223_s21, %s1418_s21  }
   0x3   : > { %p30_p1 = scmp.ge.s32.totalorder %s28_s24, 2  ;;  %p258_p2 = scmp.lt.s32.totalorder %s1186_s23, 3 }
   0x5   : > { %s1421_s24 = smov (%p30_p1, %s28_s24), 0  ;;  %p259_p3 = pnand %p964_p0, %p258_p2 }
   0x6   : > { %v1244_v0 = vld [vmem:[%s1413_s2 + $0xc0] sm:$0xff] (!%p259_p3)   ;;  %p309_p4 = scmp.lt.s32.totalorder (!%p259_p3), %s1178_s21, 1  ;;  %v1255_v2 = vld [vmem:[%s1413_s2 + $0xc8] sm:$0xff] (!%p259_p3)   ;;  %v1275_v6 = vld [vmem:[%s1413_s2 + $0xd0] sm:$0xff] (!%p259_p3)   ;;  %vm622_vm0 = vcmask (!%p259_p3), 1046528  }
   0x7   : > { %262 = sbr.rel (%p259_p3) target bundleno = 607 (0x25f), region = 44  ;;  %v1249_v1 = vld [vmem:[%s1413_s2 + $0x80] sm:$0xff] (!%p259_p3)   ;;  %1013 = vmatprep.subr.bf16.mxu1 (!%p259_p3), %v1244_v0  ;;  %v1261_v3 = vld [vmem:[%s1413_s2 + $0x88] sm:$0xff] (!%p259_p3)   ;;  %v1281_v7 = vld [vmem:[%s1413_s2 + $0x90] sm:$0xff] (!%p259_p3)  }
   0x8   : > { %1014 = vmatpush3.bf16.msra.mxu1 (!%p259_p3), %v1249_v1  ;;  %v1123_v4 = vld [vmem:[%s1413_s2 + $0x40] sm:$0xff] (!%p259_p3)   ;;  %v1127_v8 = vld [vmem:[%s1413_s2 + $0x48] sm:$0xff] (!%p259_p3)   ;;  %v1293_v10 = vld [vmem:[%s1413_s2 + $0xd8] sm:$0xff] (!%p259_p3)  }
   0x9   : > { %1015 = vmatprep.subr.bf16.mxu1 (!%p259_p3), %v1255_v2  ;;  %v1124_v5 = vld [vmem:[%s1413_s2] sm:$0xff] (!%p259_p3)   ;;  %1063 = vmatprep.subr.bf16.mxu0 (!%p259_p3), %v1123_v4  ;;  %v1128_v9 = vld [vmem:[%s1413_s2 + $0x8] sm:$0xff] (!%p259_p3)   ;;  %v1299_v11 = vld [vmem:[%s1413_s2 + $0x98] sm:$0xff] (!%p259_p3)  }
   0xa   : > { %1064 = vmatpush3.bf16.msra.mxu0 (!%p259_p3), %v1124_v5  ;;  %v1131_v12 = vld [vmem:[%s1413_s2 + $0x50] sm:$0xff] (!%p259_p3)   ;;  %v1311_v14 = vld [vmem:[%s1413_s2 + $0xe0] sm:$0xff] (!%p259_p3)   ;;  %v1135_v16 = vld [vmem:[%s1413_s2 + $0x58] sm:$0xff] (!%p259_p3)  }
   0xb   : > { %1065 = vmatprep.subr.bf16.mxu0 (!%p259_p3), %v1127_v8  ;;  %v1132_v13 = vld [vmem:[%s1413_s2 + $0x10] sm:$0xff] (!%p259_p3)   ;;  %v1317_v15 = vld [vmem:[%s1413_s2 + $0xa0] sm:$0xff] (!%p259_p3)   ;;  %v1136_v17 = vld [vmem:[%s1413_s2 + $0x18] sm:$0xff] (!%p259_p3)  }
   0xc   : > { %1016 = vmatpush3.bf16.msra.mxu1 (!%p259_p3), %v1261_v3  ;;  %v1137_v18 = vld [vmem:[%s1413_s2 + $0xe8] sm:$0xff] (!%p259_p3)   ;;  %v1139_v20 = vld [vmem:[%s1413_s2 + $0x60] sm:$0xff] (!%p259_p3)   ;;  %v1141_v22 = vld [vmem:[%s1413_s2 + $0xf0] sm:$0xff] (!%p259_p3)  }
   0xd   : > { %1017 = vmatprep.subr.bf16.mxu1 (!%p259_p3), %v1275_v6  ;;  %v1138_v19 = vld [vmem:[%s1413_s2 + $0xa8] sm:$0xff] (!%p259_p3)   ;;  %v1140_v21 = vld [vmem:[%s1413_s2 + $0x20] sm:$0xff] (!%p259_p3)   ;;  %v1142_v23 = vld [vmem:[%s1413_s2 + $0xb0] sm:$0xff] (!%p259_p3)  }
   0xe   : > { %s1423_s21 = smov (!%p309_p4, %s1178_s21), 1  ;;  %1066 = vmatpush3.bf16.msra.mxu0 %v1128_v9  ;;  %v1143_v24 = vld [vmem:[%s1413_s2 + $0x68] sm:$0xff]   ;;  %v1145_v26 = vld [vmem:[%s1413_s2 + $0xf8] sm:$0xff]   ;;  %v1147_v28 = vld [vmem:[%s1413_s2 + $0x70] sm:$0xff]  }
   0xf   : > { %1067 = vmatprep.subr.bf16.mxu0 %v1131_v12  ;;  %s1091_s9 = smul.u32 48, %s1423_s21  ;;  %v1144_v25 = vld [vmem:[%s1413_s2 + $0x28] sm:$0xff]   ;;  %v1146_v27 = vld [vmem:[%s1413_s2 + $0xb8] sm:$0xff]   ;;  %v1148_v29 = vld [vmem:[%s1413_s2 + $0x30] sm:$0xff]  }
  0x10   : > { %1018 = vmatpush3.bf16.msra.mxu1 %v1281_v7  ;;  %v1152_v32 = vld [vmem:[%s1413_s2 + $0x78] sm:$0xff]   ;;  %v1006_v56 = vld [vmem:[%s1414_s3] ss:$0 sm:$0xff]  ;;  %s1093_s17 = smul.u32 24, %s1423_s21 }
  0x11   : > { %1019 = vmatprep.subr.bf16.mxu1 %v1293_v10  ;;  %s317_s20 = scalar_lea.vmem %s1411_s0, %s1091_s9  ;;  %s1012_s29 = sadd.s32 24, %s1091_s9  ;;  %v1153_v33 = vld [vmem:[%s1413_s2 + $0x38] sm:$0xff]  }
  0x12   : > { %1068 = vmatpush3.bf16.msra.mxu0 %v1132_v13  ;;  %v1149_v30 = vld [vmem:[%s317_s20] ss:$8 sps:$4 sm:$0xff]   ;;  %v1151_v31 = vld [vmem:[%s317_s20 + $0x4] ss:$8 sps:$4 sm:$0xff]   ;;  %v345_v34 = vld [vmem:[%s317_s20 + $0x10] sm:$0xff]  ;;  %s329_s9 = scalar_lea.vmem %s1412_s1, %s1012_s29  ;;  %s340_s26 = scalar_lea.vmem %s1417_s6, %s1093_s17 }
  0x13   : > { %1069 = vmatprep.subr.bf16.mxu0 %v1135_v16  ;;  %555 = vmatprep.mubr.bf16.mxu1 %v1151_v31  ;;  %v971_v35 = vcombine.high %v345_v34, %v345_v34  ;;  %v571_v36 = vld [vmem:[%s329_s9] sm:$0xff]  ;;  %v970_v37 = vcombine.low %v345_v34, %v345_v34 }
  0x14   : > { %1020 = vmatpush3.bf16.msra.mxu1 %v1299_v11  ;;  %763 = vmatprep.mubr.bf16.mxu0 %v1151_v31  ;;  %v989_v38 = vcombine.high %v571_v36, %v571_v36  ;;  %v988_v39 = vcombine.low %v571_v36, %v571_v36  ;;  %v1007_v36 = vld [vmem:[%s1415_s4] ss:$0 sm:$0xff] }
  0x15   : > { %1021 = vmatprep.subr.bf16.mxu1 %v1311_v14 }
  0x16   : > { %1070 = vmatpush3.bf16.msra.mxu0 %v1136_v17 }
  0x17   : > { %1071 = vmatprep.subr.bf16.mxu0 %v1139_v20 }
  0x18   : > { %1022 = vmatpush3.bf16.msra.mxu1 %v1317_v15 }
  0x19   : > { %1023 = vmatprep.subr.bf16.mxu1 %v1137_v18 }
  0x1a   : > { %1072 = vmatpush3.bf16.msra.mxu0 %v1140_v21 }
  0x1b   : > { %1073 = vmatprep.subr.bf16.mxu0 %v1143_v24 }
  0x1c   : > { %1024 = vmatpush3.bf16.msra.mxu1 %v1138_v19 }
  0x1d   : > { %1025 = vmatprep.subr.bf16.mxu1 %v1141_v22 }
  0x1e   : > { %1074 = vmatpush3.bf16.msra.mxu0 %v1144_v25 }
  0x1f   : > { %1075 = vmatprep.subr.bf16.mxu0 %v1147_v28 }
  0x20   : > { %1026 = vmatpush3.bf16.msra.mxu1 %v1142_v23 }
  0x21   : > { %1027 = vmatprep.subr.bf16.mxu1 %v1145_v26 }
  0x22   : > { %1076 = vmatpush3.bf16.msra.mxu0 %v1148_v29 }
  0x23   : > { %1077 = vmatprep.subr.bf16.mxu0 %v1152_v32 }
  0x24   : > { %1028 = vmatpush3.bf16.msra.mxu1 %v1146_v27 }
  0x25   : > { %1041 = vmatprep.subr.bf16.mxu1 %v1244_v0 }
  0x26   : > { %1078 = vmatpush3.bf16.msra.mxu0 %v1153_v33 }
  0x27   : > { %556 = vmatmul.mubr.bf16.vlgmr.msra.gmra.mrb[0].mxu1 %v1149_v30 }
  0x28   : > { %1042 = vmatpush3.bf16.msra.mxu1 %v1249_v1  ;;  %563 = vmatprep.mubr.bf16.mxu1 %v971_v35 }
  0x29   : > { %1043 = vmatprep.subr.bf16.mxu1 %v1255_v2  ;;  %764 = vmatmul.mubr.bf16.vlgmr.msra.gmra.mrb[0].mxu0 %v1149_v30 }
  0x2a   : > { %771 = vmatprep.mubr.bf16.mxu0 %v971_v35 }
  0x2c   : > { %1044 = vmatpush3.bf16.msra.mxu1 %v1261_v3 }
  0x2d   : > { %1045 = vmatprep.subr.bf16.mxu1 %v1275_v6 }
  0x2f   : > { %564 = vmatmul.mubr.bf16.gmra.mrb[4].mxu1 %v970_v37 }
  0x30   : > { %1046 = vmatpush3.bf16.msra.mxu1 %v1281_v7  ;;  %611 = vmatprep.mubr.bf16.mxu1 %v989_v38  ;;  %v1008_v38 = vld [vmem:[%s1416_s5] ss:$0 sm:$0xff] }
  0x31   : > { %1047 = vmatprep.subr.bf16.mxu1 %v1293_v10  ;;  %772 = vmatmul.mubr.bf16.gmra.mrb[4].mxu0 %v970_v37 }
  0x34   : > { %1048 = vmatpush3.bf16.msra.mxu1 %v1299_v11 }
  0x35   : > { %1049 = vmatprep.subr.bf16.mxu1 %v1311_v14 }
  0x38   : > { %1050 = vmatpush3.bf16.msra.mxu1 %v1317_v15 }
  0x39   : > { %1051 = vmatprep.subr.bf16.mxu1 %v1137_v18 }
  0x3c   : > { %1052 = vmatpush3.bf16.msra.mxu1 %v1138_v19 }
  0x3d   : > { %1053 = vmatprep.subr.bf16.mxu1 %v1141_v22 }
  0x40   : > { %1054 = vmatpush3.bf16.msra.mxu1 %v1142_v23 }
  0x41   : > { %1055 = vmatprep.subr.bf16.mxu1 %v1145_v26 }
  0x44   : > { %1056 = vmatpush3.bf16.msra.mxu1 %v1146_v27 }
  0x47   : > { %612 = vmatmul.mubr.bf16.vlgmr.msra.gmra.mrb[8].mxu1 %v988_v39 }
  0xfa   : > { %v1029_v40 = vpop.f32.mrb[0].mxu1 }
  0xfb   : > { %v1030_v41 = vpop.f32.mrb[1].mxu1 }
  0xfc   : > { %v1031_v42 = vadd.f32 %v1030_v41, %v1029_v40  ;;  %v1032_v43 = vpop.f32.mrb[2].mxu1  ;;  %v1079_v46 = vpop.f32.mrb[0].mxu0 }
  0xfd   : > { %v1033_v44 = vpop.f32.mrb[3].mxu1  ;;  %v1080_v47 = vpop.f32.mrb[1].mxu0 }
  0xfe   : > { %v1034_v45 = vadd.f32 %v1033_v44, %v1032_v43  ;;  %v623_v48 = vrot.slane %v1031_v42, 1  ;;  %v1081_v50 = vadd.f32 %v1080_v47, %v1079_v46  ;;  %v1082_v51 = vpop.f32.mrb[2].mxu0 }
  0xff   : > { %v1083_v52 = vpop.f32.mrb[3].mxu0 }
 0x100   : > { %v624_v49 = vrot.slane %v1034_v45, 1  ;;  %v1084_v55 = vadd.f32 %v1083_v52, %v1082_v51 }
 0x102   : > { %v625_v53 = vsel %vm622_vm0, %v623_v48, %v624_v49  ;;  %v1035_v54 = vpop.f32.mrb[4].mxu1 }
 0x103   : > { %v766_v57 = vadd.f32 %v1081_v50, %v625_v53  ;;  %v1036_v58 = vpop.f32.mrb[5].mxu1 }
 0x104   : > { %v1037_v59 = vadd.f32 %v1036_v58, %v1035_v54  ;;  %v1038_v60 = vpop.f32.mrb[6].mxu1  ;;  %v1085_v0 = vpop.f32.mrb[4].mxu0 }
 0x105   : > { %v786_v61 = vadd.f32 %v1006_v56, %v766_v57  ;;  %v1039_v62 = vpop.f32.mrb[7].mxu1  ;;  %v1086_v1 = vpop.f32.mrb[5].mxu0 }
 0x106   : > { %v626_v63 = vrot.slane %v1037_v59, 1  ;;  %v1087_v3 = vadd.f32 %v1086_v1, %v1085_v0  ;;  %v1088_v4 = vpop.f32.mrb[6].mxu0 }
 0x107   : > { %789 = vadd.xlane.f32.xlu0 %v786_v61  ;;  %v1089_v6 = vpop.f32.mrb[7].mxu0 }
 0x108   : > { %v627_v2 = vsel %vm622_vm0, %v624_v49, %v626_v63 }
 0x109   : > { %v769_v5 = vadd.f32 %v1084_v55, %v627_v2 }
 0x10b   : > { %v787_v7 = vadd.f32 %v1006_v56, %v769_v5 }
 0x10d   : > { %791 = vadd.xlane.f32.xlu0 %v787_v7 }
 0x11a   : > { %v1057_v8 = vpop.f32.mrb[8].mxu1 }
 0x11b   : > { %v1058_v9 = vpop.f32.mrb[9].mxu1 }
 0x11c   : > { %v1059_v10 = vadd.f32 %v1058_v9, %v1057_v8  ;;  %v1060_v11 = vpop.f32.mrb[10].mxu1 }
 0x11d   : > { %v1061_v12 = vpop.f32.mrb[11].mxu1 }
 0x11e   : > { %v632_v13 = vrot.slane %v1059_v10, 1 }
 0x120   : > { %v634_v14 = vsel %vm622_vm0, %v626_v63, %v632_v13 }
 0x121   : > { %v774_v15 = vadd.f32 %v1087_v3, %v634_v14 }
 0x123   : > { %v788_v16 = vadd.f32 %v1006_v56, %v774_v15 }
 0x125   : > { %793 = vadd.xlane.f32.xlu1 %v788_v16 }
 0x194   : > { %v790_v17 = vpop.xlane.xlu0 %789 }
 0x195   : > { %v796_v18 = vmul.f32 0.0078125, %v790_v17 }
 0x197   : > { %v799_v19 = vsub.f32 %v786_v61, %v796_v18 }
 0x199   : > { %v802_v20 = vmul.f32 %v799_v19, %v799_v19 }
 0x19a   : > { %v792_v21 = vpop.xlane.xlu0 %791 }
 0x19b   : > { %v797_v22 = vmul.f32 0.0078125, %v792_v21  ;;  %805 = vadd.xlane.f32.xlu1 %v802_v20 }
 0x19d   : > { %v800_v23 = vsub.f32 %v787_v7, %v797_v22 }
 0x19f   : > { %v803_v24 = vmul.f32 %v800_v23, %v800_v23 }
 0x1a1   : > { %807 = vadd.xlane.f32.xlu0 %v803_v24 }
 0x1b2   : > { %v794_v25 = vpop.xlane.xlu1 %793 }
 0x1b3   : > { %v798_v26 = vmul.f32 0.0078125, %v794_v25 }
 0x1b5   : > { %v801_v27 = vsub.f32 %v788_v16, %v798_v26 }
 0x1b7   : > { %v804_v28 = vmul.f32 %v801_v27, %v801_v27 }
 0x1b9   : > { %809 = vadd.xlane.f32.xlu1 %v804_v28 }
 0x228   : > { %v806_v29 = vpop.xlane.xlu1 %805 }
 0x229   : > { %v811_v30 = vmul.f32 0.007874016, %v806_v29 }
 0x22b   : > { %v814_v31 = vadd.f32 1e-05, %v811_v30 }
 0x22d   : > { %1158 = vrsqrt.f32 %v814_v31 }
 0x22e   : > { %v808_v32 = vpop.xlane.xlu0 %807 }
 0x22f   : > { %v812_v33 = vmul.f32 0.007874016, %v808_v32 }
 0x231   : > { %v815_v34 = vadd.f32 1e-05, %v812_v33 }
 0x233   : > { %1160 = vrsqrt.f32 %v815_v34 }
 0x237   : > { %v1159_v35 = vpop.eup %1158 }
 0x238   : > { %v820_v37 = vmul.f32 %v1159_v35, %v799_v19 }
 0x23a   : > { %v830_v39 = vmul.f32 %v1007_v36, %v820_v37 }
 0x23c   : > { %v840_v40 = vadd.f32 %v1008_v38, %v830_v39 }
 0x23d   : > { %v1161_v41 = vpop.eup %1160 }
 0x23e   : > { %v843_v42 = vmax.f32 %v840_v40, 0.0  ;;  %v821_v43 = vmul.f32 %v1161_v41, %v800_v23 }
 0x240   : > { %846 = vst [vmem:[%s340_s26] sm:$0xff] %v843_v42  ;;  %v831_v44 = vmul.f32 %v1007_v36, %v821_v43 }
 0x242   : > { %v841_v45 = vadd.f32 %v1008_v38, %v831_v44 }
 0x244   : > { %v844_v46 = vmax.f32 %v841_v45, 0.0 }
 0x246   : > { %847 = vst [vmem:[%s340_s26 + $0x8] sm:$0xff] %v844_v46  ;;  %v810_v47 = vpop.xlane.xlu1 %809 }
 0x247   : > { %v813_v48 = vmul.f32 0.007874016, %v810_v47 }
 0x249   : > { %v816_v49 = vadd.f32 1e-05, %v813_v48 }
 0x24b   : > { %1162 = vrsqrt.f32 %v816_v49 }
 0x255   : > { %v1163_v50 = vpop.eup %1162 }
 0x256   : > { %v822_v51 = vmul.f32 %v1163_v50, %v801_v27 }
 0x258   : > { %v832_v52 = vmul.f32 %v1007_v36, %v822_v51 }
 0x25a   : > { %v842_v53 = vadd.f32 %v1008_v38, %v832_v52 }
 0x25c   : > { %v845_v54 = vmax.f32 %v842_v53, 0.0 }
 0x25e   : > { %848 = vst [vmem:[%s340_s26 + $0x10] sm:$0xff] %v845_v54 }
 0x25f PF: > { %s16_s23 = sadd.s32 1, %s1186_s23   ;;  %s1418_s21 = smov %s1182_s22 }
 0x260   : > { %p13_p5 = scmp.ge.s32.totalorder %s16_s23, 4   ;;  %s1419_s22 = smov %s1421_s24 }
 0x262   :  { %15 = sbr.rel (!%p13_p5) target bundleno = 2 (0x2), region = 77 }

</bundles_post_ra>
